<compile_context>
chip_gen: v7x
topology: tpu7x:2x2x1
jax: 0.10.0
libtpu: 0.0.40
codegen_flags: <defaults>
</compile_context>

<pallas_src>
import functools

import jax
import jax.numpy as jnp
from jax.experimental import pallas as pl
from jax.experimental.pallas import tpu as pltpu


# --------------------------- Generic dense kernel -------------------------- #

def _dense_kernel(x_ref, w_ref, b_ref, o_ref, acc_ref, *, activation):
    """Grid = (M tiles, K tiles). acc = bias; acc += x@w; act+store on last k."""
    k = pl.program_id(1)

    @pl.when(k == 0)
    def _():
        # Fold the bias into the accumulator init (broadcast (1, N) over rows).
        acc_ref[...] = jnp.zeros_like(acc_ref) + b_ref[...].astype(jnp.float32)

    acc_ref[...] += jnp.dot(
        x_ref[...], w_ref[...], preferred_element_type=jnp.float32
    )

    @pl.when(k == pl.num_programs(1) - 1)
    def _():
        y = acc_ref[...]
        if activation == "relu":
            y = jnp.maximum(y, 0.0)
        elif activation == "tanh":
            y = jnp.tanh(y)
        o_ref[...] = y.astype(o_ref.dtype)


def _pick_tile(dim, candidates):
    """Largest aligned candidate that evenly divides `dim`, else the full dim."""
    for c in candidates:
        if dim > c and dim % c == 0:
            return c
    return dim


def dense(x, w, b, activation="none", out_dtype=jnp.float32):
    """act(x @ w + b) with M-tiling (parallel) and K-tiling (arbitrary)."""
    M, K = x.shape
    K2, N = w.shape
    assert K == K2, (K, K2)

    tm = _pick_tile(M, (256,))        # conv matmuls: 512 -> 2 parallel M tiles
    tk = _pick_tile(K, (2048,))
    grid = (M // tm, K // tk)

    kernel = functools.partial(_dense_kernel, activation=activation)
    return pl.pallas_call(
        kernel,
        out_shape=jax.ShapeDtypeStruct((M, N), out_dtype),
        grid_spec=pltpu.PrefetchScalarGridSpec(
            num_scalar_prefetch=0,
            grid=grid,
            in_specs=[
                pl.BlockSpec((tm, tk), lambda m, k: (m, k)),
                pl.BlockSpec((tk, N), lambda m, k: (k, 0)),
                pl.BlockSpec((1, N), lambda m, k: (0, 0)),
            ],
            out_specs=pl.BlockSpec((tm, N), lambda m, k: (m, 0)),
            scratch_shapes=[pltpu.VMEM((tm, N), jnp.float32)],
        ),
        compiler_params=pltpu.CompilerParams(
            dimension_semantics=("parallel", "arbitrary"),
            vmem_limit_bytes=32 * 1024 * 1024,
        ),
    )(x, w, b.reshape(1, N))


# --------------------------- Fused MLP-head kernel -------------------------- #

def _mlp_head_kernel(h_ref, w0_ref, b0_ref, *rest, n_extra):
    """Grid = (K tiles of the first layer,).

    rest = [w1,b1, ..., w_{n_extra},b_{n_extra}, out_w, out_b, o_ref, acc_ref].
    First layer accumulates across the K grid; on the last step the remaining
    (tiny) hidden layers + output projection run entirely in VMEM.
    """
    extra = rest[: 2 * n_extra]
    out_w_ref, out_b_ref, o_ref, acc_ref = rest[2 * n_extra:]
    k = pl.program_id(0)

    @pl.when(k == 0)
    def _():
        acc_ref[...] = jnp.zeros_like(acc_ref) + b0_ref[...].astype(jnp.float32)

    acc_ref[...] += jnp.dot(
        h_ref[...], w0_ref[...], preferred_element_type=jnp.float32
    )

    @pl.when(k == pl.num_programs(0) - 1)
    def _():
        a = jnp.tanh(acc_ref[...])                      # first hidden activation
        for i in range(n_extra):                        # remaining hidden layers
            w_ref, b_ref = extra[2 * i], extra[2 * i + 1]
            a = jnp.tanh(
                jnp.dot(a.astype(w_ref.dtype), w_ref[...],
                        preferred_element_type=jnp.float32)
                + b_ref[...].astype(jnp.float32))
        o_ref[...] = (                                  # identity output layer
            jnp.dot(a.astype(out_w_ref.dtype), out_w_ref[...],
                    preferred_element_type=jnp.float32)
            + out_b_ref[...].astype(jnp.float32)
        ).astype(o_ref.dtype)


def mlp_head(h, layers, out_w, out_b, out_dtype=jnp.float32):
    """Fused n_layers x (Linear+Tanh) + output Linear in ONE pallas_call."""
    B, K0 = h.shape
    w0, b0 = layers[0]
    N0 = w0.shape[1]
    tk = _pick_tile(K0, (2048,))      # 64*H*W = 16384 -> 8 pipelined K tiles
    grid = (K0 // tk,)

    n_extra = len(layers) - 1
    extra_inputs, extra_specs = [], []
    for w, b in layers[1:]:
        extra_inputs += [w, b.reshape(1, -1)]
        extra_specs += [
            pl.BlockSpec(w.shape, lambda k: (0, 0)),
            pl.BlockSpec((1, b.shape[0]), lambda k: (0, 0)),
        ]

    ac_dim = out_w.shape[1]
    kernel = functools.partial(_mlp_head_kernel, n_extra=n_extra)
    return pl.pallas_call(
        kernel,
        out_shape=jax.ShapeDtypeStruct((B, ac_dim), out_dtype),
        grid_spec=pltpu.PrefetchScalarGridSpec(
            num_scalar_prefetch=0,
            grid=grid,
            in_specs=[
                pl.BlockSpec((B, tk), lambda k: (0, k)),
                pl.BlockSpec((tk, N0), lambda k: (k, 0)),
                pl.BlockSpec((1, N0), lambda k: (0, 0)),
            ] + extra_specs + [
                pl.BlockSpec(out_w.shape, lambda k: (0, 0)),
                pl.BlockSpec((1, ac_dim), lambda k: (0, 0)),
            ],
            out_specs=pl.BlockSpec((B, ac_dim), lambda k: (0, 0)),
            scratch_shapes=[pltpu.VMEM((B, N0), jnp.float32)],
        ),
        compiler_params=pltpu.CompilerParams(
            dimension_semantics=("arbitrary",),
            vmem_limit_bytes=32 * 1024 * 1024,
        ),
    )(h, w0, b0.reshape(1, N0), *extra_inputs, out_w, out_b.reshape(1, ac_dim))


# ------------------------------- Conv glue --------------------------------- #

def im2col_same(x_nhwc, k):
    """'same'-padding im2col -> (B*H*W, k*k*C). Column order = (dy, dx, c)."""
    p = k // 2
    B, H, W, C = x_nhwc.shape
    xp = jnp.pad(x_nhwc, ((0, 0), (p, p), (p, p), (0, 0)))
    cols = [xp[:, dy:dy + H, dx:dx + W, :] for dy in range(k) for dx in range(k)]
    patches = jnp.concatenate(cols, axis=-1)          # (B, H, W, k*k*C)
    return patches.reshape(B * H * W, k * k * C)


# --------------------------- Parameter creation ----------------------------- #
# Parameters are created in PyTorch-native layouts (conv OIHW, linear (out,in))
# and converted once, host-side, into fused / permuted / bf16 inference params.

def _init_conv(key, cout, cin, k):
    kw, kb = jax.random.split(key)
    bound = 1.0 / jnp.sqrt(jnp.float32(cin * k * k))
    w = jax.random.uniform(kw, (cout, cin, k, k), jnp.float32, -bound, bound)
    b = jax.random.uniform(kb, (cout,), jnp.float32, -bound, bound)
    return w, b


def _init_linear(key, fan_out, fan_in):
    kw, kb = jax.random.split(key)
    bound = 1.0 / jnp.sqrt(jnp.float32(fan_in))
    w = jax.random.uniform(kw, (fan_out, fan_in), jnp.float32, -bound, bound)
    b = jax.random.uniform(kb, (fan_out,), jnp.float32, -bound, bound)
    return w, b


def make_torch_style_params(key, C, H, W, ac_dim, n_layers, layer_size):
    keys = jax.random.split(key, 6 + n_layers)
    params = {
        "conv3": _init_conv(keys[0], 32, C, 3),
        "conv5": _init_conv(keys[1], 32, C, 5),
        "conv7": _init_conv(keys[2], 32, C, 7),
        "mix1": _init_conv(keys[3], 64, 96, 3),
        "mix2": _init_conv(keys[4], 64, 64, 3),
    }
    hidden, in_size = [], 64 * H * W
    for i in range(n_layers):
        hidden.append(_init_linear(keys[5 + i], layer_size, in_size))
        in_size = layer_size
    params["hidden"] = hidden
    params["out"] = _init_linear(keys[5 + n_layers], ac_dim, in_size)
    params["log_std"] = jnp.zeros((ac_dim,), jnp.float32)   # nn.Parameter(0.0)
    return params


def prepare_inference_params(tp, H, W, dtype=jnp.bfloat16):
    """Fuse branch convs, pad to lane-dense widths, permute MLP weight, cast bf16."""
    def hwio(w_oihw):
        return jnp.transpose(w_oihw, (2, 3, 1, 0))    # OIHW -> HWIO

    # Fused branch convs: embed 3x3/5x5 kernels in the center of a 7x7 kernel,
    # concat cout 32+32+32 = 96, pad to 128 lanes with zero weights/zero bias.
    ws, bs = [], []
    for name, k in (("conv3", 3), ("conv5", 5), ("conv7", 7)):
        w, b = tp[name]
        w = hwio(w)                                    # (k, k, C, 32)
        s = (7 - k) // 2
        ws.append(jnp.pad(w, ((s, s), (s, s), (0, 0), (0, 0))))
        bs.append(b)
    wb = jnp.concatenate(ws, axis=-1)                  # (7, 7, C, 96)
    pad_out = 128 - wb.shape[-1]
    wb = jnp.pad(wb, ((0, 0), (0, 0), (0, 0), (0, pad_out)))
    branch_b = jnp.pad(jnp.concatenate(bs), (0, pad_out))
    C = wb.shape[2]
    branch_w = wb.reshape(49 * C, 128)

    # mix1: its input now has 128 channels (channels 96..127 are always zero);
    # pad the corresponding weight rows with zeros.
    w, mix1_b = tp["mix1"]
    w = hwio(w)                                        # (3, 3, 96, 64)
    w = jnp.pad(w, ((0, 0), (0, 0), (0, 128 - w.shape[2]), (0, 0)))
    mix1_w = w.reshape(9 * 128, 64)

    w, mix2_b = tp["mix2"]
    mix2_w = hwio(w).reshape(9 * 64, 64)

    # MLP: transpose to (in, out); permute hidden[0] rows from NCHW-flatten
    # order (c*H*W + h*W + w) to NHWC-flatten order ((h*W + w)*64 + c) so the
    # runtime NCHW transpose of conv features can be deleted.
    hidden = []
    for i, (w, b) in enumerate(tp["hidden"]):
        w = w.T                                        # (in, out)
        if i == 0:
            n_out = w.shape[1]
            w = (w.reshape(64, H, W, n_out)
                 .transpose(1, 2, 0, 3)
                 .reshape(H * W * 64, n_out))
        hidden.append((w.astype(dtype), b.astype(jnp.float32)))
    out_w, out_b = tp["out"]

    return {
        "branch_w": branch_w.astype(dtype), "branch_b": branch_b.astype(jnp.float32),
        "mix1_w": mix1_w.astype(dtype), "mix1_b": mix1_b.astype(jnp.float32),
        "mix2_w": mix2_w.astype(dtype), "mix2_b": mix2_b.astype(jnp.float32),
        "hidden": hidden,
        "out_w": out_w.T.astype(dtype), "out_b": out_b.astype(jnp.float32),
        "log_std": tp["log_std"],
    }


# ------------------------------ Forward pass -------------------------------- #

def enhanced_cnn_policy_forward(obs_nchw, ip):
    """Continuous, non-state-dependent-std, learned-std branch of forward()."""
    B, _, H, W = obs_nchw.shape
    x = jnp.transpose(obs_nchw, (0, 2, 3, 1)).astype(jnp.bfloat16)   # NCHW->NHWC

    # Fused 3x3/5x5/7x7 branch convs + ReLU: one im2col, one 128-lane matmul.
    y = dense(im2col_same(x, 7), ip["branch_w"], ip["branch_b"], "relu", jnp.bfloat16)
    y = y.reshape(B, H, W, -1)                         # (B,H,W,128), ch 96..127 == 0

    y = dense(im2col_same(y, 3), ip["mix1_w"], ip["mix1_b"], "relu", jnp.bfloat16)
    y = y.reshape(B, H, W, -1)                         # (B,H,W,64)
    y = dense(im2col_same(y, 3), ip["mix2_w"], ip["mix2_b"], "relu", jnp.bfloat16)

    # NHWC flatten; hidden[0] weight rows were pre-permuted to match, so the
    # torch.nn.Flatten-on-NCHW transpose is not needed at runtime.
    h = y.reshape(B, -1)                               # (B, 64*H*W)

    # ptu.build_mlp: n_layers x (Linear + Tanh), then identity-output Linear —
    # fused into one kernel (first layer K-tiled, rest in the epilogue).
    if ip["hidden"]:
        mean = mlp_head(h, ip["hidden"], ip["out_w"], ip["out_b"], jnp.float32)
    else:
        mean = dense(h, ip["out_w"], ip["out_b"], "none", jnp.float32)

    std = jax.nn.softplus(ip["log_std"]) + 0.01        # (ac_dim,)
    # TODO(synk): torch.distributions (tanh-transformed Normal) has no Pallas
    # equivalent; the kernel returns the distribution parameters (mean, std).
    return mean, std


# --------------------------- Plain-JAX reference ----------------------------- #

def reference_forward(obs, tp):
    """f32 reference using lax.conv on the original (torch-layout) params."""
    def conv(x, w, b, pad):
        y = jax.lax.conv_general_dilated(
            x, w, (1, 1), [(pad, pad), (pad, pad)],
            dimension_numbers=("NCHW", "OIHW", "NCHW"))
        return y + b[None, :, None, None]

    relu = lambda v: jnp.maximum(v, 0.0)
    x3 = relu(conv(obs, *tp["conv3"], 1))
    x5 = relu(conv(obs, *tp["conv5"], 2))
    x7 = relu(conv(obs, *tp["conv7"], 3))
    h = jnp.concatenate([x3, x5, x7], axis=1)
    h = relu(conv(h, *tp["mix1"], 1))
    h = relu(conv(h, *tp["mix2"], 1))
    h = h.reshape(h.shape[0], -1)                      # NCHW flatten
    for w, b in tp["hidden"]:
        h = jnp.tanh(h @ w.T + b)
    mean = h @ tp["out"][0].T + tp["out"][1]
    std = jax.nn.softplus(tp["log_std"]) + 0.01
    return mean, std


# ---------------------------------- Main ------------------------------------ #

if __name__ == "__main__":
    key = jax.random.PRNGKey(0)
    k_obs, k_params = jax.random.split(key)

    B, C, H, W = 2, 4, 16, 16
    ac_dim, n_layers, layer_size = 4, 2, 32

    obs = jax.random.normal(k_obs, (B, C, H, W), dtype=jnp.float32)
    tp = make_torch_style_params(k_params, C, H, W, ac_dim, n_layers, layer_size)
    ip = prepare_inference_params(tp, H, W)

    mean, std = jax.jit(enhanced_cnn_policy_forward)(obs, ip)
    jax.block_until_ready((mean, std))

    assert mean.shape == (B, ac_dim), mean.shape
    assert std.shape == (ac_dim,), std.shape
    assert bool(jnp.all(jnp.isfinite(mean))) and bool(jnp.all(std > 0.0))

    # Numerical check against a plain-JAX f32 reference (bf16 MXU operands ->
    # loose tolerance).
    ref_mean, ref_std = reference_forward(obs, tp)
    assert bool(jnp.allclose(mean, ref_mean, atol=5e-2, rtol=5e-2)), (mean, ref_mean)
    assert bool(jnp.allclose(std, ref_std, atol=1e-6)), (std, ref_std)

    print("KERNEL_OK")
</pallas_src>

<mosaic_0001>
module attributes {stable_mosaic.version = 11 : i64} {
  func.func @_dense_kernel(%arg0: i32, %arg1: i32, %arg2: memref<256x196xbf16, #tpu.memory_space<vmem>>, %arg3: memref<196x128xbf16, #tpu.memory_space<vmem>>, %arg4: memref<1x128xf32, #tpu.memory_space<vmem>>, %arg5: memref<256x128xbf16, #tpu.memory_space<vmem>>, %arg6: memref<256x128xf32, #tpu.memory_space<vmem>>) attributes {dimension_semantics = [#tpu.dimension_semantics<parallel>, #tpu.dimension_semantics<arbitrary>], iteration_bounds = array<i64: 2, 1>, scalar_prefetch = 0 : i64, scratch_operands = 1 : i64, tpu.core_type = #tpu.core_type<tc>, window_params = [{transform_indices = @transform_0, window_bounds = array<i64: 256, 196>}, {transform_indices = @transform_1, window_bounds = array<i64: 196, 128>}, {pipeline_mode = #tpu.pipeline_mode<synchronous>, transform_indices = @transform_2, window_bounds = array<i64: 1, 128>}, {transform_indices = @transform_3, window_bounds = array<i64: 256, 128>}]} {
    %c0_i32 = arith.constant 0 : i32
    %0 = arith.cmpi eq, %arg1, %c0_i32 : i32
    %1 = arith.extui %0 : i1 to i32
    %c0_i32_0 = arith.constant 0 : i32
    %2 = arith.cmpi ne, %1, %c0_i32_0 : i32
    scf.if %2 {
      %cst_10 = arith.constant 0.000000e+00 : f32
      %12 = vector.broadcast %cst_10 : f32 to vector<256x128xf32>
      %c0_11 = arith.constant 0 : index
      %c0_12 = arith.constant 0 : index
      %13 = vector.load %arg4[%c0_11, %c0_12] : memref<1x128xf32, #tpu.memory_space<vmem>>, vector<1x128xf32>
      %14 = vector.broadcast %13 : vector<1x128xf32> to vector<256x128xf32>
      %15 = arith.addf %12, %14 : vector<256x128xf32>
      %c0_13 = arith.constant 0 : index
      %c0_14 = arith.constant 0 : index
      %16 = vector.load %arg6[%c0_13, %c0_14] : memref<256x128xf32, #tpu.memory_space<vmem>>, vector<256x128xf32>
      tpu.vector_store %arg6[%c0_13, %c0_14], %15 {strides = array<i32>} : memref<256x128xf32, #tpu.memory_space<vmem>>, vector<256x128xf32>,
    } else {
    }
    %c0 = arith.constant 0 : index
    %c0_1 = arith.constant 0 : index
    %3 = vector.load %arg6[%c0, %c0_1] : memref<256x128xf32, #tpu.memory_space<vmem>>, vector<256x128xf32>
    %c0_2 = arith.constant 0 : index
    %c0_3 = arith.constant 0 : index
    %4 = vector.load %arg2[%c0_2, %c0_3] : memref<256x196xbf16, #tpu.memory_space<vmem>>, vector<256x196xbf16>
    %c0_4 = arith.constant 0 : index
    %c0_5 = arith.constant 0 : index
    %5 = vector.load %arg3[%c0_4, %c0_5] : memref<196x128xbf16, #tpu.memory_space<vmem>>, vector<196x128xbf16>
    %cst = arith.constant dense<0.000000e+00> : vector<256x128xf32>
    %6 = tpu.matmul %4, %5, %cst {dimension_numbers = #tpu.dot_dimension_numbers<[1], [0], [0], [1], [0, 0, 1, 1], [], []>} : vector<256x196xbf16>, vector<196x128xbf16>, vector<256x128xf32> -> vector<256x128xf32>
    %7 = arith.addf %3, %6 : vector<256x128xf32>
    %c0_6 = arith.constant 0 : index
    %c0_7 = arith.constant 0 : index
    %8 = vector.load %arg6[%c0_6, %c0_7] : memref<256x128xf32, #tpu.memory_space<vmem>>, vector<256x128xf32>
    tpu.vector_store %arg6[%c0_6, %c0_7], %7 {strides = array<i32>} : memref<256x128xf32, #tpu.memory_space<vmem>>, vector<256x128xf32>,
    %c0_i32_8 = arith.constant 0 : i32
    %9 = arith.cmpi eq, %arg1, %c0_i32_8 : i32
    %10 = arith.extui %9 : i1 to i32
    %c0_i32_9 = arith.constant 0 : i32
    %11 = arith.cmpi ne, %10, %c0_i32_9 : i32
    scf.if %11 {
      %c0_10 = arith.constant 0 : index
      %c0_11 = arith.constant 0 : index
      %12 = vector.load %arg6[%c0_10, %c0_11] : memref<256x128xf32, #tpu.memory_space<vmem>>, vector<256x128xf32>
      %cst_12 = arith.constant 0.000000e+00 : f32
      %13 = vector.broadcast %cst_12 : f32 to vector<256x128xf32>
      %14 = arith.maximumf %12, %13 : vector<256x128xf32>
      %15 = arith.truncf %14 : vector<256x128xf32> to vector<256x128xbf16>
      %c0_13 = arith.constant 0 : index
      %c0_14 = arith.constant 0 : index
      %16 = vector.load %arg5[%c0_13, %c0_14] : memref<256x128xbf16, #tpu.memory_space<vmem>>, vector<256x128xbf16>
      tpu.vector_store %arg5[%c0_13, %c0_14], %15 {strides = array<i32>} : memref<256x128xbf16, #tpu.memory_space<vmem>>, vector<256x128xbf16>,
    } else {
    }
    return
  }
  func.func @transform_0(%arg0: i32, %arg1: i32) -> (i32, i32) {
    %c0_i32 = arith.constant 0 : i32
    return %arg0, %arg1 : i32, i32
  }
  func.func @transform_1(%arg0: i32, %arg1: i32) -> (i32, i32) {
    %c0_i32 = arith.constant 0 : i32
    %c0_i32_0 = arith.constant 0 : i32
    return %arg1, %c0_i32 : i32, i32
  }
  func.func @transform_2(%arg0: i32, %arg1: i32) -> (i32, i32) {
    %c0_i32 = arith.constant 0 : i32
    %c0_i32_0 = arith.constant 0 : i32
    %c0_i32_1 = arith.constant 0 : i32
    return %c0_i32, %c0_i32_0 : i32, i32
  }
  func.func @transform_3(%arg0: i32, %arg1: i32) -> (i32, i32) {
    %c0_i32 = arith.constant 0 : i32
    %c0_i32_0 = arith.constant 0 : i32
    return %arg0, %c0_i32 : i32, i32
  }
}

module attributes {stable_mosaic.version = 11 : i64} {
  func.func @_dense_kernel(%arg0: i32, %arg1: i32, %arg2: memref<256x1152xbf16, #tpu.memory_space<vmem>>, %arg3: memref<1152x64xbf16, #tpu.memory_space<vmem>>, %arg4: memref<1x64xf32, #tpu.memory_space<vmem>>, %arg5: memref<256x64xbf16, #tpu.memory_space<vmem>>, %arg6: memref<256x64xf32, #tpu.memory_space<vmem>>) attributes {dimension_semantics = [#tpu.dimension_semantics<parallel>, #tpu.dimension_semantics<arbitrary>], iteration_bounds = array<i64: 2, 1>, scalar_prefetch = 0 : i64, scratch_operands = 1 : i64, tpu.core_type = #tpu.core_type<tc>, window_params = [{transform_indices = @transform_0, window_bounds = array<i64: 256, 1152>}, {transform_indices = @transform_1, window_bounds = array<i64: 1152, 64>}, {pipeline_mode = #tpu.pipeline_mode<synchronous>, transform_indices = @transform_2, window_bounds = array<i64: 1, 64>}, {transform_indices = @transform_3, window_bounds = array<i64: 256, 64>}]} {
    %c0_i32 = arith.constant 0 : i32
    %0 = arith.cmpi eq, %arg1, %c0_i32 : i32
    %1 = arith.extui %0 : i1 to i32
    %c0_i32_0 = arith.constant 0 : i32
    %2 = arith.cmpi ne, %1, %c0_i32_0 : i32
    scf.if %2 {
      %cst_10 = arith.constant 0.000000e+00 : f32
      %12 = vector.broadcast %cst_10 : f32 to vector<256x64xf32>
      %c0_11 = arith.constant 0 : index
      %c0_12 = arith.constant 0 : index
      %13 = vector.load %arg4[%c0_11, %c0_12] : memref<1x64xf32, #tpu.memory_space<vmem>>, vector<1x64xf32>
      %14 = vector.broadcast %13 : vector<1x64xf32> to vector<256x64xf32>
      %15 = arith.addf %12, %14 : vector<256x64xf32>
      %c0_13 = arith.constant 0 : index
      %c0_14 = arith.constant 0 : index
      %16 = vector.load %arg6[%c0_13, %c0_14] : memref<256x64xf32, #tpu.memory_space<vmem>>, vector<256x64xf32>
      tpu.vector_store %arg6[%c0_13, %c0_14], %15 {strides = array<i32>} : memref<256x64xf32, #tpu.memory_space<vmem>>, vector<256x64xf32>,
    } else {
    }
    %c0 = arith.constant 0 : index
    %c0_1 = arith.constant 0 : index
    %3 = vector.load %arg6[%c0, %c0_1] : memref<256x64xf32, #tpu.memory_space<vmem>>, vector<256x64xf32>
    %c0_2 = arith.constant 0 : index
    %c0_3 = arith.constant 0 : index
    %4 = vector.load %arg2[%c0_2, %c0_3] : memref<256x1152xbf16, #tpu.memory_space<vmem>>, vector<256x1152xbf16>
    %c0_4 = arith.constant 0 : index
    %c0_5 = arith.constant 0 : index
    %5 = vector.load %arg3[%c0_4, %c0_5] : memref<1152x64xbf16, #tpu.memory_space<vmem>>, vector<1152x64xbf16>
    %cst = arith.constant dense<0.000000e+00> : vector<256x64xf32>
    %6 = tpu.matmul %4, %5, %cst {dimension_numbers = #tpu.dot_dimension_numbers<[1], [0], [0], [1], [0, 0, 1, 1], [], []>} : vector<256x1152xbf16>, vector<1152x64xbf16>, vector<256x64xf32> -> vector<256x64xf32>
    %7 = arith.addf %3, %6 : vector<256x64xf32>
    %c0_6 = arith.constant 0 : index
    %c0_7 = arith.constant 0 : index
    %8 = vector.load %arg6[%c0_6, %c0_7] : memref<256x64xf32, #tpu.memory_space<vmem>>, vector<256x64xf32>
    tpu.vector_store %arg6[%c0_6, %c0_7], %7 {strides = array<i32>} : memref<256x64xf32, #tpu.memory_space<vmem>>, vector<256x64xf32>,
    %c0_i32_8 = arith.constant 0 : i32
    %9 = arith.cmpi eq, %arg1, %c0_i32_8 : i32
    %10 = arith.extui %9 : i1 to i32
    %c0_i32_9 = arith.constant 0 : i32
    %11 = arith.cmpi ne, %10, %c0_i32_9 : i32
    scf.if %11 {
      %c0_10 = arith.constant 0 : index
      %c0_11 = arith.constant 0 : index
      %12 = vector.load %arg6[%c0_10, %c0_11] : memref<256x64xf32, #tpu.memory_space<vmem>>, vector<256x64xf32>
      %cst_12 = arith.constant 0.000000e+00 : f32
      %13 = vector.broadcast %cst_12 : f32 to vector<256x64xf32>
      %14 = arith.maximumf %12, %13 : vector<256x64xf32>
      %15 = arith.truncf %14 : vector<256x64xf32> to vector<256x64xbf16>
      %c0_13 = arith.constant 0 : index
      %c0_14 = arith.constant 0 : index
      %16 = vector.load %arg5[%c0_13, %c0_14] : memref<256x64xbf16, #tpu.memory_space<vmem>>, vector<256x64xbf16>
      tpu.vector_store %arg5[%c0_13, %c0_14], %15 {strides = array<i32>} : memref<256x64xbf16, #tpu.memory_space<vmem>>, vector<256x64xbf16>,
    } else {
    }
    return
  }
  func.func @transform_0(%arg0: i32, %arg1: i32) -> (i32, i32) {
    %c0_i32 = arith.constant 0 : i32
    return %arg0, %arg1 : i32, i32
  }
  func.func @transform_1(%arg0: i32, %arg1: i32) -> (i32, i32) {
    %c0_i32 = arith.constant 0 : i32
    %c0_i32_0 = arith.constant 0 : i32
    return %arg1, %c0_i32 : i32, i32
  }
  func.func @transform_2(%arg0: i32, %arg1: i32) -> (i32, i32) {
    %c0_i32 = arith.constant 0 : i32
    %c0_i32_0 = arith.constant 0 : i32
    %c0_i32_1 = arith.constant 0 : i32
    return %c0_i32, %c0_i32_0 : i32, i32
  }
  func.func @transform_3(%arg0: i32, %arg1: i32) -> (i32, i32) {
    %c0_i32 = arith.constant 0 : i32
    %c0_i32_0 = arith.constant 0 : i32
    return %arg0, %c0_i32 : i32, i32
  }
}

module attributes {stable_mosaic.version = 11 : i64} {
  func.func @_dense_kernel(%arg0: i32, %arg1: i32, %arg2: memref<256x576xbf16, #tpu.memory_space<vmem>>, %arg3: memref<576x64xbf16, #tpu.memory_space<vmem>>, %arg4: memref<1x64xf32, #tpu.memory_space<vmem>>, %arg5: memref<256x64xbf16, #tpu.memory_space<vmem>>, %arg6: memref<256x64xf32, #tpu.memory_space<vmem>>) attributes {dimension_semantics = [#tpu.dimension_semantics<parallel>, #tpu.dimension_semantics<arbitrary>], iteration_bounds = array<i64: 2, 1>, scalar_prefetch = 0 : i64, scratch_operands = 1 : i64, tpu.core_type = #tpu.core_type<tc>, window_params = [{transform_indices = @transform_0, window_bounds = array<i64: 256, 576>}, {transform_indices = @transform_1, window_bounds = array<i64: 576, 64>}, {pipeline_mode = #tpu.pipeline_mode<synchronous>, transform_indices = @transform_2, window_bounds = array<i64: 1, 64>}, {transform_indices = @transform_3, window_bounds = array<i64: 256, 64>}]} {
    %c0_i32 = arith.constant 0 : i32
    %0 = arith.cmpi eq, %arg1, %c0_i32 : i32
    %1 = arith.extui %0 : i1 to i32
    %c0_i32_0 = arith.constant 0 : i32
    %2 = arith.cmpi ne, %1, %c0_i32_0 : i32
    scf.if %2 {
      %cst_10 = arith.constant 0.000000e+00 : f32
      %12 = vector.broadcast %cst_10 : f32 to vector<256x64xf32>
      %c0_11 = arith.constant 0 : index
      %c0_12 = arith.constant 0 : index
      %13 = vector.load %arg4[%c0_11, %c0_12] : memref<1x64xf32, #tpu.memory_space<vmem>>, vector<1x64xf32>
      %14 = vector.broadcast %13 : vector<1x64xf32> to vector<256x64xf32>
      %15 = arith.addf %12, %14 : vector<256x64xf32>
      %c0_13 = arith.constant 0 : index
      %c0_14 = arith.constant 0 : index
      %16 = vector.load %arg6[%c0_13, %c0_14] : memref<256x64xf32, #tpu.memory_space<vmem>>, vector<256x64xf32>
      tpu.vector_store %arg6[%c0_13, %c0_14], %15 {strides = array<i32>} : memref<256x64xf32, #tpu.memory_space<vmem>>, vector<256x64xf32>,
    } else {
    }
    %c0 = arith.constant 0 : index
    %c0_1 = arith.constant 0 : index
    %3 = vector.load %arg6[%c0, %c0_1] : memref<256x64xf32, #tpu.memory_space<vmem>>, vector<256x64xf32>
    %c0_2 = arith.constant 0 : index
    %c0_3 = arith.constant 0 : index
    %4 = vector.load %arg2[%c0_2, %c0_3] : memref<256x576xbf16, #tpu.memory_space<vmem>>, vector<256x576xbf16>
    %c0_4 = arith.constant 0 : index
    %c0_5 = arith.constant 0 : index
    %5 = vector.load %arg3[%c0_4, %c0_5] : memref<576x64xbf16, #tpu.memory_space<vmem>>, vector<576x64xbf16>
    %cst = arith.constant dense<0.000000e+00> : vector<256x64xf32>
    %6 = tpu.matmul %4, %5, %cst {dimension_numbers = #tpu.dot_dimension_numbers<[1], [0], [0], [1], [0, 0, 1, 1], [], []>} : vector<256x576xbf16>, vector<576x64xbf16>, vector<256x64xf32> -> vector<256x64xf32>
    %7 = arith.addf %3, %6 : vector<256x64xf32>
    %c0_6 = arith.constant 0 : index
    %c0_7 = arith.constant 0 : index
    %8 = vector.load %arg6[%c0_6, %c0_7] : memref<256x64xf32, #tpu.memory_space<vmem>>, vector<256x64xf32>
    tpu.vector_store %arg6[%c0_6, %c0_7], %7 {strides = array<i32>} : memref<256x64xf32, #tpu.memory_space<vmem>>, vector<256x64xf32>,
    %c0_i32_8 = arith.constant 0 : i32
    %9 = arith.cmpi eq, %arg1, %c0_i32_8 : i32
    %10 = arith.extui %9 : i1 to i32
    %c0_i32_9 = arith.constant 0 : i32
    %11 = arith.cmpi ne, %10, %c0_i32_9 : i32
    scf.if %11 {
      %c0_10 = arith.constant 0 : index
      %c0_11 = arith.constant 0 : index
      %12 = vector.load %arg6[%c0_10, %c0_11] : memref<256x64xf32, #tpu.memory_space<vmem>>, vector<256x64xf32>
      %cst_12 = arith.constant 0.000000e+00 : f32
      %13 = vector.broadcast %cst_12 : f32 to vector<256x64xf32>
      %14 = arith.maximumf %12, %13 : vector<256x64xf32>
      %15 = arith.truncf %14 : vector<256x64xf32> to vector<256x64xbf16>
      %c0_13 = arith.constant 0 : index
      %c0_14 = arith.constant 0 : index
      %16 = vector.load %arg5[%c0_13, %c0_14] : memref<256x64xbf16, #tpu.memory_space<vmem>>, vector<256x64xbf16>
      tpu.vector_store %arg5[%c0_13, %c0_14], %15 {strides = array<i32>} : memref<256x64xbf16, #tpu.memory_space<vmem>>, vector<256x64xbf16>,
    } else {
    }
    return
  }
  func.func @transform_0(%arg0: i32, %arg1: i32) -> (i32, i32) {
    %c0_i32 = arith.constant 0 : i32
    return %arg0, %arg1 : i32, i32
  }
  func.func @transform_1(%arg0: i32, %arg1: i32) -> (i32, i32) {
    %c0_i32 = arith.constant 0 : i32
    %c0_i32_0 = arith.constant 0 : i32
    return %arg1, %c0_i32 : i32, i32
  }
  func.func @transform_2(%arg0: i32, %arg1: i32) -> (i32, i32) {
    %c0_i32 = arith.constant 0 : i32
    %c0_i32_0 = arith.constant 0 : i32
    %c0_i32_1 = arith.constant 0 : i32
    return %c0_i32, %c0_i32_0 : i32, i32
  }
  func.func @transform_3(%arg0: i32, %arg1: i32) -> (i32, i32) {
    %c0_i32 = arith.constant 0 : i32
    %c0_i32_0 = arith.constant 0 : i32
    return %arg0, %c0_i32 : i32, i32
  }
}

module attributes {stable_mosaic.version = 11 : i64} {
  func.func @_mlp_head_kernel(%arg0: i32, %arg1: memref<2x2048xbf16, #tpu.memory_space<vmem>>, %arg2: memref<2048x32xbf16, #tpu.memory_space<vmem>>, %arg3: memref<1x32xf32, #tpu.memory_space<vmem>>, %arg4: memref<32x32xbf16, #tpu.memory_space<vmem>>, %arg5: memref<1x32xf32, #tpu.memory_space<vmem>>, %arg6: memref<32x4xbf16, #tpu.memory_space<vmem>>, %arg7: memref<1x4xf32, #tpu.memory_space<vmem>>, %arg8: memref<2x4xf32, #tpu.memory_space<vmem>>, %arg9: memref<2x32xf32, #tpu.memory_space<vmem>>) attributes {dimension_semantics = [#tpu.dimension_semantics<arbitrary>], iteration_bounds = array<i64: 8>, scalar_prefetch = 0 : i64, scratch_operands = 1 : i64, tpu.core_type = #tpu.core_type<tc>, window_params = [{transform_indices = @transform_0, window_bounds = array<i64: 2, 2048>}, {transform_indices = @transform_1, window_bounds = array<i64: 2048, 32>}, {pipeline_mode = #tpu.pipeline_mode<synchronous>, transform_indices = @transform_2, window_bounds = array<i64: 1, 32>}, {pipeline_mode = #tpu.pipeline_mode<synchronous>, transform_indices = @transform_3, window_bounds = array<i64: 32, 32>}, {pipeline_mode = #tpu.pipeline_mode<synchronous>, transform_indices = @transform_4, window_bounds = array<i64: 1, 32>}, {pipeline_mode = #tpu.pipeline_mode<synchronous>, transform_indices = @transform_5, window_bounds = array<i64: 32, 4>}, {pipeline_mode = #tpu.pipeline_mode<synchronous>, transform_indices = @transform_6, window_bounds = array<i64: 1, 4>}, {pipeline_mode = #tpu.pipeline_mode<synchronous>, transform_indices = @transform_7, window_bounds = array<i64: 2, 4>}]} {
    %c0_i32 = arith.constant 0 : i32
    %0 = arith.cmpi eq, %arg0, %c0_i32 : i32
    %1 = arith.extui %0 : i1 to i32
    %c0_i32_0 = arith.constant 0 : i32
    %2 = arith.cmpi ne, %1, %c0_i32_0 : i32
    scf.if %2 {
      %cst_9 = arith.constant 0.000000e+00 : f32
      %12 = vector.broadcast %cst_9 : f32 to vector<2x32xf32>
      %c0_10 = arith.constant 0 : index
      %c0_11 = arith.constant 0 : index
      %13 = vector.load %arg3[%c0_10, %c0_11] : memref<1x32xf32, #tpu.memory_space<vmem>>, vector<1x32xf32>
      %14 = vector.broadcast %13 : vector<1x32xf32> to vector<2x32xf32>
      %15 = arith.addf %12, %14 : vector<2x32xf32>
      %c0_12 = arith.constant 0 : index
      %c0_13 = arith.constant 0 : index
      %16 = vector.load %arg9[%c0_12, %c0_13] : memref<2x32xf32, #tpu.memory_space<vmem>>, vector<2x32xf32>
      tpu.vector_store %arg9[%c0_12, %c0_13], %15 {strides = array<i32>} : memref<2x32xf32, #tpu.memory_space<vmem>>, vector<2x32xf32>,
    } else {
    }
    %c0 = arith.constant 0 : index
    %c0_1 = arith.constant 0 : index
    %3 = vector.load %arg9[%c0, %c0_1] : memref<2x32xf32, #tpu.memory_space<vmem>>, vector<2x32xf32>
    %c0_2 = arith.constant 0 : index
    %c0_3 = arith.constant 0 : index
    %4 = vector.load %arg1[%c0_2, %c0_3] : memref<2x2048xbf16, #tpu.memory_space<vmem>>, vector<2x2048xbf16>
    %c0_4 = arith.constant 0 : index
    %c0_5 = arith.constant 0 : index
    %5 = vector.load %arg2[%c0_4, %c0_5] : memref<2048x32xbf16, #tpu.memory_space<vmem>>, vector<2048x32xbf16>
    %cst = arith.constant dense<0.000000e+00> : vector<2x32xf32>
    %6 = tpu.matmul %4, %5, %cst {dimension_numbers = #tpu.dot_dimension_numbers<[1], [0], [0], [1], [0, 0, 1, 1], [], []>} : vector<2x2048xbf16>, vector<2048x32xbf16>, vector<2x32xf32> -> vector<2x32xf32>
    %7 = arith.addf %3, %6 : vector<2x32xf32>
    %c0_6 = arith.constant 0 : index
    %c0_7 = arith.constant 0 : index
    %8 = vector.load %arg9[%c0_6, %c0_7] : memref<2x32xf32, #tpu.memory_space<vmem>>, vector<2x32xf32>
    tpu.vector_store %arg9[%c0_6, %c0_7], %7 {strides = array<i32>} : memref<2x32xf32, #tpu.memory_space<vmem>>, vector<2x32xf32>,
    %c7_i32 = arith.constant 7 : i32
    %9 = arith.cmpi eq, %arg0, %c7_i32 : i32
    %10 = arith.extui %9 : i1 to i32
    %c0_i32_8 = arith.constant 0 : i32
    %11 = arith.cmpi ne, %10, %c0_i32_8 : i32
    scf.if %11 {
      %c0_9 = arith.constant 0 : index
      %c0_10 = arith.constant 0 : index
      %12 = vector.load %arg9[%c0_9, %c0_10] : memref<2x32xf32, #tpu.memory_space<vmem>>, vector<2x32xf32>
      %13 = math.tanh %12 : vector<2x32xf32>
      %14 = arith.truncf %13 : vector<2x32xf32> to vector<2x32xbf16>
      %c0_11 = arith.constant 0 : index
      %c0_12 = arith.constant 0 : index
      %15 = vector.load %arg4[%c0_11, %c0_12] : memref<32x32xbf16, #tpu.memory_space<vmem>>, vector<32x32xbf16>
      %cst_13 = arith.constant dense<0.000000e+00> : vector<2x32xf32>
      %16 = tpu.matmul %14, %15, %cst_13 {dimension_numbers = #tpu.dot_dimension_numbers<[1], [0], [0], [1], [0, 0, 1, 1], [], []>} : vector<2x32xbf16>, vector<32x32xbf16>, vector<2x32xf32> -> vector<2x32xf32>
      %c0_14 = arith.constant 0 : index
      %c0_15 = arith.constant 0 : index
      %17 = vector.load %arg5[%c0_14, %c0_15] : memref<1x32xf32, #tpu.memory_space<vmem>>, vector<1x32xf32>
      %18 = vector.broadcast %17 : vector<1x32xf32> to vector<2x32xf32>
      %19 = arith.addf %16, %18 : vector<2x32xf32>
      %20 = math.tanh %19 : vector<2x32xf32>
      %21 = arith.truncf %20 : vector<2x32xf32> to vector<2x32xbf16>
      %c0_16 = arith.constant 0 : index
      %c0_17 = arith.constant 0 : index
      %22 = vector.load %arg6[%c0_16, %c0_17] : memref<32x4xbf16, #tpu.memory_space<vmem>>, vector<32x4xbf16>
      %cst_18 = arith.constant dense<0.000000e+00> : vector<2x4xf32>
      %23 = tpu.matmul %21, %22, %cst_18 {dimension_numbers = #tpu.dot_dimension_numbers<[1], [0], [0], [1], [0, 0, 1, 1], [], []>} : vector<2x32xbf16>, vector<32x4xbf16>, vector<2x4xf32> -> vector<2x4xf32>
      %c0_19 = arith.constant 0 : index
      %c0_20 = arith.constant 0 : index
      %24 = vector.load %arg7[%c0_19, %c0_20] : memref<1x4xf32, #tpu.memory_space<vmem>>, vector<1x4xf32>
      %25 = vector.broadcast %24 : vector<1x4xf32> to vector<2x4xf32>
      %26 = arith.addf %23, %25 : vector<2x4xf32>
      %c0_21 = arith.constant 0 : index
      %c0_22 = arith.constant 0 : index
      %27 = vector.load %arg8[%c0_21, %c0_22] : memref<2x4xf32, #tpu.memory_space<vmem>>, vector<2x4xf32>
      tpu.vector_store %arg8[%c0_21, %c0_22], %26 {strides = array<i32>} : memref<2x4xf32, #tpu.memory_space<vmem>>, vector<2x4xf32>,
    } else {
    }
    return
  }
  func.func @transform_0(%arg0: i32) -> (i32, i32) {
    %c0_i32 = arith.constant 0 : i32
    %c0_i32_0 = arith.constant 0 : i32
    return %c0_i32, %arg0 : i32, i32
  }
  func.func @transform_1(%arg0: i32) -> (i32, i32) {
    %c0_i32 = arith.constant 0 : i32
    %c0_i32_0 = arith.constant 0 : i32
    return %arg0, %c0_i32 : i32, i32
  }
  func.func @transform_2(%arg0: i32) -> (i32, i32) {
    %c0_i32 = arith.constant 0 : i32
    %c0_i32_0 = arith.constant 0 : i32
    %c0_i32_1 = arith.constant 0 : i32
    return %c0_i32, %c0_i32_0 : i32, i32
  }
  func.func @transform_3(%arg0: i32) -> (i32, i32) {
    %c0_i32 = arith.constant 0 : i32
    %c0_i32_0 = arith.constant 0 : i32
    %c0_i32_1 = arith.constant 0 : i32
    return %c0_i32, %c0_i32_0 : i32, i32
  }
  func.func @transform_4(%arg0: i32) -> (i32, i32) {
    %c0_i32 = arith.constant 0 : i32
    %c0_i32_0 = arith.constant 0 : i32
    %c0_i32_1 = arith.constant 0 : i32
    return %c0_i32, %c0_i32_0 : i32, i32
  }
  func.func @transform_5(%arg0: i32) -> (i32, i32) {
    %c0_i32 = arith.constant 0 : i32
    %c0_i32_0 = arith.constant 0 : i32
    %c0_i32_1 = arith.constant 0 : i32
    return %c0_i32, %c0_i32_0 : i32, i32
  }
  func.func @transform_6(%arg0: i32) -> (i32, i32) {
    %c0_i32 = arith.constant 0 : i32
    %c0_i32_0 = arith.constant 0 : i32
    %c0_i32_1 = arith.constant 0 : i32
    return %c0_i32, %c0_i32_0 : i32, i32
  }
  func.func @transform_7(%arg0: i32) -> (i32, i32) {
    %c0_i32 = arith.constant 0 : i32
    %c0_i32_0 = arith.constant 0 : i32
    %c0_i32_1 = arith.constant 0 : i32
    return %c0_i32, %c0_i32_0 : i32, i32
  }
}

</mosaic_0001>

<bundles_post_ra>
// kernel: enhanced_cnn_policy_forward.4
= control target key start
LH: loop header
LB: loop body
LE: loop exit
PB: predicated region body
PF: predicated region fallthrough
CT: control target
= control target key end

     0   :  { %s1563_s12 = smov 0   ;;  %s1565_s13 = smov 0   ;;  %s1770_s0 = inlined_call_operand.vmem [shape: bf16[512,196], index: 0, kind: input, shape index: {}]   ;;  %s1771_s1 = inlined_call_operand.vmem [shape: bf16[196,128], index: 1, kind: input, shape index: {}]   ;;  %s1772_s2 = inlined_call_operand.vmem [shape: f32[1,128], index: 2, kind: input, shape index: {}]   ;;  %s1773_s3 = inlined_call_operand.vmem [shape: bf16[512,128], index: 3, kind: output, shape index: {}]  }
   0x1   :  { %s1567_s14 = smov 0  }
   0x2 LB: > { %s25_s15 = sadd.s32 1, %s1536_s13  ;;  %p1176_p0 = scmp.ge.s32.totalorder %s1540_s14, 1  ;;  %s1540_s14 = sphi %s1567_s14, %s13_s14   ;;  %s1536_s13 = sphi %s1565_s13, %s1775_s13   ;;  %s1532_s12 = sphi %s1563_s12, %s1774_s12  }
   0x3   : > { %p27_p1 = scmp.ge.s32.totalorder %s25_s15, 2  ;;  %p169_p2 = scmp.lt.s32.totalorder %s1540_s14, 3 }
   0x5   : > { %s1777_s15 = smov (%p27_p1, %s25_s15), 0  ;;  %p170_p3 = pnand %p1176_p0, %p169_p2 }
   0x6   : > { %v1457_v0 = vld [vmem:[%s1771_s1] sm:$0xff] (!%p170_p3)   ;;  %v1542_v1 = vmov (!%p170_p3), 0   ;;  %v1458_v2 = vld [vmem:[%s1771_s1 + $0x8] sm:$0xff] (!%p170_p3)   ;;  %s1177_s20 = sshll.u32 (!%p170_p3), %s1532_s12, 5  ;;  %v1459_v3 = vld [vmem:[%s1771_s1 + $0x10] sm:$0xff] (!%p170_p3)   ;;  %vm580_vm0 = vcmask (!%p170_p3), 556032  }
   0x7   : > { %173 = sbr.rel (%p170_p3) target bundleno = 336 (0x150), region = 32  ;;  %633 = vmatprep.subr.bf16.mxu0 (!%p170_p3), %v1542_v1  ;;  %1406 = vmatprep.subr.bf16.mxu1 (!%p170_p3), %v1542_v1  ;;  %p205_p4 = scmp.lt.s32.totalorder (!%p170_p3), %s1177_s20, 63  ;;  %v1460_v4 = vld [vmem:[%s1771_s1 + $0x18] sm:$0xff] (!%p170_p3)   ;;  %v1461_v6 = vld [vmem:[%s1771_s1 + $0x20] sm:$0xff] (!%p170_p3)   ;;  %v1462_v8 = vld [vmem:[%s1771_s1 + $0x28] sm:$0xff] (!%p170_p3)   ;;  %vm629_vm1 = vcmask (!%p170_p3), 1041408  }
   0x8   : > { %634 = vmatpush1.bf16.msra.mxu0 (!%p170_p3), %v1457_v0  ;;  %1419 = vmatpush1.bf16.msra.mxu1 (!%p170_p3), %v1457_v0  ;;  %v1463_v9 = vld [vmem:[%s1771_s1 + $0x30] sm:$0xff] (!%p170_p3)   ;;  %v1464_v10 = vld [vmem:[%s1771_s1 + $0x38] sm:$0xff] (!%p170_p3)   ;;  %v1465_v11 = vld [vmem:[%s1771_s1 + $0x40] sm:$0xff] (!%p170_p3)  }
   0x9   : > { %635 = vmatprep.subr.bf16.mxu0 (!%p170_p3), %v1542_v1  ;;  %1407 = vmatprep.subr.bf16.mxu1 (!%p170_p3), %v1542_v1  ;;  %v1466_v12 = vld [vmem:[%s1771_s1 + $0x48] sm:$0xff] (!%p170_p3)   ;;  %v1467_v13 = vld [vmem:[%s1771_s1 + $0x50] sm:$0xff] (!%p170_p3)   ;;  %v1468_v14 = vld [vmem:[%s1771_s1 + $0x58] sm:$0xff] (!%p170_p3)  }
   0xa   : > { %v1469_v15 = vld [vmem:[%s1771_s1 + $0x60] ss:$0 sps:$4 sm:$0x33] (!%p170_p3)  }
   0xb   : > { %v631_v16 = vsel (!%p170_p3), %vm629_vm1, %v1469_v15, 0  ;;  %v1705_v47 = vld [vmem:[%s1772_s2] ss:$0 sm:$0xff] (!%p170_p3) }
   0xc   : > { %636 = vmatpush1.bf16.msra.mxu0 (!%p170_p3), %v1458_v2  ;;  %1420 = vmatpush1.bf16.msra.mxu1 (!%p170_p3), %v1458_v2 }
   0xd   : > { %637 = vmatprep.subr.bf16.mxu0 (!%p170_p3), %v1542_v1  ;;  %1408 = vmatprep.subr.bf16.mxu1 (!%p170_p3), %v1542_v1 }
   0xe   : > { %s1779_s20 = smov (!%p205_p4, %s1177_s20), 63 }
   0xf   : > { %s1278_s23 = sshll.u32 %s1779_s20, 3  ;;  %s1181_s26 = sshll.u32 %s1779_s20, 2 }
  0x10   : > { %638 = vmatpush1.bf16.msra.mxu0 %v1459_v3  ;;  %1421 = vmatpush1.bf16.msra.mxu1 %v1459_v3  ;;  %s1605_s28 = scalar_lea.vmem %s1770_s0, %s1278_s23  ;;  %s1715_s29 = scalar_lea.vmem %s1773_s3, %s1181_s26 }
  0x11   : > { %639 = vmatprep.subr.bf16.mxu0 %v1542_v1  ;;  %1409 = vmatprep.subr.bf16.mxu1 %v1542_v1  ;;  %v1472_v5 = vld [vmem:[%s1605_s28 + $0x4] ss:$8 sps:$4 sm:$0xff]   ;;  %v1470_v17 = vld [vmem:[%s1605_s28] ss:$8 sps:$4 sm:$0xff]   ;;  %v1476_v19 = vld [vmem:[%s1605_s28 + $0x14] ss:$8 sps:$4 sm:$0xff]  }
  0x12   : > { %v1475_v7 = vld [vmem:[%s1605_s28 + $0x84] ss:$8 sps:$4 sm:$0xff]   ;;  %1228 = vmatprep.mubr.msk.bf16.mxu0 %vm580_vm0, %v1472_v5  ;;  %v1473_v18 = vld [vmem:[%s1605_s28 + $0x80] ss:$8 sps:$4 sm:$0xff]   ;;  %v1478_v20 = vld [vmem:[%s1605_s28 + $0x94] ss:$8 sps:$4 sm:$0xff]  }
  0x13   : > { %1236 = vmatprep.mubr.msk.bf16.mxu1 %vm580_vm0, %v1475_v7  ;;  %v1480_v21 = vld [vmem:[%s1605_s28 + $0x10] ss:$8 sps:$4 sm:$0xff]   ;;  %v1482_v23 = vld [vmem:[%s1605_s28 + $0x24] ss:$8 sps:$4 sm:$0xff]   ;;  %v1486_v25 = vld [vmem:[%s1605_s28 + $0x20] ss:$8 sps:$4 sm:$0xff]  }
  0x14   : > { %640 = vmatpush1.bf16.msra.mxu0 %v1460_v4  ;;  %1422 = vmatpush1.bf16.msra.mxu1 %v1460_v4  ;;  %v1481_v22 = vld [vmem:[%s1605_s28 + $0x90] ss:$8 sps:$4 sm:$0xff]   ;;  %v1484_v24 = vld [vmem:[%s1605_s28 + $0xa4] ss:$8 sps:$4 sm:$0xff]   ;;  %v1487_v26 = vld [vmem:[%s1605_s28 + $0xa0] ss:$8 sps:$4 sm:$0xff]  }
  0x15   : > { %641 = vmatprep.subr.bf16.mxu0 %v1542_v1  ;;  %1410 = vmatprep.subr.bf16.mxu1 %v1542_v1  ;;  %v1488_v27 = vld [vmem:[%s1605_s28 + $0x34] ss:$8 sps:$4 sm:$0xff]   ;;  %v1492_v29 = vld [vmem:[%s1605_s28 + $0x30] ss:$8 sps:$4 sm:$0xff]   ;;  %v1494_v31 = vld [vmem:[%s1605_s28 + $0x44] ss:$8 sps:$4 sm:$0xff]  }
  0x16   : > { %v1490_v28 = vld [vmem:[%s1605_s28 + $0xb4] ss:$8 sps:$4 sm:$0xff]   ;;  %v1493_v30 = vld [vmem:[%s1605_s28 + $0xb0] ss:$8 sps:$4 sm:$0xff]   ;;  %v1496_v32 = vld [vmem:[%s1605_s28 + $0xc4] ss:$8 sps:$4 sm:$0xff]  }
  0x17   : > { %v1498_v33 = vld [vmem:[%s1605_s28 + $0x40] ss:$8 sps:$4 sm:$0xff]   ;;  %v1500_v35 = vld [vmem:[%s1605_s28 + $0x54] ss:$8 sps:$4 sm:$0xff]   ;;  %v1504_v37 = vld [vmem:[%s1605_s28 + $0x50] ss:$8 sps:$4 sm:$0xff]  }
  0x18   : > { %642 = vmatpush1.bf16.msra.mxu0 %v1461_v6  ;;  %1423 = vmatpush1.bf16.msra.mxu1 %v1461_v6  ;;  %v1499_v34 = vld [vmem:[%s1605_s28 + $0xc0] ss:$8 sps:$4 sm:$0xff]   ;;  %v1502_v36 = vld [vmem:[%s1605_s28 + $0xd4] ss:$8 sps:$4 sm:$0xff]   ;;  %v1505_v38 = vld [vmem:[%s1605_s28 + $0xd0] ss:$8 sps:$4 sm:$0xff]  }
  0x19   : > { %643 = vmatprep.subr.bf16.mxu0 %v1542_v1  ;;  %1411 = vmatprep.subr.bf16.mxu1 %v1542_v1  ;;  %v1506_v39 = vld [vmem:[%s1605_s28 + $0x64] ss:$8 sps:$4 sm:$0xff]   ;;  %v1510_v41 = vld [vmem:[%s1605_s28 + $0x60] ss:$8 sps:$4 sm:$0xff]   ;;  %v1512_v43 = vld [vmem:[%s1605_s28 + $0x74] ss:$8 sps:$4 sm:$0xff]  }
  0x1a   : > { %v1508_v40 = vld [vmem:[%s1605_s28 + $0xe4] ss:$8 sps:$4 sm:$0xff]   ;;  %v1511_v42 = vld [vmem:[%s1605_s28 + $0xe0] ss:$8 sps:$4 sm:$0xff]   ;;  %v1514_v44 = vld [vmem:[%s1605_s28 + $0xf4] ss:$8 sps:$4 sm:$0xff]  }
  0x1b   : > { %v1516_v45 = vld [vmem:[%s1605_s28 + $0x70] ss:$8 sps:$4 sm:$0xff]  }
  0x1c   : > { %644 = vmatpush1.bf16.msra.mxu0 %v1462_v8  ;;  %1424 = vmatpush1.bf16.msra.mxu1 %v1462_v8  ;;  %v1517_v46 = vld [vmem:[%s1605_s28 + $0xf0] ss:$8 sps:$4 sm:$0xff]  }
  0x1d   : > { %645 = vmatprep.subr.bf16.mxu0 %v1542_v1  ;;  %1412 = vmatprep.subr.bf16.mxu1 %v1542_v1 }
  0x20   : > { %646 = vmatpush1.bf16.msra.mxu0 %v1463_v9  ;;  %1425 = vmatpush1.bf16.msra.mxu1 %v1463_v9 }
  0x21   : > { %647 = vmatprep.subr.bf16.mxu0 %v1542_v1  ;;  %1413 = vmatprep.subr.bf16.mxu1 %v1542_v1 }
  0x24   : > { %648 = vmatpush1.bf16.msra.mxu0 %v1464_v10  ;;  %1426 = vmatpush1.bf16.msra.mxu1 %v1464_v10 }
  0x25   : > { %649 = vmatprep.subr.bf16.mxu0 %v1542_v1  ;;  %1414 = vmatprep.subr.bf16.mxu1 %v1542_v1 }
  0x28   : > { %650 = vmatpush1.bf16.msra.mxu0 %v1465_v11  ;;  %1427 = vmatpush1.bf16.msra.mxu1 %v1465_v11 }
  0x29   : > { %651 = vmatprep.subr.bf16.mxu0 %v1542_v1  ;;  %1415 = vmatprep.subr.bf16.mxu1 %v1542_v1 }
  0x2c   : > { %652 = vmatpush1.bf16.msra.mxu0 %v1466_v12  ;;  %1428 = vmatpush1.bf16.msra.mxu1 %v1466_v12 }
  0x2d   : > { %653 = vmatprep.subr.bf16.mxu0 %v1542_v1  ;;  %1416 = vmatprep.subr.bf16.mxu1 %v1542_v1 }
  0x30   : > { %654 = vmatpush1.bf16.msra.mxu0 %v1467_v13  ;;  %1429 = vmatpush1.bf16.msra.mxu1 %v1467_v13 }
  0x31   : > { %655 = vmatprep.subr.bf16.mxu0 %v1542_v1  ;;  %1417 = vmatprep.subr.bf16.mxu1 %v1542_v1 }
  0x34   : > { %656 = vmatpush1.bf16.msra.mxu0 %v1468_v14  ;;  %1430 = vmatpush1.bf16.msra.mxu1 %v1468_v14 }
  0x35   : > { %657 = vmatprep.subr.bf16.mxu0 %v1542_v1  ;;  %1418 = vmatprep.subr.bf16.mxu1 %v1542_v1 }
  0x38   : > { %658 = vmatpush1.bf16.msra.mxu0 %v631_v16  ;;  %1431 = vmatpush1.bf16.msra.mxu1 %v631_v16 }
  0x3b   : > { %666 = vmatmul.mubr.bf16.vlgmr.msra.gmra.mrb[0].mxu0 %v1470_v17  ;;  %730 = vmatmul.mubr.bf16.vlgmr.msra.gmra.mrb[0].mxu1 %v1473_v18 }
  0x3c   : > { %1229 = vmatprep.mubr.msk.bf16.mxu0 %vm580_vm0, %v1476_v19  ;;  %1237 = vmatprep.mubr.msk.bf16.mxu1 %vm580_vm0, %v1478_v20 }
  0x43   : > { %674 = vmatmul.mubr.bf16.gmra.mrb[4].mxu0 %v1480_v21  ;;  %738 = vmatmul.mubr.bf16.gmra.mrb[4].mxu1 %v1481_v22 }
  0x44   : > { %1230 = vmatprep.mubr.msk.bf16.mxu0 %vm580_vm0, %v1482_v23  ;;  %1238 = vmatprep.mubr.msk.bf16.mxu1 %vm580_vm0, %v1484_v24 }
  0x4b   : > { %682 = vmatmul.mubr.bf16.gmra.mrb[8].mxu0 %v1486_v25  ;;  %746 = vmatmul.mubr.bf16.gmra.mrb[8].mxu1 %v1487_v26 }
  0x4c   : > { %1231 = vmatprep.mubr.msk.bf16.mxu0 %vm580_vm0, %v1488_v27  ;;  %1239 = vmatprep.mubr.msk.bf16.mxu1 %vm580_vm0, %v1490_v28 }
  0x53   : > { %690 = vmatmul.mubr.bf16.gmra.mrb[12].mxu0 %v1492_v29  ;;  %754 = vmatmul.mubr.bf16.gmra.mrb[12].mxu1 %v1493_v30 }
  0x54   : > { %1232 = vmatprep.mubr.msk.bf16.mxu0 %vm580_vm0, %v1494_v31  ;;  %1240 = vmatprep.mubr.msk.bf16.mxu1 %vm580_vm0, %v1496_v32 }
  0x5b   : > { %698 = vmatmul.mubr.bf16.gmra.mrb[16].mxu0 %v1498_v33  ;;  %762 = vmatmul.mubr.bf16.gmra.mrb[16].mxu1 %v1499_v34 }
  0x5c   : > { %1233 = vmatprep.mubr.msk.bf16.mxu0 %vm580_vm0, %v1500_v35  ;;  %1241 = vmatprep.mubr.msk.bf16.mxu1 %vm580_vm0, %v1502_v36 }
  0x63   : > { %706 = vmatmul.mubr.bf16.gmra.mrb[20].mxu0 %v1504_v37  ;;  %770 = vmatmul.mubr.bf16.gmra.mrb[20].mxu1 %v1505_v38 }
  0x64   : > { %1234 = vmatprep.mubr.msk.bf16.mxu0 %vm580_vm0, %v1506_v39  ;;  %1242 = vmatprep.mubr.msk.bf16.mxu1 %vm580_vm0, %v1508_v40 }
  0x6b   : > { %714 = vmatmul.mubr.bf16.gmra.mrb[24].mxu0 %v1510_v41  ;;  %778 = vmatmul.mubr.bf16.gmra.mrb[24].mxu1 %v1511_v42 }
  0x6c   : > { %1235 = vmatprep.mubr.msk.bf16.mxu0 %vm580_vm0, %v1512_v43  ;;  %1243 = vmatprep.mubr.msk.bf16.mxu1 %vm580_vm0, %v1514_v44 }
  0x73   : > { %722 = vmatmul.mubr.bf16.gmra.mrb[28].mxu0 %v1516_v45  ;;  %786 = vmatmul.mubr.bf16.gmra.mrb[28].mxu1 %v1517_v46 }
 0x10e   : > { %v667_v48 = vpop.f32.mrb[0].mxu0  ;;  %v731_v49 = vpop.f32.mrb[0].mxu1 }
 0x10f   : > { %v794_v50 = vadd.f32 %v1705_v47, %v667_v48  ;;  %v810_v51 = vadd.f32 %v1705_v47, %v731_v49  ;;  %v669_v52 = vpop.f32.mrb[1].mxu0  ;;  %v733_v53 = vpop.f32.mrb[1].mxu1 }
 0x110   : > { %v670_v54 = vpop.f32.mrb[2].mxu0  ;;  %v734_v55 = vpop.f32.mrb[2].mxu1 }
 0x111   : > { %v795_v56 = vadd.f32 %v1705_v47, %v670_v54  ;;  %v811_v57 = vadd.f32 %v1705_v47, %v734_v55  ;;  %v672_v58 = vpop.f32.mrb[3].mxu0  ;;  %v736_v59 = vpop.f32.mrb[3].mxu1  ;;  %v893_v60 = vmax.f32 %v794_v50, 0.0  ;;  %v909_v61 = vmax.f32 %v810_v51, 0.0 }
 0x113   : > { %v894_v62 = vmax.f32 %v795_v56, 0.0  ;;  %v910_v63 = vmax.f32 %v811_v57, 0.0 }
 0x115   : > { %v1314_v0 = vpack.c.bf16 %v894_v62, %v893_v60  ;;  %v1354_v1 = vpack.c.bf16 %v910_v63, %v909_v61 }
 0x116   : > { %v675_v2 = vpop.f32.mrb[4].mxu0  ;;  %v739_v3 = vpop.f32.mrb[4].mxu1 }
 0x117   : > { %1315 = vst [vmem:[%s1715_s29] sm:$0xff] %v1314_v0   ;;  %1398 = vst [vmem:[%s1715_s29 + $0x40] sm:$0xff] %v1354_v1   ;;  %v796_v4 = vadd.f32 %v1705_v47, %v675_v2  ;;  %v812_v5 = vadd.f32 %v1705_v47, %v739_v3  ;;  %v677_v6 = vpop.f32.mrb[5].mxu0  ;;  %v741_v7 = vpop.f32.mrb[5].mxu1 }
 0x118   : > { %v678_v8 = vpop.f32.mrb[6].mxu0  ;;  %v742_v9 = vpop.f32.mrb[6].mxu1 }
 0x119   : > { %v797_v10 = vadd.f32 %v1705_v47, %v678_v8  ;;  %v813_v11 = vadd.f32 %v1705_v47, %v742_v9  ;;  %v680_v12 = vpop.f32.mrb[7].mxu0  ;;  %v744_v13 = vpop.f32.mrb[7].mxu1  ;;  %v895_v14 = vmax.f32 %v796_v4, 0.0  ;;  %v911_v15 = vmax.f32 %v812_v5, 0.0 }
 0x11b   : > { %v896_v16 = vmax.f32 %v797_v10, 0.0  ;;  %v912_v17 = vmax.f32 %v813_v11, 0.0 }
 0x11d   : > { %v1319_v18 = vpack.c.bf16 %v896_v16, %v895_v14  ;;  %v1359_v19 = vpack.c.bf16 %v912_v17, %v911_v15 }
 0x11e   : > { %v683_v20 = vpop.f32.mrb[8].mxu0  ;;  %v747_v21 = vpop.f32.mrb[8].mxu1 }
 0x11f   : > { %1391 = vst [vmem:[%s1715_s29 + $0x8] sm:$0xff] %v1319_v18   ;;  %1399 = vst [vmem:[%s1715_s29 + $0x48] sm:$0xff] %v1359_v19   ;;  %v798_v22 = vadd.f32 %v1705_v47, %v683_v20  ;;  %v814_v23 = vadd.f32 %v1705_v47, %v747_v21  ;;  %v685_v24 = vpop.f32.mrb[9].mxu0  ;;  %v749_v25 = vpop.f32.mrb[9].mxu1 }
 0x120   : > { %v686_v26 = vpop.f32.mrb[10].mxu0  ;;  %v750_v27 = vpop.f32.mrb[10].mxu1 }
 0x121   : > { %v799_v28 = vadd.f32 %v1705_v47, %v686_v26  ;;  %v815_v29 = vadd.f32 %v1705_v47, %v750_v27  ;;  %v688_v30 = vpop.f32.mrb[11].mxu0  ;;  %v752_v31 = vpop.f32.mrb[11].mxu1  ;;  %v897_v32 = vmax.f32 %v798_v22, 0.0  ;;  %v913_v33 = vmax.f32 %v814_v23, 0.0 }
 0x123   : > { %v898_v34 = vmax.f32 %v799_v28, 0.0  ;;  %v914_v35 = vmax.f32 %v815_v29, 0.0 }
 0x125   : > { %v1324_v36 = vpack.c.bf16 %v898_v34, %v897_v32  ;;  %v1364_v37 = vpack.c.bf16 %v914_v35, %v913_v33 }
 0x126   : > { %v691_v38 = vpop.f32.mrb[12].mxu0  ;;  %v755_v39 = vpop.f32.mrb[12].mxu1 }
 0x127   : > { %1392 = vst [vmem:[%s1715_s29 + $0x10] sm:$0xff] %v1324_v36   ;;  %1400 = vst [vmem:[%s1715_s29 + $0x50] sm:$0xff] %v1364_v37   ;;  %v800_v40 = vadd.f32 %v1705_v47, %v691_v38  ;;  %v816_v41 = vadd.f32 %v1705_v47, %v755_v39  ;;  %v693_v42 = vpop.f32.mrb[13].mxu0  ;;  %v757_v43 = vpop.f32.mrb[13].mxu1 }
 0x128   : > { %v694_v44 = vpop.f32.mrb[14].mxu0  ;;  %v758_v45 = vpop.f32.mrb[14].mxu1 }
 0x129   : > { %v801_v46 = vadd.f32 %v1705_v47, %v694_v44  ;;  %v817_v48 = vadd.f32 %v1705_v47, %v758_v45  ;;  %v696_v49 = vpop.f32.mrb[15].mxu0  ;;  %v760_v50 = vpop.f32.mrb[15].mxu1  ;;  %v899_v51 = vmax.f32 %v800_v40, 0.0  ;;  %v915_v52 = vmax.f32 %v816_v41, 0.0 }
 0x12b   : > { %v900_v53 = vmax.f32 %v801_v46, 0.0  ;;  %v916_v54 = vmax.f32 %v817_v48, 0.0 }
 0x12d   : > { %v1329_v55 = vpack.c.bf16 %v900_v53, %v899_v51  ;;  %v1369_v56 = vpack.c.bf16 %v916_v54, %v915_v52 }
 0x12e   : > { %v699_v57 = vpop.f32.mrb[16].mxu0  ;;  %v763_v58 = vpop.f32.mrb[16].mxu1 }
 0x12f   : > { %1393 = vst [vmem:[%s1715_s29 + $0x18] sm:$0xff] %v1329_v55   ;;  %1401 = vst [vmem:[%s1715_s29 + $0x58] sm:$0xff] %v1369_v56   ;;  %v802_v59 = vadd.f32 %v1705_v47, %v699_v57  ;;  %v818_v60 = vadd.f32 %v1705_v47, %v763_v58  ;;  %v701_v61 = vpop.f32.mrb[17].mxu0  ;;  %v765_v62 = vpop.f32.mrb[17].mxu1 }
 0x130   : > { %v702_v63 = vpop.f32.mrb[18].mxu0  ;;  %v766_v0 = vpop.f32.mrb[18].mxu1 }
 0x131   : > { %v803_v1 = vadd.f32 %v1705_v47, %v702_v63  ;;  %v819_v2 = vadd.f32 %v1705_v47, %v766_v0  ;;  %v704_v3 = vpop.f32.mrb[19].mxu0  ;;  %v768_v4 = vpop.f32.mrb[19].mxu1  ;;  %v901_v5 = vmax.f32 %v802_v59, 0.0  ;;  %v917_v6 = vmax.f32 %v818_v60, 0.0 }
 0x133   : > { %v902_v7 = vmax.f32 %v803_v1, 0.0  ;;  %v918_v8 = vmax.f32 %v819_v2, 0.0 }
 0x135   : > { %v1334_v9 = vpack.c.bf16 %v902_v7, %v901_v5  ;;  %v1374_v10 = vpack.c.bf16 %v918_v8, %v917_v6 }
 0x136   : > { %v707_v11 = vpop.f32.mrb[20].mxu0  ;;  %v771_v12 = vpop.f32.mrb[20].mxu1 }
 0x137   : > { %1394 = vst [vmem:[%s1715_s29 + $0x20] sm:$0xff] %v1334_v9   ;;  %1402 = vst [vmem:[%s1715_s29 + $0x60] sm:$0xff] %v1374_v10   ;;  %v804_v13 = vadd.f32 %v1705_v47, %v707_v11  ;;  %v820_v14 = vadd.f32 %v1705_v47, %v771_v12  ;;  %v709_v15 = vpop.f32.mrb[21].mxu0  ;;  %v773_v16 = vpop.f32.mrb[21].mxu1 }
 0x138   : > { %v710_v17 = vpop.f32.mrb[22].mxu0  ;;  %v774_v18 = vpop.f32.mrb[22].mxu1 }
 0x139   : > { %v805_v19 = vadd.f32 %v1705_v47, %v710_v17  ;;  %v821_v20 = vadd.f32 %v1705_v47, %v774_v18  ;;  %v712_v21 = vpop.f32.mrb[23].mxu0  ;;  %v776_v22 = vpop.f32.mrb[23].mxu1  ;;  %v903_v23 = vmax.f32 %v804_v13, 0.0  ;;  %v919_v24 = vmax.f32 %v820_v14, 0.0 }
 0x13b   : > { %v904_v25 = vmax.f32 %v805_v19, 0.0  ;;  %v920_v26 = vmax.f32 %v821_v20, 0.0 }
 0x13d   : > { %v1339_v27 = vpack.c.bf16 %v904_v25, %v903_v23  ;;  %v1379_v28 = vpack.c.bf16 %v920_v26, %v919_v24 }
 0x13e   : > { %v715_v29 = vpop.f32.mrb[24].mxu0  ;;  %v779_v30 = vpop.f32.mrb[24].mxu1 }
 0x13f   : > { %1395 = vst [vmem:[%s1715_s29 + $0x28] sm:$0xff] %v1339_v27   ;;  %1403 = vst [vmem:[%s1715_s29 + $0x68] sm:$0xff] %v1379_v28   ;;  %v806_v31 = vadd.f32 %v1705_v47, %v715_v29  ;;  %v822_v32 = vadd.f32 %v1705_v47, %v779_v30  ;;  %v717_v33 = vpop.f32.mrb[25].mxu0  ;;  %v781_v34 = vpop.f32.mrb[25].mxu1 }
 0x140   : > { %v718_v35 = vpop.f32.mrb[26].mxu0  ;;  %v782_v36 = vpop.f32.mrb[26].mxu1 }
 0x141   : > { %v807_v37 = vadd.f32 %v1705_v47, %v718_v35  ;;  %v823_v38 = vadd.f32 %v1705_v47, %v782_v36  ;;  %v720_v39 = vpop.f32.mrb[27].mxu0  ;;  %v784_v40 = vpop.f32.mrb[27].mxu1  ;;  %v905_v41 = vmax.f32 %v806_v31, 0.0  ;;  %v921_v42 = vmax.f32 %v822_v32, 0.0 }
 0x143   : > { %v906_v43 = vmax.f32 %v807_v37, 0.0  ;;  %v922_v44 = vmax.f32 %v823_v38, 0.0 }
 0x145   : > { %v1344_v45 = vpack.c.bf16 %v906_v43, %v905_v41  ;;  %v1384_v46 = vpack.c.bf16 %v922_v44, %v921_v42 }
 0x146   : > { %v723_v48 = vpop.f32.mrb[28].mxu0  ;;  %v787_v49 = vpop.f32.mrb[28].mxu1 }
 0x147   : > { %1396 = vst [vmem:[%s1715_s29 + $0x30] sm:$0xff] %v1344_v45   ;;  %1404 = vst [vmem:[%s1715_s29 + $0x70] sm:$0xff] %v1384_v46   ;;  %v808_v50 = vadd.f32 %v1705_v47, %v723_v48  ;;  %v824_v51 = vadd.f32 %v1705_v47, %v787_v49  ;;  %v725_v52 = vpop.f32.mrb[29].mxu0  ;;  %v789_v53 = vpop.f32.mrb[29].mxu1 }
 0x148   : > { %v726_v54 = vpop.f32.mrb[30].mxu0  ;;  %v790_v55 = vpop.f32.mrb[30].mxu1 }
 0x149   : > { %v809_v56 = vadd.f32 %v1705_v47, %v726_v54  ;;  %v825_v57 = vadd.f32 %v1705_v47, %v790_v55  ;;  %v728_v58 = vpop.f32.mrb[31].mxu0  ;;  %v792_v59 = vpop.f32.mrb[31].mxu1  ;;  %v907_v60 = vmax.f32 %v808_v50, 0.0  ;;  %v923_v61 = vmax.f32 %v824_v51, 0.0 }
 0x14b   : > { %v908_v62 = vmax.f32 %v809_v56, 0.0  ;;  %v924_v63 = vmax.f32 %v825_v57, 0.0 }
 0x14d   : > { %v1349_v0 = vpack.c.bf16 %v908_v62, %v907_v60  ;;  %v1389_v1 = vpack.c.bf16 %v924_v63, %v923_v61 }
 0x14f   : > { %1397 = vst [vmem:[%s1715_s29 + $0x38] sm:$0xff] %v1349_v0   ;;  %1405 = vst [vmem:[%s1715_s29 + $0x78] sm:$0xff] %v1389_v1  }
 0x150 PF: > { %s13_s14 = sadd.s32 1, %s1540_s14   ;;  %s1774_s12 = smov %s1536_s13 }
 0x151   : > { %p10_p5 = scmp.ge.s32.totalorder %s13_s14, 4   ;;  %s1775_s13 = smov %s1777_s15 }
 0x153   :  { %12 = sbr.rel (!%p10_p5) target bundleno = 2 (0x2), region = 73 }

// kernel: enhanced_cnn_policy_forward.5
= control target key start
LH: loop header
LB: loop body
LE: loop exit
PB: predicated region body
PF: predicated region fallthrough
CT: control target
= control target key end

     0   :  { %s4139_s12 = smov 0   ;;  %s4141_s13 = smov 0   ;;  %s5037_s0 = inlined_call_operand.vmem [shape: bf16[512,1152], index: 0, kind: input, shape index: {}]   ;;  %s5038_s1 = inlined_call_operand.vmem [shape: bf16[1152,64], index: 1, kind: input, shape index: {}]   ;;  %s5039_s2 = inlined_call_operand.vmem [shape: f32[1,64], index: 2, kind: input, shape index: {}]   ;;  %s5040_s3 = inlined_call_operand.vmem [shape: bf16[512,64], index: 3, kind: output, shape index: {}]  }
   0x1   :  { %s4143_s14 = smov 0  }
   0x2 LB: > { %s25_s15 = sadd.s32 1, %s4113_s13  ;;  %p2966_p0 = scmp.ge.s32.totalorder %s4117_s14, 1  ;;  %s4117_s14 = sphi %s4143_s14, %s13_s14   ;;  %s4113_s13 = sphi %s4141_s13, %s5042_s13   ;;  %s4109_s12 = sphi %s4139_s12, %s5041_s12  }
   0x3   : > { %p27_p1 = scmp.ge.s32.totalorder %s25_s15, 2  ;;  %p169_p2 = scmp.lt.s32.totalorder %s4117_s14, 3 }
   0x5   : > { %s5044_s15 = smov (%p27_p1, %s25_s15), 0  ;;  %p170_p3 = pnand %p2966_p0, %p169_p2 }
   0x6   : > { %v3815_v0 = vld [vmem:[%s5038_s1 + $0x40] sm:$0xff] (!%p170_p3)   ;;  %s2967_s18 = sshll.u32 (!%p170_p3), %s4109_s12, 5  ;;  %v3817_v2 = vld [vmem:[%s5038_s1 + $0x48] sm:$0xff] (!%p170_p3)   ;;  %v3819_v4 = vld [vmem:[%s5038_s1 + $0x50] sm:$0xff] (!%p170_p3)   ;;  %vm240_vm0 = vcmask (!%p170_p3), 523264   ;;  %vm2842_vm1 = vcmask (!%p170_p3), 519168  }
   0x7   : > { %173 = sbr.rel (%p170_p3) target bundleno = 556 (0x22c), region = 32  ;;  %v3816_v1 = vld [vmem:[%s5038_s1] sm:$0xff] (!%p170_p3)   ;;  %3254 = vmatprep.subr.bf16.mxu0 (!%p170_p3), %v3815_v0  ;;  %3774 = vmatprep.subr.bf16.mxu1 (!%p170_p3), %v3815_v0  ;;  %p205_p4 = scmp.lt.s32.totalorder (!%p170_p3), %s2967_s18, 63  ;;  %v3818_v3 = vld [vmem:[%s5038_s1 + $0x8] sm:$0xff] (!%p170_p3)   ;;  %v3820_v5 = vld [vmem:[%s5038_s1 + $0x10] sm:$0xff] (!%p170_p3)  }
   0x8   : > { %3255 = vmatpush3.bf16.msra.mxu0 (!%p170_p3), %v3816_v1  ;;  %3782 = vmatpush3.bf16.msra.mxu1 (!%p170_p3), %v3816_v1  ;;  %v3821_v6 = vld [vmem:[%s5038_s1 + $0x58] sm:$0xff] (!%p170_p3)   ;;  %v3823_v8 = vld [vmem:[%s5038_s1 + $0x60] sm:$0xff] (!%p170_p3)   ;;  %v3825_v10 = vld [vmem:[%s5038_s1 + $0x68] sm:$0xff] (!%p170_p3)  }
   0x9   : > { %3256 = vmatprep.subr.bf16.mxu0 (!%p170_p3), %v3817_v2  ;;  %3775 = vmatprep.subr.bf16.mxu1 (!%p170_p3), %v3817_v2  ;;  %v3822_v7 = vld [vmem:[%s5038_s1 + $0x18] sm:$0xff] (!%p170_p3)   ;;  %v3824_v9 = vld [vmem:[%s5038_s1 + $0x20] sm:$0xff] (!%p170_p3)   ;;  %v3826_v13 = vld [vmem:[%s5038_s1 + $0x28] sm:$0xff] (!%p170_p3)  }
   0xa   : > { %v3827_v14 = vld [vmem:[%s5038_s1 + $0x70] sm:$0xff] (!%p170_p3)   ;;  %v3829_v16 = vld [vmem:[%s5038_s1 + $0x78] sm:$0xff] (!%p170_p3)   ;;  %v3837_v18 = vld [vmem:[%s5038_s1 + $0xc0] sm:$0xff] (!%p170_p3)  }
   0xb   : > { %v3828_v15 = vld [vmem:[%s5038_s1 + $0x30] sm:$0xff] (!%p170_p3)   ;;  %v3830_v17 = vld [vmem:[%s5038_s1 + $0x38] sm:$0xff] (!%p170_p3)   ;;  %v3840_v21 = vld [vmem:[%s5038_s1 + $0x140] sm:$0xff] (!%p170_p3)  }
   0xc   : > { %3257 = vmatpush3.bf16.msra.mxu0 (!%p170_p3), %v3818_v3  ;;  %3783 = vmatpush3.bf16.msra.mxu1 (!%p170_p3), %v3818_v3  ;;  %v3838_v22 = vld [vmem:[%s5038_s1 + $0x80] sm:$0xff] (!%p170_p3)   ;;  %v3839_v23 = vld [vmem:[%s5038_s1 + $0xc8] sm:$0xff] (!%p170_p3)   ;;  %v3849_v31 = vld [vmem:[%s5038_s1 + $0xd0] sm:$0xff] (!%p170_p3)  }
   0xd   : > { %3258 = vmatprep.subr.bf16.mxu0 (!%p170_p3), %v3819_v4  ;;  %3776 = vmatprep.subr.bf16.mxu1 (!%p170_p3), %v3819_v4  ;;  %v3842_v24 = vld [vmem:[%s5038_s1 + $0x100] sm:$0xff] (!%p170_p3)   ;;  %v3841_v27 = vld [vmem:[%s5038_s1 + $0x88] sm:$0xff] (!%p170_p3)   ;;  %v3850_v32 = vld [vmem:[%s5038_s1 + $0x90] sm:$0xff] (!%p170_p3)  }
   0xe   : > { %s5046_s18 = smov (!%p205_p4, %s2967_s18), 63  ;;  %v3860_v28 = vld [vmem:[%s5038_s1 + $0x148] sm:$0xff]   ;;  %v3851_v34 = vld [vmem:[%s5038_s1 + $0xd8] sm:$0xff]   ;;  %v3859_v40 = vld [vmem:[%s5038_s1 + $0xe0] sm:$0xff]  }
   0xf   : > { %s3790_s4 = smul.u32 36, %s5046_s18  ;;  %v3862_v33 = vld [vmem:[%s5038_s1 + $0x108] sm:$0xff]   ;;  %v3852_v37 = vld [vmem:[%s5038_s1 + $0x98] sm:$0xff]   ;;  %v3861_v41 = vld [vmem:[%s5038_s1 + $0xa0] sm:$0xff]   ;;  %s2970_s6 = sshll.u32 %s5046_s18, 2 }
  0x10   : > { %3259 = vmatpush3.bf16.msra.mxu0 %v3820_v5  ;;  %3784 = vmatpush3.bf16.msra.mxu1 %v3820_v5  ;;  %v3863_v42 = vld [vmem:[%s5038_s1 + $0xe8] sm:$0xff]   ;;  %v3874_v43 = vld [vmem:[%s5038_s1 + $0x150] sm:$0xff]   ;;  %v3873_v52 = vld [vmem:[%s5038_s1 + $0xf8] sm:$0xff]   ;;  %s4890_s8 = scalar_lea.vmem %s5040_s3, %s2970_s6 }
  0x11   : > { %3260 = vmatprep.subr.bf16.mxu0 %v3821_v6  ;;  %3777 = vmatprep.subr.bf16.mxu1 %v3821_v6  ;;  %s4190_s11 = scalar_lea.vmem %s5037_s0, %s3790_s4  ;;  %v3876_v46 = vld [vmem:[%s5038_s1 + $0x110] sm:$0xff]   ;;  %v3864_v47 = vld [vmem:[%s5038_s1 + $0xa8] sm:$0xff]   ;;  %v3891_v55 = vld [vmem:[%s5038_s1 + $0x158] sm:$0xff]  }
  0x12   : > { %v3833_v11 = vld [vmem:[%s4190_s11 + $0x4] ss:$36 sps:$4 sm:$0xff]   ;;  %v3843_v25 = vld [vmem:[%s4190_s11 + $0x4c] ss:$36 sps:$4 sm:$0xff]   ;;  %v3853_v35 = vld [vmem:[%s4190_s11 + $0x94] ss:$36 sps:$4 sm:$0xff]  }
  0x13   : > { %v3836_v12 = vld [vmem:[%s4190_s11 + $0x364] ss:$36 sps:$4 sm:$0xff]   ;;  %1809 = vmatprep.mubr.bf16.mxu0 %v3833_v11  ;;  %v3845_v26 = vld [vmem:[%s4190_s11 + $0x3ac] ss:$36 sps:$4 sm:$0xff]   ;;  %v3855_v36 = vld [vmem:[%s4190_s11 + $0x3f4] ss:$36 sps:$4 sm:$0xff]  }
  0x14   : > { %3261 = vmatpush3.bf16.msra.mxu0 %v3822_v7  ;;  %3785 = vmatpush3.bf16.msra.mxu1 %v3822_v7  ;;  %v3831_v19 = vld [vmem:[%s4190_s11] ss:$36 sps:$4 sm:$0xff]   ;;  %v3847_v29 = vld [vmem:[%s4190_s11 + $0x48] ss:$36 sps:$4 sm:$0xff]   ;;  %v3857_v38 = vld [vmem:[%s4190_s11 + $0x90] ss:$36 sps:$4 sm:$0xff]  }
  0x15   : > { %3262 = vmatprep.subr.bf16.mxu0 %v3823_v8  ;;  %3778 = vmatprep.subr.bf16.mxu1 %v3823_v8  ;;  %v3834_v20 = vld [vmem:[%s4190_s11 + $0x360] ss:$36 sps:$4 sm:$0xff]   ;;  %v3848_v30 = vld [vmem:[%s4190_s11 + $0x3a8] ss:$36 sps:$4 sm:$0xff]   ;;  %v3858_v39 = vld [vmem:[%s4190_s11 + $0x3f0] ss:$36 sps:$4 sm:$0xff]  }
  0x16   : > { %1905 = vmatprep.mubr.bf16.mxu1 %v3836_v12  ;;  %v3865_v44 = vld [vmem:[%s4190_s11 + $0xdc] ss:$36 sps:$4 sm:$0xff]   ;;  %v3871_v48 = vld [vmem:[%s5038_s1 + $0xf0] sm:$0xff]   ;;  %v3877_v53 = vld [vmem:[%s4190_s11 + $0x124] ss:$36 sps:$4 sm:$0xff]  }
  0x17   : > { %v3867_v45 = vld [vmem:[%s4190_s11 + $0x43c] ss:$36 sps:$4 sm:$0xff]   ;;  %v3872_v51 = vld [vmem:[%s5038_s1 + $0xb0] sm:$0xff]   ;;  %v3879_v58 = vld [vmem:[%s4190_s11 + $0x8] ss:$36 sps:$4 sm:$0xff]  }
  0x18   : > { %3263 = vmatpush3.bf16.msra.mxu0 %v3824_v9  ;;  %3786 = vmatpush3.bf16.msra.mxu1 %v3824_v9  ;;  %v3869_v49 = vld [vmem:[%s4190_s11 + $0xd8] ss:$36 sps:$4 sm:$0xff]   ;;  %v3881_v54 = vld [vmem:[%s4190_s11 + $0xc] ss:$36 sps:$4 sm:$0xff]   ;;  %v3882_v59 = vld [vmem:[%s4190_s11 + $0x120] ss:$36 sps:$4 sm:$0xff]  }
  0x19   : > { %3264 = vmatprep.subr.bf16.mxu0 %v3825_v10  ;;  %3779 = vmatprep.subr.bf16.mxu1 %v3825_v10  ;;  %v3870_v50 = vld [vmem:[%s4190_s11 + $0x438] ss:$36 sps:$4 sm:$0xff]   ;;  %v3883_v60 = vld [vmem:[%s5038_s1 + $0x1c0] sm:$0xff]   ;;  %v3885_v62 = vld [vmem:[%s4190_s11 + $0x16c] ss:$36 sps:$4 sm:$0xff]  }
  0x1a   : > { %v3892_v56 = vld [vmem:[%s5038_s1 + $0x118] sm:$0xff]   ;;  %v3884_v61 = vld [vmem:[%s5038_s1 + $0x180] sm:$0xff]   ;;  %v3899_v1 = vld [vmem:[%s5038_s1 + $0x1c8] sm:$0xff]  }
  0x1b   : > { %v3875_v57 = vld [vmem:[%s5038_s1 + $0xb8] sm:$0xff]   ;;  %v3901_v0 = vld [vmem:[%s5038_s1 + $0x160] sm:$0xff]   ;;  %v3900_v3 = vld [vmem:[%s5038_s1 + $0x188] sm:$0xff]  }
  0x1c   : > { %3265 = vmatpush3.bf16.msra.mxu0 %v3826_v13  ;;  %3787 = vmatpush3.bf16.msra.mxu1 %v3826_v13  ;;  %v3887_v63 = vld [vmem:[%s4190_s11 + $0x54] ss:$36 sps:$4 sm:$0xff]   ;;  %v3902_v2 = vld [vmem:[%s5038_s1 + $0x120] sm:$0xff]   ;;  %v3889_v4 = vld [vmem:[%s4190_s11 + $0x168] ss:$36 sps:$4 sm:$0xff]  }
  0x1d   : > { %3266 = vmatprep.subr.bf16.mxu0 %v3827_v14  ;;  %3780 = vmatprep.subr.bf16.mxu1 %v3827_v14  ;;  %v3890_v5 = vld [vmem:[%s4190_s11 + $0x50] ss:$36 sps:$4 sm:$0xff]   ;;  %v3895_v7 = vld [vmem:[%s4190_s11 + $0x9c] ss:$36 sps:$4 sm:$0xff]   ;;  %v3915_v8 = vld [vmem:[%s5038_s1 + $0x168] sm:$0xff]  }
  0x1e   : > { %v3893_v6 = vld [vmem:[%s4190_s11 + $0x1b4] ss:$36 sps:$4 sm:$0xff]   ;;  %v3917_v10 = vld [vmem:[%s5038_s1 + $0x128] sm:$0xff]   ;;  %v3903_v14 = vld [vmem:[%s4190_s11 + $0x1fc] ss:$36 sps:$4 sm:$0xff]  }
  0x1f   : > { %v3916_v9 = vld [vmem:[%s5038_s1 + $0x1d0] sm:$0xff]   ;;  %v3898_v13 = vld [vmem:[%s4190_s11 + $0x98] ss:$36 sps:$4 sm:$0xff]  }
  0x20   : > { %3267 = vmatpush3.bf16.msra.mxu0 %v3828_v15  ;;  %3788 = vmatpush3.bf16.msra.mxu1 %v3828_v15  ;;  %v3918_v11 = vld [vmem:[%s5038_s1 + $0x190] sm:$0xff]  }
  0x21   : > { %3268 = vmatprep.subr.bf16.mxu0 %v3829_v16  ;;  %3781 = vmatprep.subr.bf16.mxu1 %v3829_v16  ;;  %v3897_v12 = vld [vmem:[%s4190_s11 + $0x1b0] ss:$36 sps:$4 sm:$0xff]  }
  0x22   : > { %v3925_v15 = vld [vmem:[%s5038_s1 + $0x170] sm:$0xff]  }
  0x23   : > { %v3926_v16 = vld [vmem:[%s5038_s1 + $0x130] sm:$0xff]  }
  0x24   : > { %3269 = vmatpush3.bf16.msra.mxu0 %v3830_v17  ;;  %3789 = vmatpush3.bf16.msra.mxu1 %v3830_v17  ;;  %v3905_v17 = vld [vmem:[%s4190_s11 + $0xe4] ss:$36 sps:$4 sm:$0xff]  }
  0x25   : > { %3366 = vmatprep.subr.bf16.mxu1 %v3837_v18  ;;  %3478 = vmatprep.subr.bf16.mxu0 %v3840_v21  ;;  %v3933_v18 = vld [vmem:[%s5038_s1 + $0x1d8] sm:$0xff]   ;;  %v3908_v21 = vld [vmem:[%s4190_s11 + $0xe0] ss:$36 sps:$4 sm:$0xff]  }
  0x27   : > { %1810 = vmatmul.mubr.bf16.vlgmr.msra.gmra.mrb[0].mxu0 %v3831_v19  ;;  %1906 = vmatmul.mubr.bf16.vlgmr.msra.gmra.mrb[0].mxu1 %v3834_v20  ;;  %v3934_v19 = vld [vmem:[%s5038_s1 + $0x198] sm:$0xff]  }
  0x28   : > { %3367 = vmatpush3.bf16.msra.mxu1 %v3838_v22  ;;  %3479 = vmatpush3.bf16.msra.mxu0 %v3842_v24  ;;  %v3907_v20 = vld [vmem:[%s4190_s11 + $0x1f8] ss:$36 sps:$4 sm:$0xff]   ;;  %v3909_v22 = vld [vmem:[%s4190_s11 + $0x244] ss:$36 sps:$4 sm:$0xff]  }
  0x29   : > { %3368 = vmatprep.subr.bf16.mxu1 %v3839_v23  ;;  %1817 = vmatprep.mubr.bf16.mxu0 %v3843_v25  ;;  %v3911_v23 = vld [vmem:[%s4190_s11 + $0x12c] ss:$36 sps:$4 sm:$0xff]   ;;  %v3941_v24 = vld [vmem:[%s5038_s1 + $0x178] sm:$0xff]  }
  0x2a   : > { %1913 = vmatprep.mubr.bf16.mxu1 %v3845_v26  ;;  %3480 = vmatprep.subr.bf16.mxu0 %v3860_v28  ;;  %v3942_v25 = vld [vmem:[%s5038_s1 + $0x138] sm:$0xff]   ;;  %v3949_v26 = vld [vmem:[%s5038_s1 + $0x1e0] sm:$0xff]  }
  0x2b   : > { %v3950_v28 = vld [vmem:[%s5038_s1 + $0x1a0] sm:$0xff]  }
  0x2c   : > { %3369 = vmatpush3.bf16.msra.mxu1 %v3841_v27  ;;  %3481 = vmatpush3.bf16.msra.mxu0 %v3862_v33  ;;  %v3913_v27 = vld [vmem:[%s4190_s11 + $0x240] ss:$36 sps:$4 sm:$0xff]   ;;  %v3964_v33 = vld [vmem:[%s5038_s1 + $0x1e8] sm:$0xff]  }
  0x2d   : > { %3370 = vmatprep.subr.bf16.mxu1 %v3849_v31  ;;  %3482 = vmatprep.subr.bf16.mxu0 %v3874_v43  ;;  %v3919_v31 = vld [vmem:[%s4190_s11 + $0x28c] ss:$36 sps:$4 sm:$0xff]   ;;  %v3935_v43 = vld [vmem:[%s4190_s11 + $0x31c] ss:$36 sps:$4 sm:$0xff]  }
  0x2f   : > { %1818 = vmatmul.mubr.bf16.gmra.mrb[4].mxu0 %v3847_v29  ;;  %1914 = vmatmul.mubr.bf16.gmra.mrb[4].mxu1 %v3848_v30  ;;  %v3951_v29 = vld [vmem:[%s5038_s1 + $0x200] sm:$0xff]   ;;  %v3914_v30 = vld [vmem:[%s4190_s11 + $0x128] ss:$36 sps:$4 sm:$0xff]  }
  0x30   : > { %3371 = vmatpush3.bf16.msra.mxu1 %v3850_v32  ;;  %1825 = vmatprep.mubr.bf16.mxu0 %v3853_v35  ;;  %v3921_v32 = vld [vmem:[%s4190_s11 + $0x174] ss:$36 sps:$4 sm:$0xff]   ;;  %v3965_v35 = vld [vmem:[%s5038_s1 + $0x1a8] sm:$0xff]  }
  0x31   : > { %3372 = vmatprep.subr.bf16.mxu1 %v3851_v34  ;;  %1921 = vmatprep.mubr.bf16.mxu1 %v3855_v36  ;;  %v3923_v34 = vld [vmem:[%s4190_s11 + $0x288] ss:$36 sps:$4 sm:$0xff]   ;;  %v3924_v36 = vld [vmem:[%s4190_s11 + $0x170] ss:$36 sps:$4 sm:$0xff]  }
  0x32   : > { %3483 = vmatpush3.bf16.msra.mxu0 %v3876_v46  ;;  %v3940_v46 = vld [vmem:[%s4190_s11 + $0x200] ss:$36 sps:$4 sm:$0xff]  }
  0x33   : > { %3484 = vmatprep.subr.bf16.mxu0 %v3891_v55  ;;  %v3966_v55 = vld [vmem:[%s5038_s1 + $0x208] sm:$0xff]  }
  0x34   : > { %3373 = vmatpush3.bf16.msra.mxu1 %v3852_v37  ;;  %v3927_v37 = vld [vmem:[%s4190_s11 + $0x2d4] ss:$36 sps:$4 sm:$0xff]  }
  0x35   : > { %3374 = vmatprep.subr.bf16.mxu1 %v3859_v40  ;;  %v3932_v40 = vld [vmem:[%s4190_s11 + $0x1b8] ss:$36 sps:$4 sm:$0xff]  }
  0x36   : > { %3485 = vmatpush3.bf16.msra.mxu0 %v3892_v56  ;;  %v3981_v56 = vld [vmem:[%s5038_s1 + $0x210] sm:$0xff]  }
  0x37   : > { %1826 = vmatmul.mubr.bf16.gmra.mrb[8].mxu0 %v3857_v38  ;;  %1922 = vmatmul.mubr.bf16.gmra.mrb[8].mxu1 %v3858_v39  ;;  %v3929_v38 = vld [vmem:[%s4190_s11 + $0x1bc] ss:$36 sps:$4 sm:$0xff]   ;;  %v3931_v39 = vld [vmem:[%s4190_s11 + $0x2d0] ss:$36 sps:$4 sm:$0xff]  }
  0x38   : > { %3375 = vmatpush3.bf16.msra.mxu1 %v3861_v41  ;;  %1833 = vmatprep.mubr.bf16.mxu0 %v3865_v44  ;;  %v3979_v41 = vld [vmem:[%s5038_s1 + $0x1f0] sm:$0xff]   ;;  %v3937_v44 = vld [vmem:[%s4190_s11 + $0x204] ss:$36 sps:$4 sm:$0xff]  }
  0x39   : > { %3376 = vmatprep.subr.bf16.mxu1 %v3863_v42  ;;  %1929 = vmatprep.mubr.bf16.mxu1 %v3867_v45  ;;  %v3980_v42 = vld [vmem:[%s5038_s1 + $0x1b0] sm:$0xff]   ;;  %v3939_v45 = vld [vmem:[%s4190_s11 + $0x318] ss:$36 sps:$4 sm:$0xff]  }
  0x3a   : > { %3486 = vmatprep.subr.bf16.mxu0 %v3901_v0  ;;  %v3963_v0 = vld [vmem:[%s4190_s11 + $0xa0] ss:$36 sps:$4 sm:$0xff]  }
  0x3b   : > { %3487 = vmatpush3.bf16.msra.mxu0 %v3902_v2  ;;  %v3969_v2 = vld [vmem:[%s4190_s11 + $0xec] ss:$36 sps:$4 sm:$0xff]  }
  0x3c   : > { %3377 = vmatpush3.bf16.msra.mxu1 %v3864_v47  ;;  %3488 = vmatprep.subr.bf16.mxu0 %v3915_v8  ;;  %v3994_v47 = vld [vmem:[%s5038_s1 + $0x1f8] sm:$0xff]  }
  0x3d   : > { %3378 = vmatprep.subr.bf16.mxu1 %v3871_v48  ;;  %v3995_v48 = vld [vmem:[%s5038_s1 + $0x1b8] sm:$0xff]  }
  0x3e   : > { %v3975_v8 = vld [vmem:[%s4190_s11 + $0x134] ss:$36 sps:$4 sm:$0xff]  }
  0x3f   : > { %1834 = vmatmul.mubr.bf16.gmra.mrb[12].mxu0 %v3869_v49  ;;  %1930 = vmatmul.mubr.bf16.gmra.mrb[12].mxu1 %v3870_v50  ;;  %v3943_v49 = vld [vmem:[%s4190_s11 + $0x24c] ss:$36 sps:$4 sm:$0xff]   ;;  %v3947_v50 = vld [vmem:[%s4190_s11 + $0x14] ss:$36 sps:$4 sm:$0xff]  }
  0x40   : > { %3379 = vmatpush3.bf16.msra.mxu1 %v3872_v51  ;;  %1841 = vmatprep.mubr.bf16.mxu0 %v3877_v53  ;;  %v3945_v51 = vld [vmem:[%s4190_s11 + $0x10] ss:$36 sps:$4 sm:$0xff]  }
  0x41   : > { %3380 = vmatprep.subr.bf16.mxu1 %v3873_v52  ;;  %1970 = vmatprep.mubr.bf16.mxu1 %v3881_v54  ;;  %v3948_v52 = vld [vmem:[%s4190_s11 + $0x248] ss:$36 sps:$4 sm:$0xff]   ;;  %v3952_v53 = vld [vmem:[%s4190_s11 + $0x294] ss:$36 sps:$4 sm:$0xff]   ;;  %v3954_v54 = vld [vmem:[%s4190_s11 + $0x5c] ss:$36 sps:$4 sm:$0xff]  }
  0x42   : > { %3489 = vmatpush3.bf16.msra.mxu0 %v3917_v10  ;;  %v3977_v10 = vld [vmem:[%s4190_s11 + $0x368] ss:$36 sps:$4 sm:$0xff]  }
  0x43   : > { %3490 = vmatprep.subr.bf16.mxu0 %v3925_v15  ;;  %v3987_v15 = vld [vmem:[%s4190_s11 + $0x178] ss:$36 sps:$4 sm:$0xff]  }
  0x44   : > { %3381 = vmatpush3.bf16.msra.mxu1 %v3875_v57  ;;  %v3956_v57 = vld [vmem:[%s4190_s11 + $0x290] ss:$36 sps:$4 sm:$0xff]  }
  0x45   : > { %3590 = vmatprep.subr.bf16.mxu1 %v3883_v60  ;;  %v3960_v60 = vld [vmem:[%s4190_s11 + $0xa4] ss:$36 sps:$4 sm:$0xff]  }
  0x46   : > { %3491 = vmatpush3.bf16.msra.mxu0 %v3926_v16  ;;  %v3988_v16 = vld [vmem:[%s4190_s11 + $0x3fc] ss:$36 sps:$4 sm:$0xff]  }
  0x47   : > { %1842 = vmatmul.mubr.bf16.gmra.mrb[16].mxu0 %v3882_v59  ;;  %1971 = vmatmul.mubr.bf16.vlgmr.msra.gmra.mrb[16].mxu1 %v3879_v58  ;;  %v3957_v58 = vld [vmem:[%s4190_s11 + $0x58] ss:$36 sps:$4 sm:$0xff]  }
  0x48   : > { %3591 = vmatpush3.bf16.msra.mxu1 %v3884_v61  ;;  %1849 = vmatprep.mubr.bf16.mxu0 %v3885_v62  ;;  %v3958_v59 = vld [vmem:[%s4190_s11 + $0x2dc] ss:$36 sps:$4 sm:$0xff]  }
  0x49   : > { %1978 = vmatprep.mubr.bf16.mxu1 %v3887_v63  ;;  %3592 = vmatprep.subr.bf16.mxu1 %v3899_v1  ;;  %v3996_v61 = vld [vmem:[%s5038_s1 + $0x218] sm:$0xff]   ;;  %v4009_v62 = vld [vmem:[%s5038_s1 + $0x220] sm:$0xff]  }
  0x4a   : > { %3492 = vmatprep.subr.bf16.mxu0 %v3941_v24  ;;  %v3962_v63 = vld [vmem:[%s4190_s11 + $0x2d8] ss:$36 sps:$4 sm:$0xff]   ;;  %v3967_v1 = vld [vmem:[%s4190_s11 + $0x324] ss:$36 sps:$4 sm:$0xff]  }
  0x4b   : > { %3493 = vmatpush3.bf16.msra.mxu0 %v3942_v25  ;;  %v4003_v24 = vld [vmem:[%s4190_s11 + $0x254] ss:$36 sps:$4 sm:$0xff]   ;;  %v4007_v25 = vld [vmem:[%s4190_s11 + $0x1c] ss:$36 sps:$4 sm:$0xff]  }
  0x4c   : > { %3593 = vmatpush3.bf16.msra.mxu1 %v3900_v3  ;;  %3726 = vmatprep.subr.bf16.mxu0 %v3951_v29  ;;  %v4022_v3 = vld [vmem:[%s5038_s1 + $0x228] sm:$0xff]  }
  0x4d   : > { %3594 = vmatprep.subr.bf16.mxu1 %v3916_v9  ;;  %v4048_v9 = vld [vmem:[%s5038_s1 + $0x238] sm:$0xff]  }
  0x4f   : > { %1850 = vmatmul.mubr.bf16.gmra.mrb[20].mxu0 %v3889_v4  ;;  %1979 = vmatmul.mubr.bf16.gmra.mrb[20].mxu1 %v3890_v5  ;;  %v3971_v4 = vld [vmem:[%s4190_s11 + $0x320] ss:$36 sps:$4 sm:$0xff]   ;;  %v3972_v5 = vld [vmem:[%s4190_s11 + $0xe8] ss:$36 sps:$4 sm:$0xff]  }
  0x50   : > { %1857 = vmatprep.mubr.bf16.mxu0 %v3893_v6  ;;  %1986 = vmatprep.mubr.bf16.mxu1 %v3895_v7  ;;  %v4035_v6 = vld [vmem:[%s5038_s1 + $0x230] sm:$0xff]  }
  0x51   : > { %3595 = vmatpush3.bf16.msra.mxu1 %v3918_v11  ;;  %v3973_v7 = vld [vmem:[%s4190_s11 + $0x36c] ss:$36 sps:$4 sm:$0xff]  }
  0x52   : > { %3596 = vmatprep.subr.bf16.mxu1 %v3933_v18  ;;  %v3978_v11 = vld [vmem:[%s4190_s11 + $0x130] ss:$36 sps:$4 sm:$0xff]   ;;  %v3992_v18 = vld [vmem:[%s4190_s11 + $0x3f8] ss:$36 sps:$4 sm:$0xff]  }
  0x55   : > { %3597 = vmatpush3.bf16.msra.mxu1 %v3934_v19  ;;  %v3993_v19 = vld [vmem:[%s4190_s11 + $0x1c0] ss:$36 sps:$4 sm:$0xff]  }
  0x56   : > { %3598 = vmatprep.subr.bf16.mxu1 %v3949_v26  ;;  %v4005_v26 = vld [vmem:[%s4190_s11 + $0x18] ss:$36 sps:$4 sm:$0xff]  }
  0x57   : > { %1858 = vmatmul.mubr.bf16.gmra.mrb[24].mxu0 %v3897_v12  ;;  %1987 = vmatmul.mubr.bf16.gmra.mrb[24].mxu1 %v3898_v13  ;;  %v3982_v12 = vld [vmem:[%s4190_s11 + $0x3b4] ss:$36 sps:$4 sm:$0xff]   ;;  %v3984_v13 = vld [vmem:[%s4190_s11 + $0x17c] ss:$36 sps:$4 sm:$0xff]  }
  0x58   : > { %1865 = vmatprep.mubr.bf16.mxu0 %v3903_v14  ;;  %1994 = vmatprep.mubr.bf16.mxu1 %v3905_v17  ;;  %v3986_v14 = vld [vmem:[%s4190_s11 + $0x3b0] ss:$36 sps:$4 sm:$0xff]   ;;  %v3990_v17 = vld [vmem:[%s4190_s11 + $0x1c4] ss:$36 sps:$4 sm:$0xff]  }
  0x59   : > { %3599 = vmatpush3.bf16.msra.mxu1 %v3950_v28  ;;  %v4010_v28 = vld [vmem:[%s4190_s11 + $0x29c] ss:$36 sps:$4 sm:$0xff]  }
  0x5a   : > { %3600 = vmatprep.subr.bf16.mxu1 %v3964_v33  ;;  %v4018_v33 = vld [vmem:[%s4190_s11 + $0xac] ss:$36 sps:$4 sm:$0xff]  }
  0x5d   : > { %3601 = vmatpush3.bf16.msra.mxu1 %v3965_v35  ;;  %v4021_v35 = vld [vmem:[%s4190_s11 + $0xa8] ss:$36 sps:$4 sm:$0xff]  }
  0x5e   : > { %3602 = vmatprep.subr.bf16.mxu1 %v3979_v41  ;;  %v4031_v41 = vld [vmem:[%s4190_s11 + $0x13c] ss:$36 sps:$4 sm:$0xff]  }
  0x5f   : > { %1866 = vmatmul.mubr.bf16.gmra.mrb[28].mxu0 %v3907_v20  ;;  %1995 = vmatmul.mubr.bf16.gmra.mrb[28].mxu1 %v3908_v21  ;;  %v3997_v20 = vld [vmem:[%s4190_s11 + $0x444] ss:$36 sps:$4 sm:$0xff]   ;;  %v3999_v21 = vld [vmem:[%s4190_s11 + $0x20c] ss:$36 sps:$4 sm:$0xff]  }
  0x60   : > { %1873 = vmatprep.mubr.bf16.mxu0 %v3909_v22  ;;  %2002 = vmatprep.mubr.bf16.mxu1 %v3911_v23  ;;  %v4001_v22 = vld [vmem:[%s4190_s11 + $0x440] ss:$36 sps:$4 sm:$0xff]   ;;  %v4002_v23 = vld [vmem:[%s4190_s11 + $0x208] ss:$36 sps:$4 sm:$0xff]  }
  0x61   : > { %3603 = vmatpush3.bf16.msra.mxu1 %v3980_v42  ;;  %v4033_v42 = vld [vmem:[%s4190_s11 + $0x370] ss:$36 sps:$4 sm:$0xff]  }
  0x62   : > { %3604 = vmatprep.subr.bf16.mxu1 %v3994_v47  ;;  %v4041_v47 = vld [vmem:[%s4190_s11 + $0x180] ss:$36 sps:$4 sm:$0xff]  }
  0x65   : > { %3605 = vmatpush3.bf16.msra.mxu1 %v3995_v48  ;;  %v4042_v48 = vld [vmem:[%s4190_s11 + $0x404] ss:$36 sps:$4 sm:$0xff]  }
  0x67   : > { %1874 = vmatmul.mubr.bf16.gmra.mrb[32].mxu0 %v3913_v27  ;;  %2003 = vmatmul.mubr.bf16.gmra.mrb[32].mxu1 %v3914_v30  ;;  %v4008_v27 = vld [vmem:[%s4190_s11 + $0x250] ss:$36 sps:$4 sm:$0xff]   ;;  %v4014_v30 = vld [vmem:[%s4190_s11 + $0x298] ss:$36 sps:$4 sm:$0xff]  }
  0x68   : > { %1881 = vmatprep.mubr.bf16.mxu0 %v3919_v31  ;;  %2010 = vmatprep.mubr.bf16.mxu1 %v3921_v32  ;;  %v4015_v31 = vld [vmem:[%s4190_s11 + $0x60] ss:$36 sps:$4 sm:$0xff]  }
  0x69   : > { %v4016_v32 = vld [vmem:[%s4190_s11 + $0x2e4] ss:$36 sps:$4 sm:$0xff]  }
  0x6f   : > { %1882 = vmatmul.mubr.bf16.gmra.mrb[36].mxu0 %v3923_v34  ;;  %2011 = vmatmul.mubr.bf16.gmra.mrb[36].mxu1 %v3924_v36  ;;  %v4020_v34 = vld [vmem:[%s4190_s11 + $0x2e0] ss:$36 sps:$4 sm:$0xff]   ;;  %v4023_v36 = vld [vmem:[%s4190_s11 + $0x32c] ss:$36 sps:$4 sm:$0xff]  }
  0x70   : > { %1889 = vmatprep.mubr.bf16.mxu0 %v3927_v37  ;;  %2018 = vmatprep.mubr.bf16.mxu1 %v3929_v38  ;;  %v4025_v37 = vld [vmem:[%s4190_s11 + $0xf4] ss:$36 sps:$4 sm:$0xff]   ;;  %v4027_v38 = vld [vmem:[%s4190_s11 + $0x328] ss:$36 sps:$4 sm:$0xff]  }
  0x77   : > { %1890 = vmatmul.mubr.bf16.gmra.mrb[40].mxu0 %v3931_v39  ;;  %2019 = vmatmul.mubr.bf16.gmra.mrb[40].mxu1 %v3932_v40  ;;  %v4028_v39 = vld [vmem:[%s4190_s11 + $0xf0] ss:$36 sps:$4 sm:$0xff]  }
  0x78   : > { %1897 = vmatprep.mubr.bf16.mxu0 %v3935_v43  ;;  %2026 = vmatprep.mubr.bf16.mxu1 %v3937_v44  ;;  %v4029_v40 = vld [vmem:[%s4190_s11 + $0x374] ss:$36 sps:$4 sm:$0xff]   ;;  %v4036_v44 = vld [vmem:[%s4190_s11 + $0x3bc] ss:$36 sps:$4 sm:$0xff]  }
  0x79   : > { %v4034_v43 = vld [vmem:[%s4190_s11 + $0x138] ss:$36 sps:$4 sm:$0xff]  }
  0x7f   : > { %1898 = vmatmul.mubr.bf16.gmra.mrb[44].mxu0 %v3939_v45  ;;  %2027 = vmatmul.mubr.bf16.gmra.mrb[44].mxu1 %v3940_v46  ;;  %v4038_v45 = vld [vmem:[%s4190_s11 + $0x184] ss:$36 sps:$4 sm:$0xff]   ;;  %v4040_v46 = vld [vmem:[%s4190_s11 + $0x3b8] ss:$36 sps:$4 sm:$0xff]  }
  0x80   : > { %2034 = vmatprep.mubr.bf16.mxu1 %v3943_v49  ;;  %2131 = vmatprep.mubr.bf16.mxu0 %v3947_v50  ;;  %v4044_v49 = vld [vmem:[%s4190_s11 + $0x1cc] ss:$36 sps:$4 sm:$0xff]   ;;  %v4046_v50 = vld [vmem:[%s4190_s11 + $0x400] ss:$36 sps:$4 sm:$0xff]  }
  0x87   : > { %2035 = vmatmul.mubr.bf16.gmra.mrb[48].mxu1 %v3948_v52  ;;  %2132 = vmatmul.mubr.bf16.vlgmr.msra.gmra.mrb[48].mxu0 %v3945_v51  ;;  %v4047_v51 = vld [vmem:[%s4190_s11 + $0x1c8] ss:$36 sps:$4 sm:$0xff]  }
  0x88   : > { %3727 = vmatpush3.bf16.msra.mxu0 %v3951_v29  ;;  %2042 = vmatprep.mubr.bf16.mxu1 %v3952_v53  ;;  %v4012_v29 = vld [vmem:[%s4190_s11 + $0x64] ss:$36 sps:$4 sm:$0xff]   ;;  %v4049_v52 = vld [vmem:[%s4190_s11 + $0x44c] ss:$36 sps:$4 sm:$0xff]   ;;  %v4051_v53 = vld [vmem:[%s4190_s11 + $0x214] ss:$36 sps:$4 sm:$0xff]  }
  0x89   : > { %2139 = vmatprep.mubr.bf16.mxu0 %v3954_v54  ;;  %3728 = vmatprep.subr.bf16.mxu0 %v3966_v55 }
  0x8c   : > { %3729 = vmatpush3.bf16.msra.mxu0 %v3966_v55 }
  0x8d   : > { %3730 = vmatprep.subr.bf16.mxu0 %v3981_v56 }
  0x8f   : > { %2043 = vmatmul.mubr.bf16.gmra.mrb[52].mxu1 %v3956_v57  ;;  %2140 = vmatmul.mubr.bf16.gmra.mrb[52].mxu0 %v3957_v58  ;;  %v4053_v58 = vld [vmem:[%s4190_s11 + $0x448] ss:$36 sps:$4 sm:$0xff]  }
  0x90   : > { %2050 = vmatprep.mubr.bf16.mxu1 %v3958_v59  ;;  %2147 = vmatprep.mubr.bf16.mxu0 %v3960_v60  ;;  %v4054_v59 = vld [vmem:[%s4190_s11 + $0x210] ss:$36 sps:$4 sm:$0xff]  }
  0x91   : > { %3731 = vmatpush3.bf16.msra.mxu0 %v3981_v56 }
  0x92   : > { %3732 = vmatprep.subr.bf16.mxu0 %v3996_v61 }
  0x95   : > { %3733 = vmatpush3.bf16.msra.mxu0 %v3996_v61 }
  0x96   : > { %3734 = vmatprep.subr.bf16.mxu0 %v4009_v62 }
  0x97   : > { %2051 = vmatmul.mubr.bf16.gmra.mrb[56].mxu1 %v3962_v63  ;;  %2148 = vmatmul.mubr.bf16.gmra.mrb[56].mxu0 %v3963_v0  ;;  %v4055_v0 = vld [vmem:[%s4190_s11 + $0x25c] ss:$36 sps:$4 sm:$0xff]  }
  0x98   : > { %2058 = vmatprep.mubr.bf16.mxu1 %v3967_v1  ;;  %2155 = vmatprep.mubr.bf16.mxu0 %v3969_v2  ;;  %v4057_v1 = vld [vmem:[%s4190_s11 + $0x20] ss:$36 sps:$4 sm:$0xff]  }
  0x99   : > { %3735 = vmatpush3.bf16.msra.mxu0 %v4009_v62 }
  0x9a   : > { %3736 = vmatprep.subr.bf16.mxu0 %v4022_v3 }
  0x9d   : > { %3737 = vmatpush3.bf16.msra.mxu0 %v4022_v3 }
  0x9e   : > { %3738 = vmatprep.subr.bf16.mxu0 %v4035_v6 }
  0x9f   : > { %2059 = vmatmul.mubr.bf16.gmra.mrb[60].mxu1 %v3971_v4  ;;  %2156 = vmatmul.mubr.bf16.gmra.mrb[60].mxu0 %v3972_v5 }
  0xa0   : > { %2066 = vmatprep.mubr.bf16.mxu1 %v3973_v7  ;;  %2163 = vmatprep.mubr.bf16.mxu0 %v3975_v8 }
  0xa1   : > { %3739 = vmatpush3.bf16.msra.mxu0 %v4035_v6 }
  0xa2   : > { %3740 = vmatprep.subr.bf16.mxu0 %v4048_v9 }
  0xa5   : > { %3741 = vmatpush3.bf16.msra.mxu0 %v4048_v9 }
  0xa7   : > { %2067 = vmatmul.mubr.bf16.gmra.mrb[64].mxu1 %v3977_v10  ;;  %2164 = vmatmul.mubr.bf16.gmra.mrb[64].mxu0 %v3978_v11  ;;  %v4058_v10 = vld [vmem:[%s4190_s11 + $0x258] ss:$36 sps:$4 sm:$0xff]   ;;  %v4059_v11 = vld [vmem:[%s4190_s11 + $0x68] ss:$36 sps:$4 sm:$0xff]  }
  0xa8   : > { %2074 = vmatprep.mubr.bf16.mxu1 %v3982_v12  ;;  %2171 = vmatprep.mubr.bf16.mxu0 %v3984_v13 }
  0xaf   : > { %2075 = vmatmul.mubr.bf16.gmra.mrb[68].mxu1 %v3986_v14  ;;  %2172 = vmatmul.mubr.bf16.gmra.mrb[68].mxu0 %v3987_v15 }
  0xb0   : > { %2082 = vmatprep.mubr.bf16.mxu1 %v3988_v16  ;;  %2179 = vmatprep.mubr.bf16.mxu0 %v3990_v17  ;;  %v4060_v16 = vld [vmem:[%s4190_s11 + $0x2a4] ss:$36 sps:$4 sm:$0xff]   ;;  %v4062_v17 = vld [vmem:[%s4190_s11 + $0xb0] ss:$36 sps:$4 sm:$0xff]  }
  0xb7   : > { %2083 = vmatmul.mubr.bf16.gmra.mrb[72].mxu1 %v3992_v18  ;;  %2180 = vmatmul.mubr.bf16.gmra.mrb[72].mxu0 %v3993_v19 }
  0xb8   : > { %2090 = vmatprep.mubr.bf16.mxu1 %v3997_v20  ;;  %2187 = vmatprep.mubr.bf16.mxu0 %v3999_v21 }
  0xbf   : > { %2091 = vmatmul.mubr.bf16.gmra.mrb[76].mxu1 %v4001_v22  ;;  %2188 = vmatmul.mubr.bf16.gmra.mrb[76].mxu0 %v4002_v23 }
  0xc0   : > { %2195 = vmatprep.mubr.bf16.mxu0 %v4003_v24  ;;  %2292 = vmatprep.mubr.bf16.mxu1 %v4007_v25 }
  0xc7   : > { %2196 = vmatmul.mubr.bf16.gmra.mrb[80].mxu0 %v4008_v27  ;;  %2293 = vmatmul.mubr.bf16.vlgmr.msra.gmra.mrb[80].mxu1 %v4005_v26  ;;  %v4063_v26 = vld [vmem:[%s4190_s11 + $0x2a0] ss:$36 sps:$4 sm:$0xff]   ;;  %v4064_v27 = vld [vmem:[%s4190_s11 + $0xf8] ss:$36 sps:$4 sm:$0xff]  }
  0xc8   : > { %2203 = vmatprep.mubr.bf16.mxu0 %v4010_v28  ;;  %2300 = vmatprep.mubr.bf16.mxu1 %v4012_v29 }
  0xcf   : > { %2204 = vmatmul.mubr.bf16.gmra.mrb[84].mxu0 %v4014_v30  ;;  %2301 = vmatmul.mubr.bf16.gmra.mrb[84].mxu1 %v4015_v31 }
  0xd0   : > { %2211 = vmatprep.mubr.bf16.mxu0 %v4016_v32  ;;  %2308 = vmatprep.mubr.bf16.mxu1 %v4018_v33  ;;  %v4065_v32 = vld [vmem:[%s4190_s11 + $0x2ec] ss:$36 sps:$4 sm:$0xff]   ;;  %v4067_v33 = vld [vmem:[%s4190_s11 + $0x140] ss:$36 sps:$4 sm:$0xff]  }
  0xd7   : > { %2212 = vmatmul.mubr.bf16.gmra.mrb[88].mxu0 %v4020_v34  ;;  %2309 = vmatmul.mubr.bf16.gmra.mrb[88].mxu1 %v4021_v35 }
  0xd8   : > { %2219 = vmatprep.mubr.bf16.mxu0 %v4023_v36  ;;  %2316 = vmatprep.mubr.bf16.mxu1 %v4025_v37 }
  0xdf   : > { %2220 = vmatmul.mubr.bf16.gmra.mrb[92].mxu0 %v4027_v38  ;;  %2317 = vmatmul.mubr.bf16.gmra.mrb[92].mxu1 %v4028_v39 }
  0xe0   : > { %2227 = vmatprep.mubr.bf16.mxu0 %v4029_v40  ;;  %2324 = vmatprep.mubr.bf16.mxu1 %v4031_v41 }
  0xe7   : > { %2228 = vmatmul.mubr.bf16.gmra.mrb[96].mxu0 %v4033_v42  ;;  %2325 = vmatmul.mubr.bf16.gmra.mrb[96].mxu1 %v4034_v43  ;;  %v4068_v42 = vld [vmem:[%s4190_s11 + $0x2e8] ss:$36 sps:$4 sm:$0xff]  }
  0xe8   : > { %2235 = vmatprep.mubr.bf16.mxu0 %v4036_v44  ;;  %2332 = vmatprep.mubr.bf16.mxu1 %v4038_v45  ;;  %v4069_v43 = vld [vmem:[%s4190_s11 + $0x188] ss:$36 sps:$4 sm:$0xff]  }
  0xef   : > { %2236 = vmatmul.mubr.bf16.gmra.mrb[100].mxu0 %v4040_v46  ;;  %2333 = vmatmul.mubr.bf16.gmra.mrb[100].mxu1 %v4041_v47 }
  0xf0   : > { %2243 = vmatprep.mubr.bf16.mxu0 %v4042_v48  ;;  %2340 = vmatprep.mubr.bf16.mxu1 %v4044_v49  ;;  %v4070_v48 = vld [vmem:[%s4190_s11 + $0x334] ss:$36 sps:$4 sm:$0xff]  }
  0xf1   : > { %v4072_v49 = vld [vmem:[%s4190_s11 + $0x1d0] ss:$36 sps:$4 sm:$0xff]  }
  0xf7   : > { %2244 = vmatmul.mubr.bf16.gmra.mrb[104].mxu0 %v4046_v50  ;;  %2341 = vmatmul.mubr.bf16.gmra.mrb[104].mxu1 %v4047_v51 }
  0xf8   : > { %2251 = vmatprep.mubr.bf16.mxu0 %v4049_v52  ;;  %2348 = vmatprep.mubr.bf16.mxu1 %v4051_v53 }
  0xfa   : > { %v3342_v54 = vpop.f32.mrb[0].mxu1  ;;  %v3270_v55 = vpop.f32.mrb[0].mxu0 }
  0xfb   : > { %v3343_v56 = vpop.f32.mrb[1].mxu1  ;;  %v3271_v57 = vpop.f32.mrb[1].mxu0 }
  0xfc   : > { %v4493_v60 = vadd.f32 %v3343_v56, %v3342_v54  ;;  %v3345_v61 = vpop.f32.mrb[2].mxu1  ;;  %v4495_v62 = vadd.f32 %v3271_v57, %v3270_v55  ;;  %v3273_v63 = vpop.f32.mrb[2].mxu0 }
  0xfd   : > { %v3346_v2 = vpop.f32.mrb[3].mxu1  ;;  %v3274_v3 = vpop.f32.mrb[3].mxu0 }
  0xfe   : > { %v4499_v4 = vadd.f32 %v3346_v2, %v3345_v61  ;;  %v4501_v5 = vadd.f32 %v3274_v3, %v3273_v63  ;;  %v4075_v2 = vld [vmem:[%s4190_s11 + $0x37c] ss:$36 sps:$4 sm:$0xff]  }
  0xff   : > { %2252 = vmatmul.mubr.bf16.gmra.mrb[108].mxu0 %v4053_v58  ;;  %2349 = vmatmul.mubr.bf16.gmra.mrb[108].mxu1 %v4054_v59  ;;  %v4073_v58 = vld [vmem:[%s4190_s11 + $0x330] ss:$36 sps:$4 sm:$0xff]   ;;  %v4074_v59 = vld [vmem:[%s4190_s11 + $0x218] ss:$36 sps:$4 sm:$0xff]   ;;  %v4077_v3 = vld [vmem:[%s4190_s11 + $0x260] ss:$36 sps:$4 sm:$0xff]  }
 0x100   : > { %2356 = vmatprep.mubr.bf16.mxu1 %v4055_v0  ;;  %3742 = vmatprep.mubr.bf16.mxu0 %v4057_v1 }
 0x102   : > { %v3348_v6 = vpop.f32.mrb[4].mxu1  ;;  %v3276_v7 = vpop.f32.mrb[4].mxu0 }
 0x103   : > { %v3349_v8 = vpop.f32.mrb[5].mxu1  ;;  %v3277_v9 = vpop.f32.mrb[5].mxu0 }
 0x104   : > { %v4505_v12 = vadd.f32 %v3349_v8, %v3348_v6  ;;  %v3351_v13 = vpop.f32.mrb[6].mxu1  ;;  %v4507_v14 = vadd.f32 %v3277_v9, %v3276_v7  ;;  %v3279_v15 = vpop.f32.mrb[6].mxu0 }
 0x105   : > { %v3352_v18 = vpop.f32.mrb[7].mxu1  ;;  %v3280_v19 = vpop.f32.mrb[7].mxu0 }
 0x106   : > { %v4511_v20 = vadd.f32 %v3352_v18, %v3351_v13  ;;  %v4513_v21 = vadd.f32 %v3280_v19, %v3279_v15  ;;  %v4078_v18 = vld [vmem:[%s4190_s11 + $0x378] ss:$36 sps:$4 sm:$0xff]   ;;  %v4079_v19 = vld [vmem:[%s4190_s11 + $0x2a8] ss:$36 sps:$4 sm:$0xff]  }
 0x107   : > { %2357 = vmatmul.mubr.bf16.gmra.mrb[112].mxu1 %v4058_v10  ;;  %3743 = vmatmul.mubr.bf16.vlgmr.msra.gmra.mrb[112].mxu0 %v4059_v11 }
 0x108   : > { %2364 = vmatprep.mubr.bf16.mxu1 %v4060_v16  ;;  %3746 = vmatprep.mubr.bf16.mxu0 %v4062_v17 }
 0x10a   : > { %v3354_v22 = vpop.f32.mrb[8].mxu1  ;;  %v3282_v23 = vpop.f32.mrb[8].mxu0 }
 0x10b   : > { %v3355_v24 = vpop.f32.mrb[9].mxu1  ;;  %v3283_v25 = vpop.f32.mrb[9].mxu0 }
 0x10c   : > { %v4517_v28 = vadd.f32 %v3355_v24, %v3354_v22  ;;  %v3357_v29 = vpop.f32.mrb[10].mxu1  ;;  %v4519_v30 = vadd.f32 %v3283_v25, %v3282_v23  ;;  %v3285_v31 = vpop.f32.mrb[10].mxu0  ;;  %v4080_v25 = vld [vmem:[%s4190_s11 + $0x3c4] ss:$36 sps:$4 sm:$0xff]  }
 0x10d   : > { %v3358_v34 = vpop.f32.mrb[11].mxu1  ;;  %v3286_v35 = vpop.f32.mrb[11].mxu0 }
 0x10e   : > { %v4523_v36 = vadd.f32 %v3358_v34, %v3357_v29  ;;  %v4525_v37 = vadd.f32 %v3286_v35, %v3285_v31 }
 0x10f   : > { %2365 = vmatmul.mubr.bf16.gmra.mrb[116].mxu1 %v4063_v26  ;;  %3747 = vmatmul.mubr.bf16.gmra.mrb[116].mxu0 %v4064_v27  ;;  %v4082_v26 = vld [vmem:[%s4190_s11 + $0x2f0] ss:$36 sps:$4 sm:$0xff]  }
 0x110   : > { %2372 = vmatprep.mubr.bf16.mxu1 %v4065_v32  ;;  %3750 = vmatprep.mubr.bf16.mxu0 %v4067_v33 }
 0x112   : > { %v3360_v38 = vpop.f32.mrb[12].mxu1  ;;  %v3288_v39 = vpop.f32.mrb[12].mxu0 }
 0x113   : > { %v3361_v40 = vpop.f32.mrb[13].mxu1  ;;  %v3289_v41 = vpop.f32.mrb[13].mxu0 }
 0x114   : > { %v4529_v44 = vadd.f32 %v3361_v40, %v3360_v38  ;;  %v3363_v45 = vpop.f32.mrb[14].mxu1  ;;  %v4531_v46 = vadd.f32 %v3289_v41, %v3288_v39  ;;  %v3291_v47 = vpop.f32.mrb[14].mxu0  ;;  %v4083_v40 = vld [vmem:[%s4190_s11 + $0x3c0] ss:$36 sps:$4 sm:$0xff]   ;;  %v4084_v41 = vld [vmem:[%s4190_s11 + $0x338] ss:$36 sps:$4 sm:$0xff]  }
 0x115   : > { %v3364_v50 = vpop.f32.mrb[15].mxu1  ;;  %v3292_v51 = vpop.f32.mrb[15].mxu0 }
 0x116   : > { %v4535_v52 = vadd.f32 %v3364_v50, %v3363_v45  ;;  %v4537_v53 = vadd.f32 %v3292_v51, %v3291_v47  ;;  %v4085_v47 = vld [vmem:[%s4190_s11 + $0x40c] ss:$36 sps:$4 sm:$0xff]  }
 0x117   : > { %2373 = vmatmul.mubr.bf16.gmra.mrb[120].mxu1 %v4068_v42  ;;  %3751 = vmatmul.mubr.bf16.gmra.mrb[120].mxu0 %v4069_v43 }
 0x118   : > { %2380 = vmatprep.mubr.bf16.mxu1 %v4070_v48  ;;  %3754 = vmatprep.mubr.bf16.mxu0 %v4072_v49  ;;  %v4087_v48 = vld [vmem:[%s4190_s11 + $0x380] ss:$36 sps:$4 sm:$0xff]  }
 0x11a   : > { %v3382_v54 = vpop.f32.mrb[16].mxu1  ;;  %v3294_v55 = vpop.f32.mrb[16].mxu0 }
 0x11b   : > { %v3383_v56 = vpop.f32.mrb[17].mxu1  ;;  %v3295_v57 = vpop.f32.mrb[17].mxu0 }
 0x11c   : > { %v3384_v61 = vadd.f32 %v3383_v56, %v3382_v54  ;;  %v3385_v63 = vpop.f32.mrb[18].mxu1  ;;  %v4541_v0 = vadd.f32 %v3295_v57, %v3294_v55  ;;  %v3297_v1 = vpop.f32.mrb[18].mxu0 }
 0x11d   : > { %v3386_v6 = vpop.f32.mrb[19].mxu1  ;;  %v3298_v7 = vpop.f32.mrb[19].mxu0 }
 0x11e   : > { %v4546_v8 = vadd.f32 %v3384_v61, %v4495_v62  ;;  %v3387_v9 = vadd.f32 %v3386_v6, %v3385_v63  ;;  %v4548_v10 = vadd.f32 %v3298_v7, %v3297_v1  ;;  %v4088_v61 = vld [vmem:[%s4190_s11 + $0x408] ss:$36 sps:$4 sm:$0xff]   ;;  %v4090_v6 = vld [vmem:[%s4190_s11 + $0x454] ss:$36 sps:$4 sm:$0xff]  }
 0x11f   : > { %2381 = vmatmul.mubr.bf16.gmra.mrb[124].mxu1 %v4073_v58  ;;  %3755 = vmatmul.mubr.bf16.gmra.mrb[124].mxu0 %v4074_v59  ;;  %v4089_v63 = vld [vmem:[%s4190_s11 + $0x3c8] ss:$36 sps:$4 sm:$0xff]   ;;  %v4092_v7 = vld [vmem:[%s4190_s11 + $0x410] ss:$36 sps:$4 sm:$0xff]  }
 0x120   : > { %v4551_v11 = vadd.f32 %v3387_v9, %v4501_v5  ;;  %2388 = vmatprep.mubr.bf16.mxu1 %v4075_v2  ;;  %3758 = vmatprep.mubr.bf16.mxu0 %v4077_v3 }
 0x122   : > { %v3388_v13 = vpop.f32.mrb[20].mxu1  ;;  %v3300_v15 = vpop.f32.mrb[20].mxu0 }
 0x123   : > { %v3389_v16 = vpop.f32.mrb[21].mxu1  ;;  %v3301_v17 = vpop.f32.mrb[21].mxu0 }
 0x124   : > { %v3390_v62 = vadd.f32 %v3389_v16, %v3388_v13  ;;  %v3391_v22 = vpop.f32.mrb[22].mxu1  ;;  %v4555_v23 = vadd.f32 %v3301_v17, %v3300_v15  ;;  %v3303_v24 = vpop.f32.mrb[22].mxu0 }
 0x125   : > { %v3392_v27 = vpop.f32.mrb[23].mxu1  ;;  %v3304_v5 = vpop.f32.mrb[23].mxu0 }
 0x126   : > { %v4560_v29 = vadd.f32 %v3390_v62, %v4507_v14  ;;  %v3393_v31 = vadd.f32 %v3392_v27, %v3391_v22  ;;  %v4562_v32 = vadd.f32 %v3304_v5, %v3303_v24  ;;  %v4093_v24 = vld [vmem:[%s4190_s11 + $0x450] ss:$36 sps:$4 sm:$0xff]  }
 0x127   : > { %2389 = vmatmul.mubr.bf16.gmra.mrb[128].mxu1 %v4078_v18  ;;  %3759 = vmatmul.mubr.bf16.gmra.mrb[128].mxu0 %v4079_v19 }
 0x128   : > { %v4565_v33 = vadd.f32 %v3393_v31, %v4513_v21  ;;  %2396 = vmatprep.mubr.bf16.mxu1 %v4080_v25  ;;  %3762 = vmatprep.mubr.bf16.mxu0 %v4082_v26  ;;  %v4094_v25 = vld [vmem:[%s4190_s11 + $0x458] ss:$36 sps:$4 sm:$0xff]  }
 0x12a   : > { %v3394_v34 = vpop.f32.mrb[24].mxu1  ;;  %v3306_v35 = vpop.f32.mrb[24].mxu0 }
 0x12b   : > { %v3395_v38 = vpop.f32.mrb[25].mxu1  ;;  %v3307_v39 = vpop.f32.mrb[25].mxu0 }
 0x12c   : > { %v3396_v14 = vadd.f32 %v3395_v38, %v3394_v34  ;;  %v3397_v42 = vpop.f32.mrb[26].mxu1  ;;  %v4569_v43 = vadd.f32 %v3307_v39, %v3306_v35  ;;  %v3309_v45 = vpop.f32.mrb[26].mxu0 }
 0x12d   : > { %v3398_v49 = vpop.f32.mrb[27].mxu1  ;;  %v3310_v21 = vpop.f32.mrb[27].mxu0 }
 0x12e   : > { %v4574_v50 = vadd.f32 %v3396_v14, %v4519_v30  ;;  %v3399_v51 = vadd.f32 %v3398_v49, %v3397_v42  ;;  %v4576_v54 = vadd.f32 %v3310_v21, %v3309_v45 }
 0x12f   : > { %2397 = vmatmul.mubr.bf16.gmra.mrb[132].mxu1 %v4083_v40  ;;  %3763 = vmatmul.mubr.bf16.gmra.mrb[132].mxu0 %v4084_v41 }
 0x130   : > { %v4579_v55 = vadd.f32 %v3399_v51, %v4525_v37  ;;  %2404 = vmatprep.mubr.bf16.mxu1 %v4085_v47  ;;  %3766 = vmatprep.mubr.bf16.mxu0 %v4087_v48 }
 0x132   : > { %v3400_v56 = vpop.f32.mrb[28].mxu1  ;;  %v3312_v57 = vpop.f32.mrb[28].mxu0 }
 0x133   : > { %v3401_v58 = vpop.f32.mrb[29].mxu1  ;;  %v3313_v59 = vpop.f32.mrb[29].mxu0 }
 0x134   : > { %v3402_v30 = vadd.f32 %v3401_v58, %v3400_v56  ;;  %v3403_v1 = vpop.f32.mrb[30].mxu1  ;;  %v4583_v2 = vadd.f32 %v3313_v59, %v3312_v57  ;;  %v3315_v3 = vpop.f32.mrb[30].mxu0 }
 0x135   : > { %v3404_v9 = vpop.f32.mrb[31].mxu1  ;;  %v3316_v37 = vpop.f32.mrb[31].mxu0 }
 0x136   : > { %v4588_v13 = vadd.f32 %v3402_v30, %v4531_v46  ;;  %v3405_v15 = vadd.f32 %v3404_v9, %v3403_v1  ;;  %v4590_v16 = vadd.f32 %v3316_v37, %v3315_v3 }
 0x137   : > { %2405 = vmatmul.mubr.bf16.gmra.mrb[136].mxu1 %v4088_v61  ;;  %3767 = vmatmul.mubr.bf16.gmra.mrb[136].mxu0 %v4089_v63 }
 0x138   : > { %v4593_v17 = vadd.f32 %v3405_v15, %v4537_v53  ;;  %2412 = vmatprep.mubr.bf16.mxu1 %v4090_v6  ;;  %3770 = vmatprep.mubr.bf16.mxu0 %v4092_v7 }
 0x13a   : > { %v3406_v18 = vpop.f32.mrb[32].mxu1  ;;  %v3318_v19 = vpop.f32.mrb[32].mxu0 }
 0x13b   : > { %v3407_v62 = vpop.f32.mrb[33].mxu1  ;;  %v3319_v22 = vpop.f32.mrb[33].mxu0 }
 0x13c   : > { %v3408_v26 = vadd.f32 %v3407_v62, %v3406_v18  ;;  %v3409_v27 = vpop.f32.mrb[34].mxu1  ;;  %v4597_v46 = vadd.f32 %v3319_v22, %v3318_v19  ;;  %v3321_v5 = vpop.f32.mrb[34].mxu0 }
 0x13d   : > { %v3410_v31 = vpop.f32.mrb[35].mxu1  ;;  %v3322_v34 = vpop.f32.mrb[35].mxu0 }
 0x13e   : > { %v4600_v35 = vadd.f32 %v3408_v26, %v4541_v0  ;;  %v3411_v53 = vadd.f32 %v3410_v31, %v3409_v27  ;;  %v4602_v38 = vadd.f32 %v3322_v34, %v3321_v5 }
 0x13f   : > { %2413 = vmatmul.mubr.bf16.gmra.mrb[140].mxu1 %v4093_v24  ;;  %3771 = vmatmul.mubr.bf16.gmra.mrb[140].mxu0 %v4094_v25 }
 0x140   : > { %v4605_v39 = vadd.f32 %v3411_v53, %v4548_v10 }
 0x142   : > { %v3412_v40 = vpop.f32.mrb[36].mxu1  ;;  %v3324_v41 = vpop.f32.mrb[36].mxu0 }
 0x143   : > { %v3413_v14 = vpop.f32.mrb[37].mxu1  ;;  %v3325_v42 = vpop.f32.mrb[37].mxu0 }
 0x144   : > { %v3414_v45 = vadd.f32 %v3413_v14, %v3412_v40  ;;  %v3415_v47 = vpop.f32.mrb[38].mxu1  ;;  %v4607_v48 = vadd.f32 %v3325_v42, %v3324_v41  ;;  %v3327_v49 = vpop.f32.mrb[38].mxu0 }
 0x145   : > { %v3416_v21 = vpop.f32.mrb[39].mxu1  ;;  %v3328_v0 = vpop.f32.mrb[39].mxu0 }
 0x146   : > { %v4610_v51 = vadd.f32 %v3414_v45, %v4555_v23  ;;  %v3417_v56 = vadd.f32 %v3416_v21, %v3415_v47  ;;  %v4612_v57 = vadd.f32 %v3328_v0, %v3327_v49 }
 0x148   : > { %v4615_v10 = vadd.f32 %v3417_v56, %v4562_v32 }
 0x14a   : > { %v3418_v58 = vpop.f32.mrb[40].mxu1  ;;  %v3330_v59 = vpop.f32.mrb[40].mxu0 }
 0x14b   : > { %v3419_v61 = vpop.f32.mrb[41].mxu1  ;;  %v3331_v63 = vpop.f32.mrb[41].mxu0 }
 0x14c   : > { %v3420_v30 = vadd.f32 %v3419_v61, %v3418_v58  ;;  %v3421_v1 = vpop.f32.mrb[42].mxu1  ;;  %v4617_v3 = vadd.f32 %v3331_v63, %v3330_v59  ;;  %v3333_v6 = vpop.f32.mrb[42].mxu0 }
 0x14d   : > { %v3422_v7 = vpop.f32.mrb[43].mxu1  ;;  %v3334_v9 = vpop.f32.mrb[43].mxu0 }
 0x14e   : > { %v4620_v23 = vadd.f32 %v3420_v30, %v4569_v43  ;;  %v3423_v37 = vadd.f32 %v3422_v7, %v3421_v1  ;;  %v4622_v15 = vadd.f32 %v3334_v9, %v3333_v6  ;;  %v2971_v43 = vld [vmem:[%s5039_s2] ss:$0 sm:$0xff] }
 0x14f   : > { %243 = vst.msk [vmem:[#allocation2 + $0x10] sm:$0xff] %vm240_vm0, %v2971_v43  ;;  %241 = vst.msk [vmem:[#allocation2] sm:$0xff] %vm240_vm0, %v2971_v43 }
 0x150   : > { %v4625_v32 = vadd.f32 %v3423_v37, %v4576_v54  ;;  %242 = vst.msk [vmem:[#allocation2 + $0x8] sm:$0xff] %vm240_vm0, %v2971_v43  ;;  %244 = vst.msk [vmem:[#allocation2 + $0x18] sm:$0xff] %vm240_vm0, %v2971_v43 }
 0x151   : > { %245 = vst.msk [vmem:[#allocation2 + $0x20] sm:$0xff] %vm240_vm0, %v2971_v43  ;;  %246 = vst.msk [vmem:[#allocation2 + $0x28] sm:$0xff] %vm240_vm0, %v2971_v43 }
 0x152   : > { %v3424_v18 = vpop.f32.mrb[44].mxu1  ;;  %v3336_v19 = vpop.f32.mrb[44].mxu0  ;;  %247 = vst.msk [vmem:[#allocation2 + $0x30] sm:$0xff] %vm240_vm0, %v2971_v43  ;;  %248 = vst.msk [vmem:[#allocation2 + $0x38] sm:$0xff] %vm240_vm0, %v2971_v43 }
 0x153   : > { %v3425_v62 = vpop.f32.mrb[45].mxu1  ;;  %v3337_v22 = vpop.f32.mrb[45].mxu0  ;;  %249 = vst.msk [vmem:[#allocation2 + $0x40] sm:$0xff] %vm240_vm0, %v2971_v43  ;;  %250 = vst.msk [vmem:[#allocation2 + $0x48] sm:$0xff] %vm240_vm0, %v2971_v43 }
 0x154   : > { %v3426_v24 = vadd.f32 %v3425_v62, %v3424_v18  ;;  %v3427_v25 = vpop.f32.mrb[46].mxu1  ;;  %v4627_v26 = vadd.f32 %v3337_v22, %v3336_v19  ;;  %v3339_v27 = vpop.f32.mrb[46].mxu0  ;;  %251 = vst.msk [vmem:[#allocation2 + $0x50] sm:$0xff] %vm240_vm0, %v2971_v43  ;;  %252 = vst.msk [vmem:[#allocation2 + $0x58] sm:$0xff] %vm240_vm0, %v2971_v43 }
 0x155   : > { %v3428_v5 = vpop.f32.mrb[47].mxu1  ;;  %v3340_v31 = vpop.f32.mrb[47].mxu0  ;;  %253 = vst.msk [vmem:[#allocation2 + $0x60] sm:$0xff] %vm240_vm0, %v2971_v43  ;;  %254 = vst.msk [vmem:[#allocation2 + $0x68] sm:$0xff] %vm240_vm0, %v2971_v43 }
 0x156   : > { %255 = vst.msk [vmem:[#allocation2 + $0x70] sm:$0xff] %vm240_vm0, %v2971_v43  ;;  %256 = vst.msk [vmem:[#allocation2 + $0x78] sm:$0xff] %vm240_vm0, %v2971_v43  ;;  %v4665_v54 = vadd.f32 %v3426_v24, %v4583_v2  ;;  %v3429_v34 = vadd.f32 %v3428_v5, %v3427_v25  ;;  %v4667_v53 = vadd.f32 %v3340_v31, %v3339_v27 }
 0x157   : > { %257 = vst.msk [vmem:[#allocation2 + $0x80] sm:$0xff] %vm240_vm0, %v2971_v43  ;;  %258 = vst.msk [vmem:[#allocation2 + $0x88] sm:$0xff] %vm240_vm0, %v2971_v43 }
 0x158   : > { %259 = vst.msk [vmem:[#allocation2 + $0x90] sm:$0xff] %vm240_vm0, %v2971_v43  ;;  %260 = vst.msk [vmem:[#allocation2 + $0x98] sm:$0xff] %vm240_vm0, %v2971_v43  ;;  %v4670_v40 = vadd.f32 %v3429_v34, %v4590_v16 }
 0x159   : > { %261 = vst.msk [vmem:[#allocation2 + $0xa0] sm:$0xff] %vm240_vm0, %v2971_v43  ;;  %262 = vst.msk [vmem:[#allocation2 + $0xa8] sm:$0xff] %vm240_vm0, %v2971_v43 }
 0x15a   : > { %263 = vst.msk [vmem:[#allocation2 + $0xb0] sm:$0xff] %vm240_vm0, %v2971_v43  ;;  %264 = vst.msk [vmem:[#allocation2 + $0xb8] sm:$0xff] %vm240_vm0, %v2971_v43  ;;  %v3430_v41 = vpop.f32.mrb[48].mxu1  ;;  %v3494_v14 = vpop.f32.mrb[48].mxu0 }
 0x15b   : > { %265 = vst.msk [vmem:[#allocation2 + $0xc0] sm:$0xff] %vm240_vm0, %v2971_v43  ;;  %266 = vst.msk [vmem:[#allocation2 + $0xc8] sm:$0xff] %vm240_vm0, %v2971_v43  ;;  %v3431_v42 = vpop.f32.mrb[49].mxu1  ;;  %v3495_v45 = vpop.f32.mrb[49].mxu0 }
 0x15c   : > { %267 = vst.msk [vmem:[#allocation2 + $0xd0] sm:$0xff] %vm240_vm0, %v2971_v43  ;;  %268 = vst.msk [vmem:[#allocation2 + $0xd8] sm:$0xff] %vm240_vm0, %v2971_v43  ;;  %v3432_v47 = vadd.f32 %v3431_v42, %v3430_v41  ;;  %v3496_v49 = vadd.f32 %v3495_v45, %v3494_v14  ;;  %v3433_v21 = vpop.f32.mrb[50].mxu1  ;;  %v3497_v0 = vpop.f32.mrb[50].mxu0 }
 0x15d   : > { %269 = vst.msk [vmem:[#allocation2 + $0xe0] sm:$0xff] %vm240_vm0, %v2971_v43  ;;  %270 = vst.msk [vmem:[#allocation2 + $0xe8] sm:$0xff] %vm240_vm0, %v2971_v43  ;;  %v3434_v56 = vpop.f32.mrb[51].mxu1  ;;  %v3498_v58 = vpop.f32.mrb[51].mxu0 }
 0x15e   : > { %271 = vst.msk [vmem:[#allocation2 + $0xf0] sm:$0xff] %vm240_vm0, %v2971_v43  ;;  %272 = vst.msk [vmem:[#allocation2 + $0xf8] sm:$0xff] %vm240_vm0, %v2971_v43  ;;  %v4673_v59 = vadd.f32 %v3432_v47, %v4597_v46  ;;  %v4676_v2 = vadd.f32 %v3496_v49, %v4546_v8  ;;  %v3435_v61 = vadd.f32 %v3434_v56, %v3433_v21 }
 0x15f   : > { %v3499_v63 = vadd.f32 %v3498_v58, %v3497_v0 }
 0x160   : > { %v4679_v16 = vadd.f32 %v3435_v61, %v4602_v38 }
 0x161   : > { %v4682_v30 = vadd.f32 %v3499_v63, %v4551_v11 }
 0x162   : > { %v3436_v1 = vpop.f32.mrb[52].mxu1  ;;  %v3500_v6 = vpop.f32.mrb[52].mxu0 }
 0x163   : > { %v3437_v7 = vpop.f32.mrb[53].mxu1  ;;  %v3501_v9 = vpop.f32.mrb[53].mxu0 }
 0x164   : > { %v3438_v37 = vadd.f32 %v3437_v7, %v3436_v1  ;;  %v3502_v18 = vadd.f32 %v3501_v9, %v3500_v6  ;;  %v3439_v19 = vpop.f32.mrb[54].mxu1  ;;  %v3503_v46 = vpop.f32.mrb[54].mxu0 }
 0x165   : > { %v3440_v62 = vpop.f32.mrb[55].mxu1  ;;  %v3504_v22 = vpop.f32.mrb[55].mxu0 }
 0x166   : > { %v4685_v8 = vadd.f32 %v3438_v37, %v4607_v48  ;;  %v4688_v24 = vadd.f32 %v3502_v18, %v4560_v29  ;;  %v3441_v38 = vadd.f32 %v3440_v62, %v3439_v19  ;;  %v3505_v25 = vadd.f32 %v3504_v22, %v3503_v46 }
 0x168   : > { %v4691_v11 = vadd.f32 %v3441_v38, %v4612_v57  ;;  %v4694_v27 = vadd.f32 %v3505_v25, %v4565_v33 }
 0x16a   : > { %v3442_v43 = vpop.f32.mrb[56].mxu1  ;;  %v3506_v5 = vpop.f32.mrb[56].mxu0 }
 0x16b   : > { %v3443_v31 = vpop.f32.mrb[57].mxu1  ;;  %v3507_v34 = vpop.f32.mrb[57].mxu0 }
 0x16c   : > { %v3444_v41 = vadd.f32 %v3443_v31, %v3442_v43  ;;  %v3508_v14 = vadd.f32 %v3507_v34, %v3506_v5  ;;  %v3445_v42 = vpop.f32.mrb[58].mxu1  ;;  %v3509_v48 = vpop.f32.mrb[58].mxu0 }
 0x16d   : > { %v3446_v45 = vpop.f32.mrb[59].mxu1  ;;  %v3510_v47 = vpop.f32.mrb[59].mxu0 }
 0x16e   : > { %v4697_v29 = vadd.f32 %v3444_v41, %v4617_v3  ;;  %v4700_v49 = vadd.f32 %v3508_v14, %v4574_v50  ;;  %v3447_v57 = vadd.f32 %v3446_v45, %v3445_v42  ;;  %v3511_v21 = vadd.f32 %v3510_v47, %v3509_v48 }
 0x170   : > { %v4703_v33 = vadd.f32 %v3447_v57, %v4622_v15  ;;  %v4706_v0 = vadd.f32 %v3511_v21, %v4579_v55 }
 0x172   : > { %v3448_v56 = vpop.f32.mrb[60].mxu1  ;;  %v3512_v58 = vpop.f32.mrb[60].mxu0 }
 0x173   : > { %v3449_v61 = vpop.f32.mrb[61].mxu1  ;;  %v3513_v63 = vpop.f32.mrb[61].mxu0 }
 0x174   : > { %v3450_v1 = vadd.f32 %v3449_v61, %v3448_v56  ;;  %v3514_v6 = vadd.f32 %v3513_v63, %v3512_v58  ;;  %v3451_v7 = vpop.f32.mrb[62].mxu1  ;;  %v3515_v3 = vpop.f32.mrb[62].mxu0 }
 0x175   : > { %v3452_v9 = vpop.f32.mrb[63].mxu1  ;;  %v3516_v37 = vpop.f32.mrb[63].mxu0 }
 0x176   : > { %v4709_v50 = vadd.f32 %v3450_v1, %v4627_v26  ;;  %v4712_v18 = vadd.f32 %v3514_v6, %v4588_v13  ;;  %v3453_v15 = vadd.f32 %v3452_v9, %v3451_v7  ;;  %v3517_v19 = vadd.f32 %v3516_v37, %v3515_v3 }
 0x178   : > { %v4715_v55 = vadd.f32 %v3453_v15, %v4667_v53  ;;  %v4718_v46 = vadd.f32 %v3517_v19, %v4593_v17 }
 0x17a   : > { %v3454_v62 = vpop.f32.mrb[64].mxu1  ;;  %v3518_v22 = vpop.f32.mrb[64].mxu0 }
 0x17b   : > { %v3455_v38 = vpop.f32.mrb[65].mxu1  ;;  %v3519_v25 = vpop.f32.mrb[65].mxu0 }
 0x17c   : > { %v3456_v43 = vadd.f32 %v3455_v38, %v3454_v62  ;;  %v3520_v5 = vadd.f32 %v3519_v25, %v3518_v22  ;;  %v3457_v31 = vpop.f32.mrb[66].mxu1  ;;  %v3521_v26 = vpop.f32.mrb[66].mxu0 }
 0x17d   : > { %v3458_v34 = vpop.f32.mrb[67].mxu1  ;;  %v3522_v41 = vpop.f32.mrb[67].mxu0 }
 0x17e   : > { %v4721_v13 = vadd.f32 %v3456_v43, %v4493_v60  ;;  %v4724_v14 = vadd.f32 %v3520_v5, %v4600_v35  ;;  %v3459_v53 = vadd.f32 %v3458_v34, %v3457_v31  ;;  %v3523_v42 = vadd.f32 %v3522_v41, %v3521_v26 }
 0x180   : > { %v4727_v17 = vadd.f32 %v3459_v53, %v4499_v4  ;;  %v4730_v48 = vadd.f32 %v3523_v42, %v4605_v39 }
 0x182   : > { %v3460_v45 = vpop.f32.mrb[68].mxu1  ;;  %v3524_v47 = vpop.f32.mrb[68].mxu0 }
 0x183   : > { %v3461_v57 = vpop.f32.mrb[69].mxu1  ;;  %v3525_v21 = vpop.f32.mrb[69].mxu0 }
 0x184   : > { %v3462_v56 = vadd.f32 %v3461_v57, %v3460_v45  ;;  %v3526_v58 = vadd.f32 %v3525_v21, %v3524_v47  ;;  %v3463_v61 = vpop.f32.mrb[70].mxu1  ;;  %v3527_v60 = vpop.f32.mrb[70].mxu0 }
 0x185   : > { %v3464_v63 = vpop.f32.mrb[71].mxu1  ;;  %v3528_v1 = vpop.f32.mrb[71].mxu0 }
 0x186   : > { %v4733_v35 = vadd.f32 %v3462_v56, %v4505_v12  ;;  %v4736_v6 = vadd.f32 %v3526_v58, %v4610_v51  ;;  %v3465_v4 = vadd.f32 %v3464_v63, %v3463_v61  ;;  %v3529_v7 = vadd.f32 %v3528_v1, %v3527_v60 }
 0x188   : > { %v4739_v39 = vadd.f32 %v3465_v4, %v4511_v20  ;;  %v4742_v3 = vadd.f32 %v3529_v7, %v4615_v10 }
 0x18a   : > { %v3466_v9 = vpop.f32.mrb[72].mxu1  ;;  %v3530_v37 = vpop.f32.mrb[72].mxu0 }
 0x18b   : > { %v3467_v15 = vpop.f32.mrb[73].mxu1  ;;  %v3531_v19 = vpop.f32.mrb[73].mxu0 }
 0x18c   : > { %v3468_v62 = vadd.f32 %v3467_v15, %v3466_v9  ;;  %v3532_v22 = vadd.f32 %v3531_v19, %v3530_v37  ;;  %v3469_v38 = vpop.f32.mrb[74].mxu1  ;;  %v3533_v12 = vpop.f32.mrb[74].mxu0 }
 0x18d   : > { %v3470_v25 = vpop.f32.mrb[75].mxu1  ;;  %v3534_v43 = vpop.f32.mrb[75].mxu0 }
 0x18e   : > { %v4745_v51 = vadd.f32 %v3468_v62, %v4517_v28  ;;  %v4748_v5 = vadd.f32 %v3532_v22, %v4620_v23  ;;  %v3471_v20 = vadd.f32 %v3470_v25, %v3469_v38  ;;  %v3535_v31 = vadd.f32 %v3534_v43, %v3533_v12 }
 0x190   : > { %v4751_v10 = vadd.f32 %v3471_v20, %v4523_v36  ;;  %v4754_v26 = vadd.f32 %v3535_v31, %v4625_v32 }
 0x192   : > { %v3472_v34 = vpop.f32.mrb[76].mxu1  ;;  %v3536_v41 = vpop.f32.mrb[76].mxu0 }
 0x193   : > { %v3473_v53 = vpop.f32.mrb[77].mxu1  ;;  %v3537_v42 = vpop.f32.mrb[77].mxu0 }
 0x194   : > { %v3474_v45 = vadd.f32 %v3473_v53, %v3472_v34  ;;  %v3538_v47 = vadd.f32 %v3537_v42, %v3536_v41  ;;  %v3475_v57 = vpop.f32.mrb[78].mxu1  ;;  %v3539_v28 = vpop.f32.mrb[78].mxu0 }
 0x195   : > { %v3476_v21 = vpop.f32.mrb[79].mxu1  ;;  %v3540_v56 = vpop.f32.mrb[79].mxu0 }
 0x196   : > { %v4757_v23 = vadd.f32 %v3474_v45, %v4529_v44  ;;  %v4760_v58 = vadd.f32 %v3538_v47, %v4665_v54  ;;  %v3477_v36 = vadd.f32 %v3476_v21, %v3475_v57  ;;  %v3541_v61 = vadd.f32 %v3540_v56, %v3539_v28 }
 0x198   : > { %v4763_v32 = vadd.f32 %v3477_v36, %v4535_v52  ;;  %v4766_v60 = vadd.f32 %v3541_v61, %v4670_v40 }
 0x19a   : > { %v3542_v63 = vpop.f32.mrb[80].mxu0  ;;  %v3606_v1 = vpop.f32.mrb[80].mxu1 }
 0x19b   : > { %v3543_v4 = vpop.f32.mrb[81].mxu0  ;;  %v3607_v7 = vpop.f32.mrb[81].mxu1 }
 0x19c   : > { %v3544_v9 = vadd.f32 %v3543_v4, %v3542_v63  ;;  %v3608_v37 = vadd.f32 %v3607_v7, %v3606_v1  ;;  %v3545_v15 = vpop.f32.mrb[82].mxu0  ;;  %v3609_v44 = vpop.f32.mrb[82].mxu1 }
 0x19d   : > { %v3546_v19 = vpop.f32.mrb[83].mxu0  ;;  %v3610_v62 = vpop.f32.mrb[83].mxu1 }
 0x19e   : > { %v4769_v54 = vadd.f32 %v3544_v9, %v4673_v59  ;;  %v3547_v22 = vadd.f32 %v3546_v19, %v3545_v15  ;;  %v3611_v38 = vadd.f32 %v3610_v62, %v3609_v44  ;;  %v4772_v52 = vadd.f32 %v3608_v37, %v4676_v2 }
 0x1a0   : > { %v4775_v40 = vadd.f32 %v3547_v22, %v4679_v16  ;;  %v4778_v12 = vadd.f32 %v3611_v38, %v4682_v30 }
 0x1a2   : > { %v3548_v25 = vpop.f32.mrb[84].mxu0  ;;  %v3612_v43 = vpop.f32.mrb[84].mxu1 }
 0x1a3   : > { %v3549_v20 = vpop.f32.mrb[85].mxu0  ;;  %v3613_v31 = vpop.f32.mrb[85].mxu1 }
 0x1a4   : > { %v3550_v34 = vadd.f32 %v3549_v20, %v3548_v25  ;;  %v3614_v41 = vadd.f32 %v3613_v31, %v3612_v43  ;;  %v3551_v53 = vpop.f32.mrb[86].mxu0  ;;  %v3615_v59 = vpop.f32.mrb[86].mxu1 }
 0x1a5   : > { %v3552_v42 = vpop.f32.mrb[87].mxu0  ;;  %v3616_v45 = vpop.f32.mrb[87].mxu1 }
 0x1a6   : > { %v4781_v47 = vadd.f32 %v3550_v34, %v4685_v8  ;;  %v3553_v2 = vadd.f32 %v3552_v42, %v3551_v53  ;;  %v3617_v57 = vadd.f32 %v3616_v45, %v3615_v59  ;;  %v4784_v16 = vadd.f32 %v3614_v41, %v4688_v24 }
 0x1a8   : > { %v4787_v30 = vadd.f32 %v3553_v2, %v4691_v11  ;;  %v4790_v28 = vadd.f32 %v3617_v57, %v4694_v27 }
 0x1aa   : > { %v3554_v21 = vpop.f32.mrb[88].mxu0  ;;  %v3618_v56 = vpop.f32.mrb[88].mxu1 }
 0x1ab   : > { %v3555_v36 = vpop.f32.mrb[89].mxu0  ;;  %v3619_v61 = vpop.f32.mrb[89].mxu1 }
 0x1ac   : > { %v3556_v63 = vadd.f32 %v3555_v36, %v3554_v21  ;;  %v3620_v1 = vadd.f32 %v3619_v61, %v3618_v56  ;;  %v3557_v4 = vpop.f32.mrb[90].mxu0  ;;  %v3621_v8 = vpop.f32.mrb[90].mxu1 }
 0x1ad   : > { %v3558_v7 = vpop.f32.mrb[91].mxu0  ;;  %v3622_v9 = vpop.f32.mrb[91].mxu1 }
 0x1ae   : > { %v4793_v37 = vadd.f32 %v3556_v63, %v4697_v29  ;;  %v3559_v24 = vadd.f32 %v3558_v7, %v3557_v4  ;;  %v3623_v15 = vadd.f32 %v3622_v9, %v3621_v8  ;;  %v4796_v11 = vadd.f32 %v3620_v1, %v4700_v49 }
 0x1b0   : > { %v4799_v27 = vadd.f32 %v3559_v24, %v4703_v33  ;;  %v4802_v44 = vadd.f32 %v3623_v15, %v4706_v0 }
 0x1b2   : > { %v3560_v19 = vpop.f32.mrb[92].mxu0  ;;  %v3624_v62 = vpop.f32.mrb[92].mxu1 }
 0x1b3   : > { %v3561_v22 = vpop.f32.mrb[93].mxu0  ;;  %v3625_v38 = vpop.f32.mrb[93].mxu1 }
 0x1b4   : > { %v3562_v25 = vadd.f32 %v3561_v22, %v3560_v19  ;;  %v3626_v43 = vadd.f32 %v3625_v38, %v3624_v62  ;;  %v3563_v20 = vpop.f32.mrb[94].mxu0  ;;  %v3627_v29 = vpop.f32.mrb[94].mxu1 }
 0x1b5   : > { %v3564_v31 = vpop.f32.mrb[95].mxu0  ;;  %v3628_v34 = vpop.f32.mrb[95].mxu1 }
 0x1b6   : > { %v4805_v41 = vadd.f32 %v3562_v25, %v4709_v50  ;;  %v3565_v49 = vadd.f32 %v3564_v31, %v3563_v20  ;;  %v3629_v53 = vadd.f32 %v3628_v34, %v3627_v29  ;;  %v4808_v33 = vadd.f32 %v3626_v43, %v4712_v18 }
 0x1b8   : > { %v4811_v0 = vadd.f32 %v3565_v49, %v4715_v55  ;;  %v4814_v59 = vadd.f32 %v3629_v53, %v4718_v46 }
 0x1ba   : > { %v3566_v42 = vpop.f32.mrb[96].mxu0  ;;  %v3630_v45 = vpop.f32.mrb[96].mxu1 }
 0x1bb   : > { %v3567_v2 = vpop.f32.mrb[97].mxu0  ;;  %v3631_v57 = vpop.f32.mrb[97].mxu1 }
 0x1bc   : > { %v3568_v21 = vadd.f32 %v3567_v2, %v3566_v42  ;;  %v3632_v56 = vadd.f32 %v3631_v57, %v3630_v45  ;;  %v3569_v36 = vpop.f32.mrb[98].mxu0  ;;  %v3633_v50 = vpop.f32.mrb[98].mxu1 }
 0x1bd   : > { %v3570_v61 = vpop.f32.mrb[99].mxu0  ;;  %v3634_v63 = vpop.f32.mrb[99].mxu1 }
 0x1be   : > { %v4817_v1 = vadd.f32 %v3568_v21, %v4721_v13  ;;  %v3571_v18 = vadd.f32 %v3570_v61, %v3569_v36  ;;  %v3635_v4 = vadd.f32 %v3634_v63, %v3633_v50  ;;  %v4820_v55 = vadd.f32 %v3632_v56, %v4724_v14 }
 0x1c0   : > { %v4823_v46 = vadd.f32 %v3571_v18, %v4727_v17  ;;  %v4826_v8 = vadd.f32 %v3635_v4, %v4730_v48 }
 0x1c2   : > { %v3572_v7 = vpop.f32.mrb[100].mxu0  ;;  %v3636_v9 = vpop.f32.mrb[100].mxu1 }
 0x1c3   : > { %v3573_v24 = vpop.f32.mrb[101].mxu0  ;;  %v3637_v15 = vpop.f32.mrb[101].mxu1 }
 0x1c4   : > { %v3574_v19 = vadd.f32 %v3573_v24, %v3572_v7  ;;  %v3638_v62 = vadd.f32 %v3637_v15, %v3636_v9  ;;  %v3575_v22 = vpop.f32.mrb[102].mxu0  ;;  %v3639_v13 = vpop.f32.mrb[102].mxu1 }
 0x1c5   : > { %v3576_v38 = vpop.f32.mrb[103].mxu0  ;;  %v3640_v25 = vpop.f32.mrb[103].mxu1 }
 0x1c6   : > { %v4829_v43 = vadd.f32 %v3574_v19, %v4733_v35  ;;  %v3577_v14 = vadd.f32 %v3576_v38, %v3575_v22  ;;  %v3641_v20 = vadd.f32 %v3640_v25, %v3639_v13  ;;  %v4832_v17 = vadd.f32 %v3638_v62, %v4736_v6  ;;  %v275_v25 = vld [vmem:[#allocation2 + $0x10] sm:$0xff] }
 0x1c8   : > { %v4835_v48 = vadd.f32 %v3577_v14, %v4739_v39  ;;  %v4838_v29 = vadd.f32 %v3641_v20, %v4742_v3 }
 0x1ca   : > { %v3578_v31 = vpop.f32.mrb[104].mxu0  ;;  %v3642_v34 = vpop.f32.mrb[104].mxu1 }
 0x1cb   : > { %v3579_v49 = vpop.f32.mrb[105].mxu0  ;;  %v3643_v53 = vpop.f32.mrb[105].mxu1 }
 0x1cc   : > { %v3580_v42 = vadd.f32 %v3579_v49, %v3578_v31  ;;  %v3644_v45 = vadd.f32 %v3643_v53, %v3642_v34  ;;  %v3581_v2 = vpop.f32.mrb[106].mxu0  ;;  %v3645_v35 = vpop.f32.mrb[106].mxu1  ;;  %v273_v34 = vld [vmem:[#allocation2] sm:$0xff] }
 0x1cd   : > { %v3582_v57 = vpop.f32.mrb[107].mxu0  ;;  %v3646_v21 = vpop.f32.mrb[107].mxu1 }
 0x1ce   : > { %v4841_v56 = vadd.f32 %v3580_v42, %v4745_v51  ;;  %v3583_v6 = vadd.f32 %v3582_v57, %v3581_v2  ;;  %v3647_v36 = vadd.f32 %v3646_v21, %v3645_v35  ;;  %v4844_v39 = vadd.f32 %v3644_v45, %v4748_v5 }
 0x1d0   : > { %v4847_v3 = vadd.f32 %v3583_v6, %v4751_v10  ;;  %v4850_v50 = vadd.f32 %v3647_v36, %v4754_v26 }
 0x1d2   : > { %v3584_v61 = vpop.f32.mrb[108].mxu0  ;;  %v3648_v63 = vpop.f32.mrb[108].mxu1 }
 0x1d3   : > { %v3585_v18 = vpop.f32.mrb[109].mxu0  ;;  %v3649_v4 = vpop.f32.mrb[109].mxu1 }
 0x1d4   : > { %v3586_v7 = vadd.f32 %v3585_v18, %v3584_v61  ;;  %v3650_v9 = vadd.f32 %v3649_v4, %v3648_v63  ;;  %v3587_v24 = vpop.f32.mrb[110].mxu0  ;;  %v3651_v51 = vpop.f32.mrb[110].mxu1  ;;  %v279_v18 = vld [vmem:[#allocation2 + $0x30] sm:$0xff] }
 0x1d5   : > { %v3588_v15 = vpop.f32.mrb[111].mxu0  ;;  %v3652_v19 = vpop.f32.mrb[111].mxu1 }
 0x1d6   : > { %v4853_v62 = vadd.f32 %v3586_v7, %v4757_v23  ;;  %v3589_v5 = vadd.f32 %v3588_v15, %v3587_v24  ;;  %v3653_v22 = vadd.f32 %v3652_v19, %v3651_v51  ;;  %v4856_v10 = vadd.f32 %v3650_v9, %v4760_v58  ;;  %v276_v58 = vld [vmem:[#allocation2 + $0x18] sm:$0xff]  ;;  %v277_v7 = vld [vmem:[#allocation2 + $0x20] sm:$0xff] }
 0x1d7   : > { %v280_v19 = vld [vmem:[#allocation2 + $0x38] sm:$0xff] }
 0x1d8   : > { %v4859_v26 = vadd.f32 %v3589_v5, %v4763_v32  ;;  %v4862_v13 = vadd.f32 %v3653_v22, %v4766_v60  ;;  %v274_v60 = vld [vmem:[#allocation2 + $0x8] sm:$0xff] }
 0x1da   : > { %v3654_v38 = vpop.f32.mrb[112].mxu1  ;;  %v3744_v14 = vpop.f32.mrb[112].mxu0 }
 0x1db   : > { %v2464_v20 = vadd.f32 %v3744_v14, %v4784_v16  ;;  %v3655_v31 = vpop.f32.mrb[113].mxu1  ;;  %v2455_v23 = vpop.f32.mrb[113].mxu0 }
 0x1dc   : > { %v3656_v49 = vadd.f32 %v3655_v31, %v3654_v38  ;;  %v2456_v53 = vadd.f32 %v2455_v23, %v4772_v52  ;;  %v3657_v42 = vpop.f32.mrb[114].mxu1  ;;  %v3745_v45 = vpop.f32.mrb[114].mxu0 }
 0x1dd   : > { %v2584_v2 = vadd.f32 %v2464_v20, %v275_v25  ;;  %v2467_v32 = vadd.f32 %v3745_v45, %v4790_v28  ;;  %v3658_v35 = vpop.f32.mrb[115].mxu1  ;;  %v2458_v57 = vpop.f32.mrb[115].mxu0  ;;  %v278_v25 = vld [vmem:[#allocation2 + $0x28] sm:$0xff] }
 0x1de   : > { %v2582_v21 = vadd.f32 %v2456_v53, %v273_v34  ;;  %v3659_v6 = vadd.f32 %v3658_v35, %v3657_v42  ;;  %v2459_v36 = vadd.f32 %v2458_v57, %v4778_v12  ;;  %v4869_v16 = vadd.f32 %v3656_v49, %v4769_v54  ;;  %v283_v57 = vld [vmem:[#allocation2 + $0x50] sm:$0xff] }
 0x1df   : > { %2617 = vst.msk [vmem:[#allocation2 + $0x10] sm:$0xff] %vm240_vm0, %v2584_v2  ;;  %v2585_v61 = vadd.f32 %v2467_v32, %v276_v58 }
 0x1e0   : > { %2615 = vst.msk [vmem:[#allocation2] sm:$0xff] %vm240_vm0, %v2582_v21  ;;  %v2583_v52 = vadd.f32 %v2459_v36, %v274_v60  ;;  %v4874_v63 = vadd.f32 %v3659_v6, %v4775_v40 }
 0x1e1   : > { %2618 = vst.msk [vmem:[#allocation2 + $0x18] sm:$0xff] %vm240_vm0, %v2585_v61  ;;  %v281_v61 = vld [vmem:[#allocation2 + $0x40] sm:$0xff] }
 0x1e2   : > { %2616 = vst.msk [vmem:[#allocation2 + $0x8] sm:$0xff] %vm240_vm0, %v2583_v52  ;;  %v3660_v28 = vpop.f32.mrb[116].mxu1  ;;  %v3748_v12 = vpop.f32.mrb[116].mxu0 }
 0x1e3   : > { %v2480_v54 = vadd.f32 %v3748_v12, %v4808_v33  ;;  %v3661_v4 = vpop.f32.mrb[117].mxu1  ;;  %v2471_v9 = vpop.f32.mrb[117].mxu0 }
 0x1e4   : > { %v3662_v24 = vadd.f32 %v3661_v4, %v3660_v28  ;;  %v2472_v51 = vadd.f32 %v2471_v9, %v4796_v11  ;;  %v3663_v15 = vpop.f32.mrb[118].mxu1  ;;  %v3749_v5 = vpop.f32.mrb[118].mxu0  ;;  %v284_v4 = vld [vmem:[#allocation2 + $0x58] sm:$0xff] }
 0x1e5   : > { %v2588_v40 = vadd.f32 %v2480_v54, %v279_v18  ;;  %v2483_v22 = vadd.f32 %v3749_v5, %v4814_v59  ;;  %v3664_v38 = vpop.f32.mrb[119].mxu1  ;;  %v2474_v14 = vpop.f32.mrb[119].mxu0 }
 0x1e6   : > { %v2652_v20 = vld [vmem:[#allocation2 + $0x10] sm:$0xff]  ;;  %v2586_v31 = vadd.f32 %v2472_v51, %v277_v7  ;;  %v3665_v34 = vadd.f32 %v3664_v38, %v3663_v15  ;;  %v2475_v33 = vadd.f32 %v2474_v14, %v4802_v44  ;;  %v4884_v23 = vadd.f32 %v3662_v24, %v4781_v47 }
 0x1e7   : > { %v2684_v49 = vmax.f32 %v2652_v20, 0.0  ;;  %v2650_v11 = vld [vmem:[#allocation2] sm:$0xff]  ;;  %2621 = vst.msk [vmem:[#allocation2 + $0x30] sm:$0xff] %vm240_vm0, %v2588_v40  ;;  %v2589_v53 = vadd.f32 %v2483_v22, %v280_v19 }
 0x1e8   : > { %v2682_v59 = vmax.f32 %v2650_v11, 0.0  ;;  %v2653_v42 = vld [vmem:[#allocation2 + $0x18] sm:$0xff]  ;;  %2619 = vst.msk [vmem:[#allocation2 + $0x20] sm:$0xff] %vm240_vm0, %v2586_v31  ;;  %v2587_v44 = vadd.f32 %v2475_v33, %v278_v25  ;;  %v4894_v47 = vadd.f32 %v3665_v34, %v4787_v30 }
 0x1e9   : > { %v3224_v58 = vpack.c.bf16 %v2684_v49, %v2684_v49  ;;  %v2685_v45 = vmax.f32 %v2653_v42, 0.0  ;;  %v2651_v2 = vld [vmem:[#allocation2 + $0x8] sm:$0xff]  ;;  %2622 = vst.msk [vmem:[#allocation2 + $0x38] sm:$0xff] %vm240_vm0, %v2589_v53 }
 0x1ea   : > { %v3222_v32 = vpack.c.bf16 %v2682_v59, %v2682_v59  ;;  %v2683_v35 = vmax.f32 %v2651_v2, 0.0  ;;  %2620 = vst.msk [vmem:[#allocation2 + $0x28] sm:$0xff] %vm240_vm0, %v2587_v44  ;;  %v3666_v60 = vpop.f32.mrb[120].mxu1  ;;  %v3752_v21 = vpop.f32.mrb[120].mxu0  ;;  %v287_v59 = vld [vmem:[#allocation2 + $0x70] sm:$0xff] }
 0x1eb   : > { %2845 = vst.msk [vmem:[%s4890_s8 + $0x8] sm:$0xf] %vm2842_vm1, %v3224_v58  ;;  %v3225_v6 = vpack.c.bf16 %v2685_v45, %v2685_v45  ;;  %v2496_v30 = vadd.f32 %v3752_v21, %v4832_v17  ;;  %v3667_v36 = vpop.f32.mrb[121].mxu1  ;;  %v2487_v52 = vpop.f32.mrb[121].mxu0  ;;  %v282_v17 = vld [vmem:[#allocation2 + $0x48] sm:$0xff]  ;;  %v285_v45 = vld [vmem:[#allocation2 + $0x60] sm:$0xff] }
 0x1ec   : > { %2843 = vst.msk [vmem:[%s4890_s8] sm:$0xf] %vm2842_vm1, %v3222_v32  ;;  %v3223_v28 = vpack.c.bf16 %v2683_v35, %v2683_v35  ;;  %v3668_v18 = vadd.f32 %v3667_v36, %v3666_v60  ;;  %v2488_v12 = vadd.f32 %v2487_v52, %v4820_v55  ;;  %v3669_v54 = vpop.f32.mrb[122].mxu1  ;;  %v3753_v7 = vpop.f32.mrb[122].mxu0  ;;  %v288_v21 = vld [vmem:[#allocation2 + $0x78] sm:$0xff] }
 0x1ed   : > { %2846 = vst.msk [vmem:[%s4890_s8 + $0xc] sm:$0xf] %vm2842_vm1, %v3225_v6  ;;  %v2592_v9 = vadd.f32 %v2496_v30, %v283_v57  ;;  %v2499_v24 = vadd.f32 %v3753_v7, %v4838_v29  ;;  %v3670_v51 = vpop.f32.mrb[123].mxu1  ;;  %v2490_v15 = vpop.f32.mrb[123].mxu0 }
 0x1ee   : > { %2844 = vst.msk [vmem:[%s4890_s8 + $0x4] sm:$0xf] %vm2842_vm1, %v3223_v28  ;;  %v2656_v19 = vld [vmem:[#allocation2 + $0x30] sm:$0xff]  ;;  %v2590_v5 = vadd.f32 %v2488_v12, %v281_v61  ;;  %v3671_v40 = vadd.f32 %v3670_v51, %v3669_v54  ;;  %v2491_v22 = vadd.f32 %v2490_v15, %v4826_v8  ;;  %v4911_v55 = vadd.f32 %v3668_v18, %v4793_v37 }
 0x1ef   : > { %v2688_v38 = vmax.f32 %v2656_v19, 0.0  ;;  %v2654_v25 = vld [vmem:[#allocation2 + $0x20] sm:$0xff]  ;;  %2625 = vst.msk [vmem:[#allocation2 + $0x50] sm:$0xff] %vm240_vm0, %v2592_v9  ;;  %v2593_v14 = vadd.f32 %v2499_v24, %v284_v4 }
 0x1f0   : > { %v2686_v29 = vmax.f32 %v2654_v25, 0.0  ;;  %v2657_v20 = vld [vmem:[#allocation2 + $0x38] sm:$0xff]  ;;  %2623 = vst.msk [vmem:[#allocation2 + $0x40] sm:$0xff] %vm240_vm0, %v2590_v5  ;;  %v2591_v31 = vadd.f32 %v2491_v22, %v282_v17  ;;  %v4916_v34 = vadd.f32 %v3671_v40, %v4799_v27  ;;  %v291_v22 = vld [vmem:[#allocation2 + $0x90] sm:$0xff] }
 0x1f1   : > { %v3228_v33 = vpack.c.bf16 %v2688_v38, %v2688_v38  ;;  %v2689_v8 = vmax.f32 %v2657_v20, 0.0  ;;  %v2655_v49 = vld [vmem:[#allocation2 + $0x28] sm:$0xff]  ;;  %2626 = vst.msk [vmem:[#allocation2 + $0x58] sm:$0xff] %vm240_vm0, %v2593_v14 }
 0x1f2   : > { %v3226_v37 = vpack.c.bf16 %v2686_v29, %v2686_v29  ;;  %v2687_v11 = vmax.f32 %v2655_v49, 0.0  ;;  %2624 = vst.msk [vmem:[#allocation2 + $0x48] sm:$0xff] %vm240_vm0, %v2591_v31  ;;  %v3672_v53 = vpop.f32.mrb[124].mxu1  ;;  %v3756_v42 = vpop.f32.mrb[124].mxu0  ;;  %v289_v29 = vld [vmem:[#allocation2 + $0x80] sm:$0xff] }
 0x1f3   : > { %2849 = vst.msk [vmem:[%s4890_s8 + $0x18] sm:$0xf] %vm2842_vm1, %v3228_v33  ;;  %v3229_v44 = vpack.c.bf16 %v2689_v8, %v2689_v8  ;;  %v2512_v27 = vadd.f32 %v3756_v42, %v4856_v10  ;;  %v3673_v58 = vpop.f32.mrb[125].mxu1  ;;  %v2503_v2 = vpop.f32.mrb[125].mxu0  ;;  %v286_v10 = vld [vmem:[#allocation2 + $0x68] sm:$0xff] }
 0x1f4   : > { %2847 = vst.msk [vmem:[%s4890_s8 + $0x10] sm:$0xf] %vm2842_vm1, %v3226_v37  ;;  %v3227_v32 = vpack.c.bf16 %v2687_v11, %v2687_v11  ;;  %v3674_v35 = vadd.f32 %v3673_v58, %v3672_v53  ;;  %v2504_v60 = vadd.f32 %v2503_v2, %v4844_v39  ;;  %v3675_v57 = vpop.f32.mrb[126].mxu1  ;;  %v3757_v6 = vpop.f32.mrb[126].mxu0  ;;  %v292_v37 = vld [vmem:[#allocation2 + $0x98] sm:$0xff] }
 0x1f5   : > { %2850 = vst.msk [vmem:[%s4890_s8 + $0x1c] sm:$0xf] %vm2842_vm1, %v3229_v44  ;;  %v2596_v30 = vadd.f32 %v2512_v27, %v287_v59  ;;  %v2515_v36 = vadd.f32 %v3757_v6, %v4862_v13  ;;  %v3676_v61 = vpop.f32.mrb[127].mxu1  ;;  %v2506_v52 = vpop.f32.mrb[127].mxu0 }
 0x1f6   : > { %2848 = vst.msk [vmem:[%s4890_s8 + $0x14] sm:$0xf] %vm2842_vm1, %v3227_v32  ;;  %v2660_v28 = vld [vmem:[#allocation2 + $0x50] sm:$0xff]  ;;  %v2594_v18 = vadd.f32 %v2504_v60, %v285_v45  ;;  %v3677_v12 = vadd.f32 %v3676_v61, %v3675_v57  ;;  %v2507_v54 = vadd.f32 %v2506_v52, %v4850_v50  ;;  %v4933_v39 = vadd.f32 %v3674_v35, %v4805_v41 }
 0x1f7   : > { %v2692_v4 = vmax.f32 %v2660_v28, 0.0  ;;  %v2658_v7 = vld [vmem:[#allocation2 + $0x40] sm:$0xff]  ;;  %2629 = vst.msk [vmem:[#allocation2 + $0x70] sm:$0xff] %vm240_vm0, %v2596_v30  ;;  %v2597_v9 = vadd.f32 %v2515_v36, %v288_v21  ;;  %v295_v52 = vld [vmem:[#allocation2 + $0xb0] sm:$0xff] }
 0x1f8   : > { %v2690_v13 = vmax.f32 %v2658_v7, 0.0  ;;  %v2661_v24 = vld [vmem:[#allocation2 + $0x58] sm:$0xff]  ;;  %2627 = vst.msk [vmem:[#allocation2 + $0x60] sm:$0xff] %vm240_vm0, %v2594_v18  ;;  %v2595_v51 = vadd.f32 %v2507_v54, %v286_v10  ;;  %v4938_v17 = vadd.f32 %v3677_v12, %v4811_v0  ;;  %v293_v54 = vld [vmem:[#allocation2 + $0xa0] sm:$0xff] }
 0x1f9   : > { %v3232_v15 = vpack.c.bf16 %v2692_v4, %v2692_v4  ;;  %v2693_v50 = vmax.f32 %v2661_v24, 0.0  ;;  %v2659_v19 = vld [vmem:[#allocation2 + $0x48] sm:$0xff]  ;;  %2630 = vst.msk [vmem:[#allocation2 + $0x78] sm:$0xff] %vm240_vm0, %v2597_v9 }
 0x1fa   : > { %v3230_v41 = vpack.c.bf16 %v2690_v13, %v2690_v13  ;;  %v2691_v5 = vmax.f32 %v2659_v19, 0.0  ;;  %2628 = vst.msk [vmem:[#allocation2 + $0x68] sm:$0xff] %vm240_vm0, %v2595_v51  ;;  %v3678_v40 = vpop.f32.mrb[128].mxu1  ;;  %v3760_v38 = vpop.f32.mrb[128].mxu0  ;;  %v296_v51 = vld [vmem:[#allocation2 + $0xb8] sm:$0xff] }
 0x1fb   : > { %2853 = vst.msk [vmem:[%s4890_s8 + $0x28] sm:$0xf] %vm2842_vm1, %v3232_v15  ;;  %v3233_v25 = vpack.c.bf16 %v2693_v50, %v2693_v50  ;;  %v2528_v0 = vadd.f32 %v3760_v38, %v4884_v23  ;;  %v3679_v14 = vpop.f32.mrb[129].mxu1  ;;  %v2519_v20 = vpop.f32.mrb[129].mxu0  ;;  %v290_v23 = vld [vmem:[#allocation2 + $0x88] sm:$0xff] }
 0x1fc   : > { %2851 = vst.msk [vmem:[%s4890_s8 + $0x20] sm:$0xf] %vm2842_vm1, %v3230_v41  ;;  %v3231_v31 = vpack.c.bf16 %v2691_v5, %v2691_v5  ;;  %v3680_v33 = vadd.f32 %v3679_v14, %v3678_v40  ;;  %v2520_v8 = vadd.f32 %v2519_v20, %v4869_v16  ;;  %v3681_v49 = vpop.f32.mrb[130].mxu1  ;;  %v3761_v11 = vpop.f32.mrb[130].mxu0 }
 0x1fd   : > { %2854 = vst.msk [vmem:[%s4890_s8 + $0x2c] sm:$0xf] %vm2842_vm1, %v3233_v25  ;;  %v2600_v53 = vadd.f32 %v2528_v0, %v291_v22  ;;  %v2531_v59 = vadd.f32 %v3761_v11, %v4894_v47  ;;  %v3682_v42 = vpop.f32.mrb[131].mxu1  ;;  %v2522_v44 = vpop.f32.mrb[131].mxu0 }
 0x1fe   : > { %2852 = vst.msk [vmem:[%s4890_s8 + $0x24] sm:$0xf] %vm2842_vm1, %v3231_v31  ;;  %v2664_v27 = vld [vmem:[#allocation2 + $0x70] sm:$0xff]  ;;  %v2598_v58 = vadd.f32 %v2520_v8, %v289_v29  ;;  %v3683_v45 = vadd.f32 %v3682_v42, %v3681_v49  ;;  %v2523_v2 = vadd.f32 %v2522_v44, %v4874_v63  ;;  %v4955_v16 = vadd.f32 %v3680_v33, %v4817_v1 }
 0x1ff   : > { %v2696_v32 = vmax.f32 %v2664_v27, 0.0  ;;  %v2662_v35 = vld [vmem:[#allocation2 + $0x60] sm:$0xff]  ;;  %2633 = vst.msk [vmem:[#allocation2 + $0x90] sm:$0xff] %vm240_vm0, %v2600_v53  ;;  %v2601_v60 = vadd.f32 %v2531_v59, %v292_v37  ;;  %v299_v53 = vld [vmem:[#allocation2 + $0xd0] sm:$0xff] }
 0x200   : > { %v2694_v47 = vmax.f32 %v2662_v35, 0.0  ;;  %v2665_v57 = vld [vmem:[#allocation2 + $0x78] sm:$0xff]  ;;  %2631 = vst.msk [vmem:[#allocation2 + $0x80] sm:$0xff] %vm240_vm0, %v2598_v58  ;;  %v2599_v21 = vadd.f32 %v2523_v2, %v290_v23  ;;  %v4960_v6 = vadd.f32 %v3683_v45, %v4823_v46 }
 0x201   : > { %v3236_v30 = vpack.c.bf16 %v2696_v32, %v2696_v32  ;;  %v2697_v63 = vmax.f32 %v2665_v57, 0.0  ;;  %v2663_v36 = vld [vmem:[#allocation2 + $0x68] sm:$0xff]  ;;  %2634 = vst.msk [vmem:[#allocation2 + $0x98] sm:$0xff] %vm240_vm0, %v2601_v60  ;;  %v300_v35 = vld [vmem:[#allocation2 + $0xd8] sm:$0xff] }
 0x202   : > { %v3234_v1 = vpack.c.bf16 %v2694_v47, %v2694_v47  ;;  %v2695_v61 = vmax.f32 %v2663_v36, 0.0  ;;  %2632 = vst.msk [vmem:[#allocation2 + $0x88] sm:$0xff] %vm240_vm0, %v2599_v21  ;;  %v3684_v10 = vpop.f32.mrb[132].mxu1  ;;  %v3764_v28 = vpop.f32.mrb[132].mxu0 }
 0x203   : > { %2857 = vst.msk [vmem:[%s4890_s8 + $0x38] sm:$0xf] %vm2842_vm1, %v3236_v30  ;;  %v3237_v18 = vpack.c.bf16 %v2697_v63, %v2697_v63  ;;  %v2544_v46 = vadd.f32 %v3764_v28, %v4933_v39  ;;  %v3685_v12 = vpop.f32.mrb[133].mxu1  ;;  %v2535_v4 = vpop.f32.mrb[133].mxu0  ;;  %v294_v39 = vld [vmem:[#allocation2 + $0xa8] sm:$0xff] }
 0x204   : > { %2855 = vst.msk [vmem:[%s4890_s8 + $0x30] sm:$0xf] %vm2842_vm1, %v3234_v1  ;;  %v3235_v7 = vpack.c.bf16 %v2695_v61, %v2695_v61  ;;  %v3686_v9 = vadd.f32 %v3685_v12, %v3684_v10  ;;  %v2536_v13 = vadd.f32 %v2535_v4, %v4911_v55  ;;  %v3687_v24 = vpop.f32.mrb[134].mxu1  ;;  %v3765_v15 = vpop.f32.mrb[134].mxu0  ;;  %v298_v30 = vld [vmem:[#allocation2 + $0xc8] sm:$0xff] }
 0x205   : > { %2858 = vst.msk [vmem:[%s4890_s8 + $0x3c] sm:$0xf] %vm2842_vm1, %v3237_v18  ;;  %v2604_v50 = vadd.f32 %v2544_v46, %v295_v52  ;;  %v2547_v19 = vadd.f32 %v3765_v15, %v4938_v17  ;;  %v3688_v41 = vpop.f32.mrb[135].mxu1  ;;  %v2538_v5 = vpop.f32.mrb[135].mxu0 }
 0x206   : > { %2856 = vst.msk [vmem:[%s4890_s8 + $0x34] sm:$0xf] %vm2842_vm1, %v3235_v7  ;;  %v2668_v40 = vld [vmem:[#allocation2 + $0x90] sm:$0xff]  ;;  %v2602_v22 = vadd.f32 %v2536_v13, %v293_v54  ;;  %v3689_v38 = vadd.f32 %v3688_v41, %v3687_v24  ;;  %v2539_v25 = vadd.f32 %v2538_v5, %v4916_v34  ;;  %v2399_v55 = vadd.f32 %v3686_v9, %v4829_v43 }
 0x207   : > { %v2700_v0 = vmax.f32 %v2668_v40, 0.0  ;;  %v2666_v14 = vld [vmem:[#allocation2 + $0x80] sm:$0xff]  ;;  %2637 = vst.msk [vmem:[#allocation2 + $0xb0] sm:$0xff] %vm240_vm0, %v2604_v50  ;;  %v2605_v29 = vadd.f32 %v2547_v19, %v296_v51 }
 0x208   : > { %v2698_v20 = vmax.f32 %v2666_v14, 0.0  ;;  %v2669_v17 = vld [vmem:[#allocation2 + $0x98] sm:$0xff]  ;;  %2635 = vst.msk [vmem:[#allocation2 + $0xa0] sm:$0xff] %vm240_vm0, %v2602_v22  ;;  %v2603_v31 = vadd.f32 %v2539_v25, %v294_v39  ;;  %v2402_v33 = vadd.f32 %v3689_v38, %v4835_v48  ;;  %v297_v48 = vld [vmem:[#allocation2 + $0xc0] sm:$0xff]  ;;  %v302_v25 = vld [vmem:[#allocation2 + $0xe8] sm:$0xff] }
 0x209   : > { %v3240_v8 = vpack.c.bf16 %v2700_v0, %v2700_v0  ;;  %v2701_v49 = vmax.f32 %v2669_v17, 0.0  ;;  %v2667_v37 = vld [vmem:[#allocation2 + $0x88] sm:$0xff]  ;;  %2638 = vst.msk [vmem:[#allocation2 + $0xb8] sm:$0xff] %vm240_vm0, %v2605_v29  ;;  %v301_v19 = vld [vmem:[#allocation2 + $0xe0] sm:$0xff] }
 0x20a   : > { %v3238_v43 = vpack.c.bf16 %v2698_v20, %v2698_v20  ;;  %v2699_v34 = vmax.f32 %v2667_v37, 0.0  ;;  %2636 = vst.msk [vmem:[#allocation2 + $0xa8] sm:$0xff] %vm240_vm0, %v2603_v31  ;;  %v3690_v11 = vpop.f32.mrb[136].mxu1  ;;  %v3768_v59 = vpop.f32.mrb[136].mxu0 }
 0x20b   : > { %2861 = vst.msk [vmem:[%s4890_s8 + $0x48] sm:$0xf] %vm2842_vm1, %v3240_v8  ;;  %v3241_v42 = vpack.c.bf16 %v2701_v49, %v2701_v49  ;;  %v2560_v23 = vadd.f32 %v3768_v59, %v2399_v55  ;;  %v3691_v44 = vpop.f32.mrb[137].mxu1  ;;  %v2551_v27 = vpop.f32.mrb[137].mxu0  ;;  %v303_v8 = vld [vmem:[#allocation2 + $0xf0] sm:$0xff] }
 0x20c   : > { %2859 = vst.msk [vmem:[%s4890_s8 + $0x40] sm:$0xf] %vm2842_vm1, %v3238_v43  ;;  %v3239_v58 = vpack.c.bf16 %v2699_v34, %v2699_v34  ;;  %v3692_v45 = vadd.f32 %v3691_v44, %v3690_v11  ;;  %v2552_v2 = vadd.f32 %v2551_v27, %v4955_v16  ;;  %v3693_v32 = vpop.f32.mrb[138].mxu1  ;;  %v3769_v60 = vpop.f32.mrb[138].mxu0 }
 0x20d   : > { %2862 = vst.msk [vmem:[%s4890_s8 + $0x4c] sm:$0xf] %vm2842_vm1, %v3241_v42  ;;  %v2608_v47 = vadd.f32 %v2560_v23, %v299_v53  ;;  %v2563_v57 = vadd.f32 %v3769_v60, %v2402_v33  ;;  %v3694_v21 = vpop.f32.mrb[139].mxu1  ;;  %v2554_v63 = vpop.f32.mrb[139].mxu0  ;;  %v304_v42 = vld [vmem:[#allocation2 + $0xf8] sm:$0xff] }
 0x20e   : > { %2860 = vst.msk [vmem:[%s4890_s8 + $0x44] sm:$0xf] %vm2842_vm1, %v3239_v58  ;;  %v2672_v36 = vld [vmem:[#allocation2 + $0xb0] sm:$0xff]  ;;  %v2606_v1 = vadd.f32 %v2552_v2, %v297_v48  ;;  %v3695_v61 = vadd.f32 %v3694_v21, %v3693_v32  ;;  %v2555_v10 = vadd.f32 %v2554_v63, %v4960_v6  ;;  %v2407_v52 = vadd.f32 %v3692_v45, %v4841_v56 }
 0x20f   : > { %v2704_v16 = vmax.f32 %v2672_v36, 0.0  ;;  %v2670_v28 = vld [vmem:[#allocation2 + $0xa0] sm:$0xff]  ;;  %2641 = vst.msk [vmem:[#allocation2 + $0xd0] sm:$0xff] %vm240_vm0, %v2608_v47  ;;  %v2609_v18 = vadd.f32 %v2563_v57, %v300_v35 }
 0x210   : > { %v2702_v46 = vmax.f32 %v2670_v28, 0.0  ;;  %v2673_v12 = vld [vmem:[#allocation2 + $0xb8] sm:$0xff]  ;;  %2639 = vst.msk [vmem:[#allocation2 + $0xc0] sm:$0xff] %vm240_vm0, %v2606_v1  ;;  %v2607_v54 = vadd.f32 %v2555_v10, %v298_v30  ;;  %v2410_v4 = vadd.f32 %v3695_v61, %v4847_v3 }
 0x211   : > { %v3244_v7 = vpack.c.bf16 %v2704_v16, %v2704_v16  ;;  %v2705_v9 = vmax.f32 %v2673_v12, 0.0  ;;  %v2671_v13 = vld [vmem:[#allocation2 + $0xa8] sm:$0xff]  ;;  %2642 = vst.msk [vmem:[#allocation2 + $0xd8] sm:$0xff] %vm240_vm0, %v2609_v18 }
 0x212   : > { %v3242_v56 = vpack.c.bf16 %v2702_v46, %v2702_v46  ;;  %v2703_v6 = vmax.f32 %v2671_v13, 0.0  ;;  %2640 = vst.msk [vmem:[#allocation2 + $0xc8] sm:$0xff] %vm240_vm0, %v2607_v54  ;;  %v3696_v24 = vpop.f32.mrb[140].mxu1  ;;  %v3772_v51 = vpop.f32.mrb[140].mxu0 }
 0x213   : > { %2865 = vst.msk [vmem:[%s4890_s8 + $0x58] sm:$0xf] %vm2842_vm1, %v3244_v7  ;;  %v3245_v15 = vpack.c.bf16 %v2705_v9, %v2705_v9  ;;  %v3697_v50 = vpop.f32.mrb[141].mxu1  ;;  %v2567_v41 = vpop.f32.mrb[141].mxu0 }
 0x214   : > { %2863 = vst.msk [vmem:[%s4890_s8 + $0x50] sm:$0xf] %vm2842_vm1, %v3242_v56  ;;  %v3243_v3 = vpack.c.bf16 %v2703_v6, %v2703_v6  ;;  %v3698_v39 = vadd.f32 %v3697_v50, %v3696_v24  ;;  %v2568_v5 = vadd.f32 %v2567_v41, %v2407_v52  ;;  %v3699_v40 = vpop.f32.mrb[142].mxu1  ;;  %v3773_v22 = vpop.f32.mrb[142].mxu0 }
 0x215   : > { %2866 = vst.msk [vmem:[%s4890_s8 + $0x5c] sm:$0xf] %vm2842_vm1, %v3245_v15  ;;  %v3700_v38 = vpop.f32.mrb[143].mxu1  ;;  %v2570_v55 = vpop.f32.mrb[143].mxu0 }
 0x216   : > { %2864 = vst.msk [vmem:[%s4890_s8 + $0x54] sm:$0xf] %vm2842_vm1, %v3243_v3  ;;  %v2676_v0 = vld [vmem:[#allocation2 + $0xd0] sm:$0xff]  ;;  %v2415_v14 = vadd.f32 %v3698_v39, %v4853_v62  ;;  %v2610_v29 = vadd.f32 %v2568_v5, %v301_v19  ;;  %v3701_v20 = vadd.f32 %v3700_v38, %v3699_v40  ;;  %v2571_v17 = vadd.f32 %v2570_v55, %v2410_v4 }
 0x217   : > { %v2708_v31 = vmax.f32 %v2676_v0, 0.0  ;;  %v2674_v33 = vld [vmem:[#allocation2 + $0xc0] sm:$0xff] }
 0x218   : > { %v2706_v49 = vmax.f32 %v2674_v33, 0.0  ;;  %v2677_v37 = vld [vmem:[#allocation2 + $0xd8] sm:$0xff]  ;;  %v2576_v43 = vadd.f32 %v3772_v51, %v2415_v14  ;;  %2643 = vst.msk [vmem:[#allocation2 + $0xe0] sm:$0xff] %vm240_vm0, %v2610_v29  ;;  %v2418_v34 = vadd.f32 %v3701_v20, %v4859_v26  ;;  %v2611_v11 = vadd.f32 %v2571_v17, %v302_v25 }
 0x219   : > { %v3248_v53 = vpack.c.bf16 %v2708_v31, %v2708_v31  ;;  %v2709_v62 = vmax.f32 %v2677_v37, 0.0  ;;  %v2675_v59 = vld [vmem:[#allocation2 + $0xc8] sm:$0xff] }
 0x21a   : > { %v3246_v23 = vpack.c.bf16 %v2706_v49, %v2706_v49  ;;  %v2707_v44 = vmax.f32 %v2675_v59, 0.0  ;;  %v2612_v48 = vadd.f32 %v2576_v43, %v303_v8  ;;  %v2579_v27 = vadd.f32 %v3773_v22, %v2418_v34  ;;  %2644 = vst.msk [vmem:[#allocation2 + $0xe8] sm:$0xff] %vm240_vm0, %v2611_v11 }
 0x21b   : > { %2869 = vst.msk [vmem:[%s4890_s8 + $0x68] sm:$0xf] %vm2842_vm1, %v3248_v53  ;;  %v3249_v58 = vpack.c.bf16 %v2709_v62, %v2709_v62 }
 0x21c   : > { %2867 = vst.msk [vmem:[%s4890_s8 + $0x60] sm:$0xf] %vm2842_vm1, %v3246_v23  ;;  %v3247_v26 = vpack.c.bf16 %v2707_v44, %v2707_v44  ;;  %v2613_v45 = vadd.f32 %v2579_v27, %v304_v42 }
 0x21d   : > { %2645 = vst.msk [vmem:[#allocation2 + $0xf0] sm:$0xff] %vm240_vm0, %v2612_v48 }
 0x21e   : > { %2870 = vst.msk [vmem:[%s4890_s8 + $0x6c] sm:$0xf] %vm2842_vm1, %v3249_v58  ;;  %2868 = vst.msk [vmem:[%s4890_s8 + $0x64] sm:$0xf] %vm2842_vm1, %v3247_v26 }
 0x21f   : > { %2646 = vst.msk [vmem:[#allocation2 + $0xf8] sm:$0xff] %vm240_vm0, %v2613_v45  ;;  %v2678_v2 = vld [vmem:[#allocation2 + $0xe0] sm:$0xff] }
 0x220   : > { %v2710_v32 = vmax.f32 %v2678_v2, 0.0 }
 0x221   : > { %v2679_v35 = vld [vmem:[#allocation2 + $0xe8] sm:$0xff] }
 0x222   : > { %v3250_v60 = vpack.c.bf16 %v2710_v32, %v2710_v32  ;;  %v2711_v47 = vmax.f32 %v2679_v35, 0.0 }
 0x224   : > { %v2680_v57 = vld [vmem:[#allocation2 + $0xf0] sm:$0xff]  ;;  %2871 = vst.msk [vmem:[%s4890_s8 + $0x70] sm:$0xf] %vm2842_vm1, %v3250_v60  ;;  %v3251_v30 = vpack.c.bf16 %v2711_v47, %v2711_v47 }
 0x225   : > { %v2712_v21 = vmax.f32 %v2680_v57, 0.0 }
 0x226   : > { %v2681_v63 = vld [vmem:[#allocation2 + $0xf8] sm:$0xff]  ;;  %2872 = vst.msk [vmem:[%s4890_s8 + $0x74] sm:$0xf] %vm2842_vm1, %v3251_v30 }
 0x227   : > { %v3252_v36 = vpack.c.bf16 %v2712_v21, %v2712_v21  ;;  %v2713_v1 = vmax.f32 %v2681_v63, 0.0 }
 0x229   : > { %2873 = vst.msk [vmem:[%s4890_s8 + $0x78] sm:$0xf] %vm2842_vm1, %v3252_v36  ;;  %v3253_v61 = vpack.c.bf16 %v2713_v1, %v2713_v1 }
 0x22b   : > { %2874 = vst.msk [vmem:[%s4890_s8 + $0x7c] sm:$0xf] %vm2842_vm1, %v3253_v61 }
 0x22c PF: > { %s13_s14 = sadd.s32 1, %s4117_s14   ;;  %s5041_s12 = smov %s4113_s13 }
 0x22d   : > { %p10_p5 = scmp.ge.s32.totalorder %s13_s14, 4   ;;  %s5042_s13 = smov %s5044_s15 }
 0x22f   :  { %12 = sbr.rel (!%p10_p5) target bundleno = 2 (0x2), region = 73 }

// kernel: enhanced_cnn_policy_forward.6
= control target key start
LH: loop header
LB: loop body
LE: loop exit
PB: predicated region body
PF: predicated region fallthrough
CT: control target
= control target key end

     0   :  { %s2725_s12 = smov 0   ;;  %s2727_s13 = smov 0   ;;  %s3227_s0 = inlined_call_operand.vmem [shape: bf16[512,576], index: 0, kind: input, shape index: {}]   ;;  %s3228_s1 = inlined_call_operand.vmem [shape: bf16[576,64], index: 1, kind: input, shape index: {}]   ;;  %s3229_s2 = inlined_call_operand.vmem [shape: f32[1,64], index: 2, kind: input, shape index: {}]   ;;  %s3230_s3 = inlined_call_operand.vmem [shape: bf16[512,64], index: 3, kind: output, shape index: {}]  }
   0x1   :  { %s2729_s14 = smov 0  }
   0x2 LB: > { %s25_s15 = sadd.s32 1, %s2699_s13  ;;  %p2004_p0 = scmp.ge.s32.totalorder %s2703_s14, 1  ;;  %s2703_s14 = sphi %s2729_s14, %s13_s14   ;;  %s2699_s13 = sphi %s2727_s13, %s3232_s13   ;;  %s2695_s12 = sphi %s2725_s12, %s3231_s12  }
   0x3   : > { %p27_p1 = scmp.ge.s32.totalorder %s25_s15, 2  ;;  %p169_p2 = scmp.lt.s32.totalorder %s2703_s14, 3 }
   0x5   : > { %s3234_s15 = smov (%p27_p1, %s25_s15), 0  ;;  %p170_p3 = pnand %p2004_p0, %p169_p2 }
   0x6   : > { %v2533_v0 = vld [vmem:[%s3228_s1 + $0x40] sm:$0xff] (!%p170_p3)   ;;  %s2005_s18 = sshll.u32 (!%p170_p3), %s2695_s12, 5  ;;  %v2535_v2 = vld [vmem:[%s3228_s1 + $0x48] sm:$0xff] (!%p170_p3)   ;;  %v2537_v4 = vld [vmem:[%s3228_s1 + $0x50] sm:$0xff] (!%p170_p3)   ;;  %vm240_vm0 = vcmask (!%p170_p3), 523264   ;;  %vm1880_vm1 = vcmask (!%p170_p3), 519168  }
   0x7   : > { %173 = sbr.rel (%p170_p3) target bundleno = 428 (0x1ac), region = 32  ;;  %v2534_v1 = vld [vmem:[%s3228_s1] sm:$0xff] (!%p170_p3)   ;;  %2208 = vmatprep.subr.bf16.mxu0 (!%p170_p3), %v2533_v0  ;;  %2492 = vmatprep.subr.bf16.mxu1 (!%p170_p3), %v2533_v0  ;;  %p205_p4 = scmp.lt.s32.totalorder (!%p170_p3), %s2005_s18, 63  ;;  %v2536_v3 = vld [vmem:[%s3228_s1 + $0x8] sm:$0xff] (!%p170_p3)   ;;  %v2538_v5 = vld [vmem:[%s3228_s1 + $0x10] sm:$0xff] (!%p170_p3)  }
   0x8   : > { %2209 = vmatpush3.bf16.msra.mxu0 (!%p170_p3), %v2534_v1  ;;  %2500 = vmatpush3.bf16.msra.mxu1 (!%p170_p3), %v2534_v1  ;;  %v2539_v6 = vld [vmem:[%s3228_s1 + $0x58] sm:$0xff] (!%p170_p3)   ;;  %v2541_v8 = vld [vmem:[%s3228_s1 + $0x60] sm:$0xff] (!%p170_p3)   ;;  %v2543_v10 = vld [vmem:[%s3228_s1 + $0x68] sm:$0xff] (!%p170_p3)  }
   0x9   : > { %2210 = vmatprep.subr.bf16.mxu0 (!%p170_p3), %v2535_v2  ;;  %2493 = vmatprep.subr.bf16.mxu1 (!%p170_p3), %v2535_v2  ;;  %v2540_v7 = vld [vmem:[%s3228_s1 + $0x18] sm:$0xff] (!%p170_p3)   ;;  %v2542_v9 = vld [vmem:[%s3228_s1 + $0x20] sm:$0xff] (!%p170_p3)   ;;  %v2544_v13 = vld [vmem:[%s3228_s1 + $0x28] sm:$0xff] (!%p170_p3)  }
   0xa   : > { %v2545_v14 = vld [vmem:[%s3228_s1 + $0x70] sm:$0xff] (!%p170_p3)   ;;  %v2547_v16 = vld [vmem:[%s3228_s1 + $0x78] sm:$0xff] (!%p170_p3)   ;;  %v2555_v18 = vld [vmem:[%s3228_s1 + $0xc0] sm:$0xff] (!%p170_p3)  }
   0xb   : > { %v2546_v15 = vld [vmem:[%s3228_s1 + $0x30] sm:$0xff] (!%p170_p3)   ;;  %v2548_v17 = vld [vmem:[%s3228_s1 + $0x38] sm:$0xff] (!%p170_p3)   ;;  %v2558_v19 = vld [vmem:[%s3228_s1 + $0x100] sm:$0xff] (!%p170_p3)  }
   0xc   : > { %2211 = vmatpush3.bf16.msra.mxu0 (!%p170_p3), %v2536_v3  ;;  %2501 = vmatpush3.bf16.msra.mxu1 (!%p170_p3), %v2536_v3  ;;  %v2556_v22 = vld [vmem:[%s3228_s1 + $0x80] sm:$0xff] (!%p170_p3)   ;;  %v2557_v23 = vld [vmem:[%s3228_s1 + $0xc8] sm:$0xff] (!%p170_p3)   ;;  %v2566_v28 = vld [vmem:[%s3228_s1 + $0xd0] sm:$0xff] (!%p170_p3)  }
   0xd   : > { %2212 = vmatprep.subr.bf16.mxu0 (!%p170_p3), %v2537_v4  ;;  %2494 = vmatprep.subr.bf16.mxu1 (!%p170_p3), %v2537_v4  ;;  %v2559_v26 = vld [vmem:[%s3228_s1 + $0x88] sm:$0xff] (!%p170_p3)   ;;  %v2567_v30 = vld [vmem:[%s3228_s1 + $0x90] sm:$0xff] (!%p170_p3)   ;;  %v2568_v31 = vld [vmem:[%s3228_s1 + $0xd8] sm:$0xff] (!%p170_p3)  }
   0xe   : > { %s3236_s18 = smov (!%p205_p4, %s2005_s18), 63  ;;  %v2569_v34 = vld [vmem:[%s3228_s1 + $0x98] sm:$0xff]   ;;  %v2589_v35 = vld [vmem:[%s3228_s1 + $0x108] sm:$0xff]   ;;  %v2576_v37 = vld [vmem:[%s3228_s1 + $0xe0] sm:$0xff]  }
   0xf   : > { %s2508_s4 = smul.u32 20, %s3236_s18  ;;  %v2577_v39 = vld [vmem:[%s3228_s1 + $0xa0] sm:$0xff]   ;;  %v2578_v40 = vld [vmem:[%s3228_s1 + $0xe8] sm:$0xff]   ;;  %v2586_v46 = vld [vmem:[%s3228_s1 + $0xf0] sm:$0xff]  }
  0x10   : > { %2213 = vmatpush3.bf16.msra.mxu0 %v2538_v5  ;;  %2502 = vmatpush3.bf16.msra.mxu1 %v2538_v5  ;;  %v2579_v43 = vld [vmem:[%s3228_s1 + $0xa8] sm:$0xff]   ;;  %v2609_v47 = vld [vmem:[%s3228_s1 + $0x110] sm:$0xff]   ;;  %v2588_v49 = vld [vmem:[%s3228_s1 + $0xf8] sm:$0xff]  }
  0x11   : > { %2214 = vmatprep.subr.bf16.mxu0 %v2539_v6  ;;  %2495 = vmatprep.subr.bf16.mxu1 %v2539_v6  ;;  %s2776_s11 = scalar_lea.vmem %s3227_s0, %s2508_s4  ;;  %v2587_v48 = vld [vmem:[%s3228_s1 + $0xb0] sm:$0xff]   ;;  %v2590_v52 = vld [vmem:[%s3228_s1 + $0xb8] sm:$0xff]  }
  0x12   : > { %v2551_v11 = vld [vmem:[%s2776_s11 + $0x4] ss:$20 sps:$4 sm:$0xff]   ;;  %v2549_v20 = vld [vmem:[%s2776_s11] ss:$20 sps:$4 sm:$0xff]   ;;  %v2564_v27 = vld [vmem:[%s2776_s11 + $0x28] ss:$20 sps:$4 sm:$0xff]  }
  0x13   : > { %v2554_v12 = vld [vmem:[%s2776_s11 + $0x1e4] ss:$20 sps:$4 sm:$0xff]   ;;  %1170 = vmatprep.mubr.bf16.mxu0 %v2551_v11  ;;  %v2552_v21 = vld [vmem:[%s2776_s11 + $0x1e0] ss:$20 sps:$4 sm:$0xff]   ;;  %v2565_v29 = vld [vmem:[%s2776_s11 + $0x208] ss:$20 sps:$4 sm:$0xff]  }
  0x14   : > { %2215 = vmatpush3.bf16.msra.mxu0 %v2540_v7  ;;  %2503 = vmatpush3.bf16.msra.mxu1 %v2540_v7  ;;  %v2560_v24 = vld [vmem:[%s2776_s11 + $0x2c] ss:$20 sps:$4 sm:$0xff]   ;;  %v2570_v32 = vld [vmem:[%s2776_s11 + $0x54] ss:$20 sps:$4 sm:$0xff]   ;;  %v2574_v36 = vld [vmem:[%s2776_s11 + $0x50] ss:$20 sps:$4 sm:$0xff]  }
  0x15   : > { %2216 = vmatprep.subr.bf16.mxu0 %v2541_v8  ;;  %2496 = vmatprep.subr.bf16.mxu1 %v2541_v8  ;;  %v2562_v25 = vld [vmem:[%s2776_s11 + $0x20c] ss:$20 sps:$4 sm:$0xff]   ;;  %v2572_v33 = vld [vmem:[%s2776_s11 + $0x234] ss:$20 sps:$4 sm:$0xff]   ;;  %v2575_v38 = vld [vmem:[%s2776_s11 + $0x230] ss:$20 sps:$4 sm:$0xff]  }
  0x16   : > { %1266 = vmatprep.mubr.bf16.mxu1 %v2554_v12  ;;  %v2580_v41 = vld [vmem:[%s2776_s11 + $0x7c] ss:$20 sps:$4 sm:$0xff]   ;;  %v2584_v44 = vld [vmem:[%s2776_s11 + $0x78] ss:$20 sps:$4 sm:$0xff]   ;;  %v2596_v54 = vld [vmem:[%s2776_s11 + $0xa0] ss:$20 sps:$4 sm:$0xff]  }
  0x17   : > { %v2582_v42 = vld [vmem:[%s2776_s11 + $0x25c] ss:$20 sps:$4 sm:$0xff]   ;;  %v2585_v45 = vld [vmem:[%s2776_s11 + $0x258] ss:$20 sps:$4 sm:$0xff]   ;;  %v2599_v57 = vld [vmem:[%s2776_s11 + $0x34] ss:$20 sps:$4 sm:$0xff]  }
  0x18   : > { %2217 = vmatpush3.bf16.msra.mxu0 %v2542_v9  ;;  %2504 = vmatpush3.bf16.msra.mxu1 %v2542_v9  ;;  %v2591_v50 = vld [vmem:[%s2776_s11 + $0xa4] ss:$20 sps:$4 sm:$0xff]   ;;  %v2595_v51 = vld [vmem:[%s2776_s11 + $0xc] ss:$20 sps:$4 sm:$0xff]   ;;  %v2593_v53 = vld [vmem:[%s2776_s11 + $0x8] ss:$20 sps:$4 sm:$0xff]  }
  0x19   : > { %2218 = vmatprep.subr.bf16.mxu0 %v2543_v10  ;;  %2497 = vmatprep.subr.bf16.mxu1 %v2543_v10  ;;  %v2597_v55 = vld [vmem:[%s2776_s11 + $0xcc] ss:$20 sps:$4 sm:$0xff]   ;;  %v2628_v56 = vld [vmem:[%s3228_s1 + $0x118] sm:$0xff]   ;;  %v2602_v59 = vld [vmem:[%s2776_s11 + $0x30] ss:$20 sps:$4 sm:$0xff]  }
  0x1a   : > { %v2601_v58 = vld [vmem:[%s2776_s11 + $0xc8] ss:$20 sps:$4 sm:$0xff]   ;;  %v2607_v62 = vld [vmem:[%s2776_s11 + $0xf0] ss:$20 sps:$4 sm:$0xff]   ;;  %v2608_v63 = vld [vmem:[%s2776_s11 + $0x58] ss:$20 sps:$4 sm:$0xff]  }
  0x1b   : > { %v2603_v60 = vld [vmem:[%s2776_s11 + $0xf4] ss:$20 sps:$4 sm:$0xff]   ;;  %v2605_v61 = vld [vmem:[%s2776_s11 + $0x5c] ss:$20 sps:$4 sm:$0xff]   ;;  %v2612_v1 = vld [vmem:[%s2776_s11 + $0x84] ss:$20 sps:$4 sm:$0xff]  }
  0x1c   : > { %2219 = vmatpush3.bf16.msra.mxu0 %v2544_v13  ;;  %2505 = vmatpush3.bf16.msra.mxu1 %v2544_v13  ;;  %v2610_v0 = vld [vmem:[%s2776_s11 + $0x11c] ss:$20 sps:$4 sm:$0xff]   ;;  %v2614_v2 = vld [vmem:[%s2776_s11 + $0x118] ss:$20 sps:$4 sm:$0xff]   ;;  %v2615_v3 = vld [vmem:[%s2776_s11 + $0x80] ss:$20 sps:$4 sm:$0xff]  }
  0x1d   : > { %2220 = vmatprep.subr.bf16.mxu0 %v2545_v14  ;;  %2498 = vmatprep.subr.bf16.mxu1 %v2545_v14  ;;  %v2616_v4 = vld [vmem:[%s2776_s11 + $0x144] ss:$20 sps:$4 sm:$0xff]   ;;  %v2618_v5 = vld [vmem:[%s2776_s11 + $0xac] ss:$20 sps:$4 sm:$0xff]   ;;  %v2621_v7 = vld [vmem:[%s2776_s11 + $0xa8] ss:$20 sps:$4 sm:$0xff]  }
  0x1e   : > { %v2620_v6 = vld [vmem:[%s2776_s11 + $0x140] ss:$20 sps:$4 sm:$0xff]   ;;  %v2626_v10 = vld [vmem:[%s2776_s11 + $0x168] ss:$20 sps:$4 sm:$0xff]   ;;  %v2627_v11 = vld [vmem:[%s2776_s11 + $0xd0] ss:$20 sps:$4 sm:$0xff]  }
  0x1f   : > { %v2622_v8 = vld [vmem:[%s2776_s11 + $0x16c] ss:$20 sps:$4 sm:$0xff]   ;;  %v2624_v9 = vld [vmem:[%s2776_s11 + $0xd4] ss:$20 sps:$4 sm:$0xff]   ;;  %v2631_v13 = vld [vmem:[%s2776_s11 + $0xfc] ss:$20 sps:$4 sm:$0xff]  }
  0x20   : > { %2221 = vmatpush3.bf16.msra.mxu0 %v2546_v15  ;;  %2506 = vmatpush3.bf16.msra.mxu1 %v2546_v15  ;;  %v2629_v12 = vld [vmem:[%s2776_s11 + $0x194] ss:$20 sps:$4 sm:$0xff]   ;;  %v2633_v14 = vld [vmem:[%s2776_s11 + $0x190] ss:$20 sps:$4 sm:$0xff]   ;;  %v2634_v15 = vld [vmem:[%s2776_s11 + $0xf8] ss:$20 sps:$4 sm:$0xff]  }
  0x21   : > { %2222 = vmatprep.subr.bf16.mxu0 %v2547_v16  ;;  %2499 = vmatprep.subr.bf16.mxu1 %v2547_v16  ;;  %v2635_v16 = vld [vmem:[%s2776_s11 + $0x1bc] ss:$20 sps:$4 sm:$0xff]  }
  0x24   : > { %2223 = vmatpush3.bf16.msra.mxu0 %v2548_v17  ;;  %2507 = vmatpush3.bf16.msra.mxu1 %v2548_v17  ;;  %v2637_v17 = vld [vmem:[%s2776_s11 + $0x124] ss:$20 sps:$4 sm:$0xff]  }
  0x25   : > { %2320 = vmatprep.subr.bf16.mxu1 %v2555_v18  ;;  %2452 = vmatprep.subr.bf16.mxu0 %v2558_v19  ;;  %v2639_v18 = vld [vmem:[%s2776_s11 + $0x1b8] ss:$20 sps:$4 sm:$0xff]  }
  0x27   : > { %1171 = vmatmul.mubr.bf16.vlgmr.msra.gmra.mrb[0].mxu0 %v2549_v20  ;;  %1267 = vmatmul.mubr.bf16.vlgmr.msra.gmra.mrb[0].mxu1 %v2552_v21  ;;  %v2641_v20 = vld [vmem:[%s2776_s11 + $0x14c] ss:$20 sps:$4 sm:$0xff]   ;;  %v2643_v21 = vld [vmem:[%s2776_s11 + $0x10] ss:$20 sps:$4 sm:$0xff]  }
  0x28   : > { %2321 = vmatpush3.bf16.msra.mxu1 %v2556_v22  ;;  %2453 = vmatpush3.bf16.msra.mxu0 %v2558_v19  ;;  %v2640_v19 = vld [vmem:[%s2776_s11 + $0x120] ss:$20 sps:$4 sm:$0xff]   ;;  %v2644_v22 = vld [vmem:[%s2776_s11 + $0x148] ss:$20 sps:$4 sm:$0xff]  }
  0x29   : > { %2322 = vmatprep.subr.bf16.mxu1 %v2557_v23  ;;  %1178 = vmatprep.mubr.bf16.mxu0 %v2560_v24  ;;  %v2645_v23 = vld [vmem:[%s2776_s11 + $0x38] ss:$20 sps:$4 sm:$0xff]   ;;  %v2646_v24 = vld [vmem:[%s2776_s11 + $0x174] ss:$20 sps:$4 sm:$0xff]  }
  0x2a   : > { %1274 = vmatprep.mubr.bf16.mxu1 %v2562_v25  ;;  %2454 = vmatprep.subr.bf16.mxu0 %v2589_v35  ;;  %v2648_v25 = vld [vmem:[%s2776_s11 + $0x60] ss:$20 sps:$4 sm:$0xff]  }
  0x2c   : > { %2323 = vmatpush3.bf16.msra.mxu1 %v2559_v26  ;;  %2455 = vmatpush3.bf16.msra.mxu0 %v2589_v35  ;;  %v2649_v26 = vld [vmem:[%s2776_s11 + $0x170] ss:$20 sps:$4 sm:$0xff]   ;;  %v2660_v35 = vld [vmem:[%s2776_s11 + $0x128] ss:$20 sps:$4 sm:$0xff]  }
  0x2d   : > { %2324 = vmatprep.subr.bf16.mxu1 %v2566_v28  ;;  %2456 = vmatprep.subr.bf16.mxu0 %v2609_v47  ;;  %v2651_v28 = vld [vmem:[%s2776_s11 + $0x19c] ss:$20 sps:$4 sm:$0xff]  }
  0x2f   : > { %1179 = vmatmul.mubr.bf16.gmra.mrb[4].mxu0 %v2564_v27  ;;  %1275 = vmatmul.mubr.bf16.gmra.mrb[4].mxu1 %v2565_v29  ;;  %v2650_v27 = vld [vmem:[%s2776_s11 + $0x88] ss:$20 sps:$4 sm:$0xff]   ;;  %v2653_v29 = vld [vmem:[%s2776_s11 + $0xb0] ss:$20 sps:$4 sm:$0xff]  }
  0x30   : > { %2325 = vmatpush3.bf16.msra.mxu1 %v2567_v30  ;;  %1186 = vmatprep.mubr.bf16.mxu0 %v2570_v32  ;;  %v2654_v30 = vld [vmem:[%s2776_s11 + $0x198] ss:$20 sps:$4 sm:$0xff]  }
  0x31   : > { %2326 = vmatprep.subr.bf16.mxu1 %v2568_v31  ;;  %1282 = vmatprep.mubr.bf16.mxu1 %v2572_v33  ;;  %v2655_v31 = vld [vmem:[%s2776_s11 + $0xd8] ss:$20 sps:$4 sm:$0xff]   ;;  %v2658_v33 = vld [vmem:[%s2776_s11 + $0x100] ss:$20 sps:$4 sm:$0xff]  }
  0x32   : > { %2457 = vmatpush3.bf16.msra.mxu0 %v2609_v47  ;;  %v2656_v32 = vld [vmem:[%s2776_s11 + $0x1c4] ss:$20 sps:$4 sm:$0xff]  }
  0x33   : > { %2458 = vmatprep.subr.bf16.mxu0 %v2628_v56  ;;  %v2675_v47 = vld [vmem:[%s2776_s11 + $0x218] ss:$20 sps:$4 sm:$0xff]  }
  0x34   : > { %2327 = vmatpush3.bf16.msra.mxu1 %v2569_v34  ;;  %v2659_v34 = vld [vmem:[%s2776_s11 + $0x1c0] ss:$20 sps:$4 sm:$0xff]  }
  0x35   : > { %2328 = vmatprep.subr.bf16.mxu1 %v2576_v37  ;;  %v2663_v37 = vld [vmem:[%s2776_s11 + $0x150] ss:$20 sps:$4 sm:$0xff]  }
  0x36   : > { %2459 = vmatpush3.bf16.msra.mxu0 %v2628_v56 }
  0x37   : > { %1187 = vmatmul.mubr.bf16.gmra.mrb[8].mxu0 %v2574_v36  ;;  %1283 = vmatmul.mubr.bf16.gmra.mrb[8].mxu1 %v2575_v38  ;;  %v2661_v36 = vld [vmem:[%s2776_s11 + $0x1ec] ss:$20 sps:$4 sm:$0xff]   ;;  %v2664_v38 = vld [vmem:[%s2776_s11 + $0x1e8] ss:$20 sps:$4 sm:$0xff]  }
  0x38   : > { %2329 = vmatpush3.bf16.msra.mxu1 %v2577_v39  ;;  %1194 = vmatprep.mubr.bf16.mxu0 %v2580_v41  ;;  %v2665_v39 = vld [vmem:[%s2776_s11 + $0x178] ss:$20 sps:$4 sm:$0xff]   ;;  %v2668_v41 = vld [vmem:[%s2776_s11 + $0x1a0] ss:$20 sps:$4 sm:$0xff]  }
  0x39   : > { %2330 = vmatprep.subr.bf16.mxu1 %v2578_v40  ;;  %1290 = vmatprep.mubr.bf16.mxu1 %v2582_v42  ;;  %v2666_v40 = vld [vmem:[%s2776_s11 + $0x214] ss:$20 sps:$4 sm:$0xff]   ;;  %v2669_v42 = vld [vmem:[%s2776_s11 + $0x210] ss:$20 sps:$4 sm:$0xff]  }
  0x3c   : > { %2331 = vmatpush3.bf16.msra.mxu1 %v2579_v43  ;;  %v2670_v43 = vld [vmem:[%s2776_s11 + $0x1c8] ss:$20 sps:$4 sm:$0xff]  }
  0x3d   : > { %2332 = vmatprep.subr.bf16.mxu1 %v2586_v46  ;;  %v2674_v46 = vld [vmem:[%s2776_s11 + $0x238] ss:$20 sps:$4 sm:$0xff]  }
  0x3f   : > { %1195 = vmatmul.mubr.bf16.gmra.mrb[12].mxu0 %v2584_v44  ;;  %1291 = vmatmul.mubr.bf16.gmra.mrb[12].mxu1 %v2585_v45  ;;  %v2671_v44 = vld [vmem:[%s2776_s11 + $0x23c] ss:$20 sps:$4 sm:$0xff]  }
  0x40   : > { %2333 = vmatpush3.bf16.msra.mxu1 %v2587_v48  ;;  %1202 = vmatprep.mubr.bf16.mxu0 %v2591_v50  ;;  %v2673_v45 = vld [vmem:[%s2776_s11 + $0x1f0] ss:$20 sps:$4 sm:$0xff]   ;;  %v2679_v50 = vld [vmem:[%s2776_s11 + $0x260] ss:$20 sps:$4 sm:$0xff]  }
  0x41   : > { %2334 = vmatprep.subr.bf16.mxu1 %v2588_v49  ;;  %1331 = vmatprep.mubr.bf16.mxu1 %v2595_v51  ;;  %v2676_v48 = vld [vmem:[%s2776_s11 + $0x264] ss:$20 sps:$4 sm:$0xff]   ;;  %v2678_v49 = vld [vmem:[%s2776_s11 + $0x240] ss:$20 sps:$4 sm:$0xff]   ;;  %v2680_v51 = vld [vmem:[%s2776_s11 + $0x268] ss:$20 sps:$4 sm:$0xff]  }
  0x42   : > { %s2008_s11 = sshll.u32 %s3236_s18, 2 }
  0x43   : > { %s3080_s29 = scalar_lea.vmem %s3230_s3, %s2008_s11 }
  0x44   : > { %2335 = vmatpush3.bf16.msra.mxu1 %v2590_v52  ;;  %v2009_v52 = vld [vmem:[%s3229_s2] ss:$0 sm:$0xff] }
  0x45   : > { %243 = vst.msk [vmem:[#allocation2 + $0x10] sm:$0xff] %vm240_vm0, %v2009_v52  ;;  %241 = vst.msk [vmem:[#allocation2] sm:$0xff] %vm240_vm0, %v2009_v52 }
  0x46   : > { %242 = vst.msk [vmem:[#allocation2 + $0x8] sm:$0xff] %vm240_vm0, %v2009_v52  ;;  %244 = vst.msk [vmem:[#allocation2 + $0x18] sm:$0xff] %vm240_vm0, %v2009_v52 }
  0x47   : > { %1203 = vmatmul.mubr.bf16.gmra.mrb[16].mxu0 %v2596_v54  ;;  %1332 = vmatmul.mubr.bf16.vlgmr.msra.gmra.mrb[16].mxu1 %v2593_v53  ;;  %245 = vst.msk [vmem:[#allocation2 + $0x20] sm:$0xff] %vm240_vm0, %v2009_v52  ;;  %246 = vst.msk [vmem:[#allocation2 + $0x28] sm:$0xff] %vm240_vm0, %v2009_v52 }
  0x48   : > { %1210 = vmatprep.mubr.bf16.mxu0 %v2597_v55  ;;  %1339 = vmatprep.mubr.bf16.mxu1 %v2599_v57  ;;  %247 = vst.msk [vmem:[#allocation2 + $0x30] sm:$0xff] %vm240_vm0, %v2009_v52  ;;  %248 = vst.msk [vmem:[#allocation2 + $0x38] sm:$0xff] %vm240_vm0, %v2009_v52 }
  0x49   : > { %249 = vst.msk [vmem:[#allocation2 + $0x40] sm:$0xff] %vm240_vm0, %v2009_v52  ;;  %250 = vst.msk [vmem:[#allocation2 + $0x48] sm:$0xff] %vm240_vm0, %v2009_v52 }
  0x4a   : > { %251 = vst.msk [vmem:[#allocation2 + $0x50] sm:$0xff] %vm240_vm0, %v2009_v52  ;;  %252 = vst.msk [vmem:[#allocation2 + $0x58] sm:$0xff] %vm240_vm0, %v2009_v52 }
  0x4b   : > { %253 = vst.msk [vmem:[#allocation2 + $0x60] sm:$0xff] %vm240_vm0, %v2009_v52  ;;  %254 = vst.msk [vmem:[#allocation2 + $0x68] sm:$0xff] %vm240_vm0, %v2009_v52 }
  0x4c   : > { %255 = vst.msk [vmem:[#allocation2 + $0x70] sm:$0xff] %vm240_vm0, %v2009_v52  ;;  %256 = vst.msk [vmem:[#allocation2 + $0x78] sm:$0xff] %vm240_vm0, %v2009_v52 }
  0x4d   : > { %257 = vst.msk [vmem:[#allocation2 + $0x80] sm:$0xff] %vm240_vm0, %v2009_v52  ;;  %258 = vst.msk [vmem:[#allocation2 + $0x88] sm:$0xff] %vm240_vm0, %v2009_v52 }
  0x4e   : > { %259 = vst.msk [vmem:[#allocation2 + $0x90] sm:$0xff] %vm240_vm0, %v2009_v52  ;;  %260 = vst.msk [vmem:[#allocation2 + $0x98] sm:$0xff] %vm240_vm0, %v2009_v52 }
  0x4f   : > { %1211 = vmatmul.mubr.bf16.gmra.mrb[20].mxu0 %v2601_v58  ;;  %1340 = vmatmul.mubr.bf16.gmra.mrb[20].mxu1 %v2602_v59  ;;  %261 = vst.msk [vmem:[#allocation2 + $0xa0] sm:$0xff] %vm240_vm0, %v2009_v52  ;;  %262 = vst.msk [vmem:[#allocation2 + $0xa8] sm:$0xff] %vm240_vm0, %v2009_v52 }
  0x50   : > { %1218 = vmatprep.mubr.bf16.mxu0 %v2603_v60  ;;  %1347 = vmatprep.mubr.bf16.mxu1 %v2605_v61  ;;  %263 = vst.msk [vmem:[#allocation2 + $0xb0] sm:$0xff] %vm240_vm0, %v2009_v52  ;;  %264 = vst.msk [vmem:[#allocation2 + $0xb8] sm:$0xff] %vm240_vm0, %v2009_v52 }
  0x51   : > { %265 = vst.msk [vmem:[#allocation2 + $0xc0] sm:$0xff] %vm240_vm0, %v2009_v52  ;;  %266 = vst.msk [vmem:[#allocation2 + $0xc8] sm:$0xff] %vm240_vm0, %v2009_v52 }
  0x52   : > { %267 = vst.msk [vmem:[#allocation2 + $0xd0] sm:$0xff] %vm240_vm0, %v2009_v52  ;;  %268 = vst.msk [vmem:[#allocation2 + $0xd8] sm:$0xff] %vm240_vm0, %v2009_v52 }
  0x53   : > { %269 = vst.msk [vmem:[#allocation2 + $0xe0] sm:$0xff] %vm240_vm0, %v2009_v52  ;;  %270 = vst.msk [vmem:[#allocation2 + $0xe8] sm:$0xff] %vm240_vm0, %v2009_v52 }
  0x54   : > { %271 = vst.msk [vmem:[#allocation2 + $0xf0] sm:$0xff] %vm240_vm0, %v2009_v52  ;;  %272 = vst.msk [vmem:[#allocation2 + $0xf8] sm:$0xff] %vm240_vm0, %v2009_v52 }
  0x57   : > { %1219 = vmatmul.mubr.bf16.gmra.mrb[24].mxu0 %v2607_v62  ;;  %1348 = vmatmul.mubr.bf16.gmra.mrb[24].mxu1 %v2608_v63 }
  0x58   : > { %1226 = vmatprep.mubr.bf16.mxu0 %v2610_v0  ;;  %1355 = vmatprep.mubr.bf16.mxu1 %v2612_v1 }
  0x5f   : > { %1227 = vmatmul.mubr.bf16.gmra.mrb[28].mxu0 %v2614_v2  ;;  %1356 = vmatmul.mubr.bf16.gmra.mrb[28].mxu1 %v2615_v3 }
  0x60   : > { %1234 = vmatprep.mubr.bf16.mxu0 %v2616_v4  ;;  %1363 = vmatprep.mubr.bf16.mxu1 %v2618_v5 }
  0x67   : > { %1235 = vmatmul.mubr.bf16.gmra.mrb[32].mxu0 %v2620_v6  ;;  %1364 = vmatmul.mubr.bf16.gmra.mrb[32].mxu1 %v2621_v7 }
  0x68   : > { %1242 = vmatprep.mubr.bf16.mxu0 %v2622_v8  ;;  %1371 = vmatprep.mubr.bf16.mxu1 %v2624_v9 }
  0x6f   : > { %1243 = vmatmul.mubr.bf16.gmra.mrb[36].mxu0 %v2626_v10  ;;  %1372 = vmatmul.mubr.bf16.gmra.mrb[36].mxu1 %v2627_v11 }
  0x70   : > { %1250 = vmatprep.mubr.bf16.mxu0 %v2629_v12  ;;  %1379 = vmatprep.mubr.bf16.mxu1 %v2631_v13 }
  0x77   : > { %1251 = vmatmul.mubr.bf16.gmra.mrb[40].mxu0 %v2633_v14  ;;  %1380 = vmatmul.mubr.bf16.gmra.mrb[40].mxu1 %v2634_v15 }
  0x78   : > { %1258 = vmatprep.mubr.bf16.mxu0 %v2635_v16  ;;  %1387 = vmatprep.mubr.bf16.mxu1 %v2637_v17 }
  0x7f   : > { %1259 = vmatmul.mubr.bf16.gmra.mrb[44].mxu0 %v2639_v18  ;;  %1388 = vmatmul.mubr.bf16.gmra.mrb[44].mxu1 %v2640_v19 }
  0x80   : > { %1395 = vmatprep.mubr.bf16.mxu1 %v2641_v20  ;;  %2460 = vmatprep.mubr.msk.bf16.mxu0 %vm240_vm0, %v2643_v21 }
  0x87   : > { %1396 = vmatmul.mubr.bf16.gmra.mrb[48].mxu1 %v2644_v22  ;;  %2461 = vmatmul.mubr.msk.bf16.vlgmr.msra.gmra.mrb[48].mxu0 %vm240_vm0, %v2645_v23 }
  0x88   : > { %1403 = vmatprep.mubr.bf16.mxu1 %v2646_v24  ;;  %2464 = vmatprep.mubr.msk.bf16.mxu0 %vm240_vm0, %v2648_v25 }
  0x8f   : > { %1404 = vmatmul.mubr.bf16.gmra.mrb[52].mxu1 %v2649_v26  ;;  %2465 = vmatmul.mubr.msk.bf16.gmra.mrb[52].mxu0 %vm240_vm0, %v2650_v27 }
  0x90   : > { %1411 = vmatprep.mubr.bf16.mxu1 %v2651_v28  ;;  %2468 = vmatprep.mubr.msk.bf16.mxu0 %vm240_vm0, %v2653_v29 }
  0x97   : > { %1412 = vmatmul.mubr.bf16.gmra.mrb[56].mxu1 %v2654_v30  ;;  %2469 = vmatmul.mubr.msk.bf16.gmra.mrb[56].mxu0 %vm240_vm0, %v2655_v31 }
  0x98   : > { %1419 = vmatprep.mubr.bf16.mxu1 %v2656_v32  ;;  %2472 = vmatprep.mubr.msk.bf16.mxu0 %vm240_vm0, %v2658_v33 }
  0x9f   : > { %1420 = vmatmul.mubr.bf16.gmra.mrb[60].mxu1 %v2659_v34  ;;  %2473 = vmatmul.mubr.msk.bf16.gmra.mrb[60].mxu0 %vm240_vm0, %v2660_v35 }
  0xa0   : > { %1427 = vmatprep.mubr.bf16.mxu1 %v2661_v36  ;;  %2476 = vmatprep.mubr.msk.bf16.mxu0 %vm240_vm0, %v2663_v37 }
  0xa7   : > { %1428 = vmatmul.mubr.bf16.gmra.mrb[64].mxu1 %v2664_v38  ;;  %2477 = vmatmul.mubr.msk.bf16.gmra.mrb[64].mxu0 %vm240_vm0, %v2665_v39 }
  0xa8   : > { %1435 = vmatprep.mubr.bf16.mxu1 %v2666_v40  ;;  %2480 = vmatprep.mubr.msk.bf16.mxu0 %vm240_vm0, %v2668_v41 }
  0xaf   : > { %1436 = vmatmul.mubr.bf16.gmra.mrb[68].mxu1 %v2669_v42  ;;  %2481 = vmatmul.mubr.msk.bf16.gmra.mrb[68].mxu0 %vm240_vm0, %v2670_v43 }
  0xb0   : > { %1443 = vmatprep.mubr.bf16.mxu1 %v2671_v44  ;;  %2484 = vmatprep.mubr.msk.bf16.mxu0 %vm240_vm0, %v2673_v45 }
  0xb7   : > { %1444 = vmatmul.mubr.bf16.gmra.mrb[72].mxu1 %v2674_v46  ;;  %2485 = vmatmul.mubr.msk.bf16.gmra.mrb[72].mxu0 %vm240_vm0, %v2675_v47 }
  0xb8   : > { %1451 = vmatprep.mubr.bf16.mxu1 %v2676_v48  ;;  %2488 = vmatprep.mubr.msk.bf16.mxu0 %vm240_vm0, %v2678_v49 }
  0xbf   : > { %1452 = vmatmul.mubr.bf16.gmra.mrb[76].mxu1 %v2679_v50  ;;  %2489 = vmatmul.mubr.msk.bf16.gmra.mrb[76].mxu0 %vm240_vm0, %v2680_v51 }
  0xfa   : > { %v2296_v53 = vpop.f32.mrb[0].mxu1  ;;  %v2224_v54 = vpop.f32.mrb[0].mxu0 }
  0xfb   : > { %v2297_v55 = vpop.f32.mrb[1].mxu1  ;;  %v2225_v56 = vpop.f32.mrb[1].mxu0 }
  0xfc   : > { %v2990_v57 = vadd.f32 %v2297_v55, %v2296_v53  ;;  %v2299_v58 = vpop.f32.mrb[2].mxu1  ;;  %v2226_v59 = vadd.f32 %v2225_v56, %v2224_v54  ;;  %v2227_v60 = vpop.f32.mrb[2].mxu0 }
  0xfd   : > { %v2300_v61 = vpop.f32.mrb[3].mxu1  ;;  %v2228_v62 = vpop.f32.mrb[3].mxu0 }
  0xfe   : > { %v2992_v63 = vadd.f32 %v2300_v61, %v2299_v58  ;;  %v2229_v0 = vadd.f32 %v2228_v62, %v2227_v60 }
 0x102   : > { %v2302_v1 = vpop.f32.mrb[4].mxu1  ;;  %v2230_v2 = vpop.f32.mrb[4].mxu0 }
 0x103   : > { %v2303_v3 = vpop.f32.mrb[5].mxu1  ;;  %v2231_v4 = vpop.f32.mrb[5].mxu0 }
 0x104   : > { %v2994_v5 = vadd.f32 %v2303_v3, %v2302_v1  ;;  %v2305_v6 = vpop.f32.mrb[6].mxu1  ;;  %v2232_v7 = vadd.f32 %v2231_v4, %v2230_v2  ;;  %v2233_v8 = vpop.f32.mrb[6].mxu0 }
 0x105   : > { %v2306_v9 = vpop.f32.mrb[7].mxu1  ;;  %v2234_v10 = vpop.f32.mrb[7].mxu0 }
 0x106   : > { %v2996_v11 = vadd.f32 %v2306_v9, %v2305_v6  ;;  %v2235_v12 = vadd.f32 %v2234_v10, %v2233_v8 }
 0x10a   : > { %v2308_v13 = vpop.f32.mrb[8].mxu1  ;;  %v2236_v14 = vpop.f32.mrb[8].mxu0 }
 0x10b   : > { %v2309_v15 = vpop.f32.mrb[9].mxu1  ;;  %v2237_v16 = vpop.f32.mrb[9].mxu0 }
 0x10c   : > { %v2998_v17 = vadd.f32 %v2309_v15, %v2308_v13  ;;  %v2311_v18 = vpop.f32.mrb[10].mxu1  ;;  %v2238_v19 = vadd.f32 %v2237_v16, %v2236_v14  ;;  %v2239_v20 = vpop.f32.mrb[10].mxu0 }
 0x10d   : > { %v2312_v21 = vpop.f32.mrb[11].mxu1  ;;  %v2240_v22 = vpop.f32.mrb[11].mxu0 }
 0x10e   : > { %v3000_v23 = vadd.f32 %v2312_v21, %v2311_v18  ;;  %v2241_v24 = vadd.f32 %v2240_v22, %v2239_v20 }
 0x112   : > { %v2314_v25 = vpop.f32.mrb[12].mxu1  ;;  %v2242_v26 = vpop.f32.mrb[12].mxu0 }
 0x113   : > { %v2315_v27 = vpop.f32.mrb[13].mxu1  ;;  %v2243_v28 = vpop.f32.mrb[13].mxu0 }
 0x114   : > { %v3002_v29 = vadd.f32 %v2315_v27, %v2314_v25  ;;  %v2317_v30 = vpop.f32.mrb[14].mxu1  ;;  %v2244_v31 = vadd.f32 %v2243_v28, %v2242_v26  ;;  %v2245_v32 = vpop.f32.mrb[14].mxu0 }
 0x115   : > { %v2318_v33 = vpop.f32.mrb[15].mxu1  ;;  %v2246_v34 = vpop.f32.mrb[15].mxu0 }
 0x116   : > { %v3004_v35 = vadd.f32 %v2318_v33, %v2317_v30  ;;  %v2247_v36 = vadd.f32 %v2246_v34, %v2245_v32 }
 0x11a   : > { %v2336_v37 = vpop.f32.mrb[16].mxu1  ;;  %v2248_v38 = vpop.f32.mrb[16].mxu0 }
 0x11b   : > { %v2337_v39 = vpop.f32.mrb[17].mxu1  ;;  %v2249_v40 = vpop.f32.mrb[17].mxu0 }
 0x11c   : > { %v2338_v41 = vadd.f32 %v2337_v39, %v2336_v37  ;;  %v2339_v42 = vpop.f32.mrb[18].mxu1  ;;  %v2250_v43 = vadd.f32 %v2249_v40, %v2248_v38  ;;  %v2251_v44 = vpop.f32.mrb[18].mxu0 }
 0x11d   : > { %v2340_v45 = vpop.f32.mrb[19].mxu1  ;;  %v2252_v46 = vpop.f32.mrb[19].mxu0 }
 0x11e   : > { %v2341_v47 = vadd.f32 %v2340_v45, %v2339_v42  ;;  %v2253_v48 = vadd.f32 %v2252_v46, %v2251_v44  ;;  %v3006_v49 = vadd.f32 %v2338_v41, %v2226_v59 }
 0x120   : > { %v3008_v50 = vadd.f32 %v2341_v47, %v2229_v0 }
 0x122   : > { %v2342_v51 = vpop.f32.mrb[20].mxu1  ;;  %v2254_v52 = vpop.f32.mrb[20].mxu0 }
 0x123   : > { %v2343_v53 = vpop.f32.mrb[21].mxu1  ;;  %v2255_v54 = vpop.f32.mrb[21].mxu0 }
 0x124   : > { %v2344_v55 = vadd.f32 %v2343_v53, %v2342_v51  ;;  %v2345_v56 = vpop.f32.mrb[22].mxu1  ;;  %v2256_v58 = vadd.f32 %v2255_v54, %v2254_v52  ;;  %v2257_v60 = vpop.f32.mrb[22].mxu0 }
 0x125   : > { %v2346_v61 = vpop.f32.mrb[23].mxu1  ;;  %v2258_v62 = vpop.f32.mrb[23].mxu0 }
 0x126   : > { %v2347_v1 = vadd.f32 %v2346_v61, %v2345_v56  ;;  %v2259_v2 = vadd.f32 %v2258_v62, %v2257_v60  ;;  %v3010_v3 = vadd.f32 %v2344_v55, %v2232_v7 }
 0x128   : > { %v3012_v4 = vadd.f32 %v2347_v1, %v2235_v12 }
 0x12a   : > { %v2348_v59 = vpop.f32.mrb[24].mxu1  ;;  %v2260_v6 = vpop.f32.mrb[24].mxu0 }
 0x12b   : > { %v2349_v0 = vpop.f32.mrb[25].mxu1  ;;  %v2261_v8 = vpop.f32.mrb[25].mxu0 }
 0x12c   : > { %v2350_v9 = vadd.f32 %v2349_v0, %v2348_v59  ;;  %v2351_v10 = vpop.f32.mrb[26].mxu1  ;;  %v2262_v13 = vadd.f32 %v2261_v8, %v2260_v6  ;;  %v2263_v14 = vpop.f32.mrb[26].mxu0 }
 0x12d   : > { %v2352_v15 = vpop.f32.mrb[27].mxu1  ;;  %v2264_v16 = vpop.f32.mrb[27].mxu0 }
 0x12e   : > { %v2353_v18 = vadd.f32 %v2352_v15, %v2351_v10  ;;  %v2265_v20 = vadd.f32 %v2264_v16, %v2263_v14  ;;  %v3014_v21 = vadd.f32 %v2350_v9, %v2238_v19 }
 0x130   : > { %v3016_v22 = vadd.f32 %v2353_v18, %v2241_v24 }
 0x132   : > { %v2354_v7 = vpop.f32.mrb[28].mxu1  ;;  %v2266_v25 = vpop.f32.mrb[28].mxu0 }
 0x133   : > { %v2355_v12 = vpop.f32.mrb[29].mxu1  ;;  %v2267_v26 = vpop.f32.mrb[29].mxu0 }
 0x134   : > { %v2356_v27 = vadd.f32 %v2355_v12, %v2354_v7  ;;  %v2357_v28 = vpop.f32.mrb[30].mxu1  ;;  %v2268_v30 = vadd.f32 %v2267_v26, %v2266_v25  ;;  %v2269_v32 = vpop.f32.mrb[30].mxu0 }
 0x135   : > { %v2358_v33 = vpop.f32.mrb[31].mxu1  ;;  %v2270_v34 = vpop.f32.mrb[31].mxu0 }
 0x136   : > { %v2359_v37 = vadd.f32 %v2358_v33, %v2357_v28  ;;  %v2271_v38 = vadd.f32 %v2270_v34, %v2269_v32  ;;  %v3018_v39 = vadd.f32 %v2356_v27, %v2244_v31 }
 0x138   : > { %v3020_v40 = vadd.f32 %v2359_v37, %v2247_v36 }
 0x13a   : > { %v2360_v19 = vpop.f32.mrb[32].mxu1  ;;  %v2272_v41 = vpop.f32.mrb[32].mxu0 }
 0x13b   : > { %v2361_v24 = vpop.f32.mrb[33].mxu1  ;;  %v2273_v42 = vpop.f32.mrb[33].mxu0 }
 0x13c   : > { %v2362_v44 = vadd.f32 %v2361_v24, %v2360_v19  ;;  %v2363_v45 = vpop.f32.mrb[34].mxu1  ;;  %v3022_v46 = vadd.f32 %v2273_v42, %v2272_v41  ;;  %v2275_v47 = vpop.f32.mrb[34].mxu0 }
 0x13d   : > { %v2364_v51 = vpop.f32.mrb[35].mxu1  ;;  %v2276_v52 = vpop.f32.mrb[35].mxu0 }
 0x13e   : > { %v2365_v53 = vadd.f32 %v2364_v51, %v2363_v45  ;;  %v3024_v54 = vadd.f32 %v2276_v52, %v2275_v47  ;;  %v3026_v55 = vadd.f32 %v2362_v44, %v2250_v43 }
 0x140   : > { %v3028_v31 = vadd.f32 %v2365_v53, %v2253_v48 }
 0x142   : > { %v2366_v36 = vpop.f32.mrb[36].mxu1  ;;  %v2278_v56 = vpop.f32.mrb[36].mxu0 }
 0x143   : > { %v2367_v60 = vpop.f32.mrb[37].mxu1  ;;  %v2279_v61 = vpop.f32.mrb[37].mxu0 }
 0x144   : > { %v2368_v62 = vadd.f32 %v2367_v60, %v2366_v36  ;;  %v2369_v1 = vpop.f32.mrb[38].mxu1  ;;  %v3030_v59 = vadd.f32 %v2279_v61, %v2278_v56  ;;  %v2281_v6 = vpop.f32.mrb[38].mxu0  ;;  %v275_v56 = vld [vmem:[#allocation2 + $0x10] sm:$0xff] }
 0x145   : > { %v2370_v0 = vpop.f32.mrb[39].mxu1  ;;  %v2282_v8 = vpop.f32.mrb[39].mxu0 }
 0x146   : > { %v2371_v9 = vadd.f32 %v2370_v0, %v2369_v1  ;;  %v3032_v10 = vadd.f32 %v2282_v8, %v2281_v6  ;;  %v3034_v14 = vadd.f32 %v2368_v62, %v2256_v58  ;;  %v273_v1 = vld [vmem:[#allocation2] sm:$0xff] }
 0x148   : > { %v3036_v43 = vadd.f32 %v2371_v9, %v2259_v2 }
 0x14a   : > { %v2372_v48 = vpop.f32.mrb[40].mxu1  ;;  %v2284_v15 = vpop.f32.mrb[40].mxu0 }
 0x14b   : > { %v2373_v16 = vpop.f32.mrb[41].mxu1  ;;  %v2285_v18 = vpop.f32.mrb[41].mxu0 }
 0x14c   : > { %v2374_v7 = vadd.f32 %v2373_v16, %v2372_v48  ;;  %v2375_v25 = vpop.f32.mrb[42].mxu1  ;;  %v3038_v12 = vadd.f32 %v2285_v18, %v2284_v15  ;;  %v2287_v26 = vpop.f32.mrb[42].mxu0  ;;  %v276_v48 = vld [vmem:[#allocation2 + $0x18] sm:$0xff] }
 0x14d   : > { %v2376_v27 = vpop.f32.mrb[43].mxu1  ;;  %v2288_v28 = vpop.f32.mrb[43].mxu0 }
 0x14e   : > { %v2377_v32 = vadd.f32 %v2376_v27, %v2375_v25  ;;  %v3040_v33 = vadd.f32 %v2288_v28, %v2287_v26  ;;  %v3042_v34 = vadd.f32 %v2374_v7, %v2262_v13 }
 0x150   : > { %v3044_v58 = vadd.f32 %v2377_v32, %v2265_v20 }
 0x152   : > { %v2378_v2 = vpop.f32.mrb[44].mxu1  ;;  %v2290_v37 = vpop.f32.mrb[44].mxu0 }
 0x153   : > { %v2379_v19 = vpop.f32.mrb[45].mxu1  ;;  %v2291_v41 = vpop.f32.mrb[45].mxu0 }
 0x154   : > { %v2380_v24 = vadd.f32 %v2379_v19, %v2378_v2  ;;  %v2381_v42 = vpop.f32.mrb[46].mxu1  ;;  %v3046_v44 = vadd.f32 %v2291_v41, %v2290_v37  ;;  %v2293_v45 = vpop.f32.mrb[46].mxu0  ;;  %v279_v2 = vld [vmem:[#allocation2 + $0x30] sm:$0xff]  ;;  %v277_v19 = vld [vmem:[#allocation2 + $0x20] sm:$0xff] }
 0x155   : > { %v2382_v47 = vpop.f32.mrb[47].mxu1  ;;  %v2294_v51 = vpop.f32.mrb[47].mxu0 }
 0x156   : > { %v2383_v52 = vadd.f32 %v2382_v47, %v2381_v42  ;;  %v3048_v53 = vadd.f32 %v2294_v51, %v2293_v45  ;;  %v3050_v36 = vadd.f32 %v2380_v24, %v2268_v30  ;;  %v280_v47 = vld [vmem:[#allocation2 + $0x38] sm:$0xff] }
 0x158   : > { %v3052_v13 = vadd.f32 %v2383_v52, %v2271_v38  ;;  %v274_v38 = vld [vmem:[#allocation2 + $0x8] sm:$0xff] }
 0x15a   : > { %v2384_v20 = vpop.f32.mrb[48].mxu1  ;;  %v2462_v60 = vpop.f32.mrb[48].mxu0 }
 0x15b   : > { %v1503_v61 = vadd.f32 %v2462_v60, %v3010_v3  ;;  %v2385_v62 = vpop.f32.mrb[49].mxu1  ;;  %v1494_v6 = vpop.f32.mrb[49].mxu0 }
 0x15c   : > { %v2386_v0 = vadd.f32 %v2385_v62, %v2384_v20  ;;  %v1495_v8 = vadd.f32 %v1494_v6, %v3006_v49  ;;  %v2387_v9 = vpop.f32.mrb[50].mxu1  ;;  %v2463_v15 = vpop.f32.mrb[50].mxu0 }
 0x15d   : > { %v1623_v16 = vadd.f32 %v1503_v61, %v275_v56  ;;  %v1506_v30 = vadd.f32 %v2463_v15, %v3012_v4  ;;  %v2388_v18 = vpop.f32.mrb[51].mxu1  ;;  %v1497_v7 = vpop.f32.mrb[51].mxu0  ;;  %v278_v56 = vld [vmem:[#allocation2 + $0x28] sm:$0xff] }
 0x15e   : > { %v1621_v25 = vadd.f32 %v1495_v8, %v273_v1  ;;  %v2389_v26 = vadd.f32 %v2388_v18, %v2387_v9  ;;  %v1498_v27 = vadd.f32 %v1497_v7, %v3008_v50  ;;  %v3059_v3 = vadd.f32 %v2386_v0, %v3022_v46  ;;  %v283_v7 = vld [vmem:[#allocation2 + $0x50] sm:$0xff] }
 0x15f   : > { %1655 = vst.msk [vmem:[#allocation2 + $0x10] sm:$0xff] %vm240_vm0, %v1623_v16  ;;  %v1624_v28 = vadd.f32 %v1506_v30, %v276_v48 }
 0x160   : > { %1653 = vst.msk [vmem:[#allocation2] sm:$0xff] %vm240_vm0, %v1621_v25  ;;  %v1622_v49 = vadd.f32 %v1498_v27, %v274_v38  ;;  %v3064_v32 = vadd.f32 %v2389_v26, %v3024_v54 }
 0x161   : > { %1656 = vst.msk [vmem:[#allocation2 + $0x18] sm:$0xff] %vm240_vm0, %v1624_v28  ;;  %v281_v28 = vld [vmem:[#allocation2 + $0x40] sm:$0xff] }
 0x162   : > { %1654 = vst.msk [vmem:[#allocation2 + $0x8] sm:$0xff] %vm240_vm0, %v1622_v49  ;;  %v2390_v4 = vpop.f32.mrb[52].mxu1  ;;  %v2466_v50 = vpop.f32.mrb[52].mxu0 }
 0x163   : > { %v1519_v46 = vadd.f32 %v2466_v50, %v3018_v39  ;;  %v2391_v37 = vpop.f32.mrb[53].mxu1  ;;  %v1510_v41 = vpop.f32.mrb[53].mxu0 }
 0x164   : > { %v2392_v24 = vadd.f32 %v2391_v37, %v2390_v4  ;;  %v1511_v42 = vadd.f32 %v1510_v41, %v3014_v21  ;;  %v2393_v45 = vpop.f32.mrb[54].mxu1  ;;  %v2467_v51 = vpop.f32.mrb[54].mxu0  ;;  %v284_v37 = vld [vmem:[#allocation2 + $0x58] sm:$0xff] }
 0x165   : > { %v1627_v54 = vadd.f32 %v1519_v46, %v279_v2  ;;  %v1522_v52 = vadd.f32 %v2467_v51, %v3020_v40  ;;  %v2394_v20 = vpop.f32.mrb[55].mxu1  ;;  %v1513_v60 = vpop.f32.mrb[55].mxu0 }
 0x166   : > { %v1690_v61 = vld [vmem:[#allocation2 + $0x10] sm:$0xff]  ;;  %v1625_v62 = vadd.f32 %v1511_v42, %v277_v19  ;;  %v2395_v1 = vadd.f32 %v2394_v20, %v2393_v45  ;;  %v1514_v39 = vadd.f32 %v1513_v60, %v3016_v22  ;;  %v3074_v6 = vadd.f32 %v2392_v24, %v3030_v59 }
 0x167   : > { %v1722_v0 = vmax.f32 %v1690_v61, 0.0  ;;  %v1688_v21 = vld [vmem:[#allocation2] sm:$0xff]  ;;  %1659 = vst.msk [vmem:[#allocation2 + $0x30] sm:$0xff] %vm240_vm0, %v1627_v54  ;;  %v1628_v8 = vadd.f32 %v1522_v52, %v280_v47 }
 0x168   : > { %v1720_v40 = vmax.f32 %v1688_v21, 0.0  ;;  %v1691_v9 = vld [vmem:[#allocation2 + $0x18] sm:$0xff]  ;;  %1657 = vst.msk [vmem:[#allocation2 + $0x20] sm:$0xff] %vm240_vm0, %v1625_v62  ;;  %v1626_v22 = vadd.f32 %v1514_v39, %v278_v56  ;;  %v3084_v59 = vadd.f32 %v2395_v1, %v3032_v10 }
 0x169   : > { %v2178_v48 = vpack.c.bf16 %v1722_v0, %v1722_v0  ;;  %v1723_v15 = vmax.f32 %v1691_v9, 0.0  ;;  %v1689_v16 = vld [vmem:[#allocation2 + $0x8] sm:$0xff]  ;;  %1660 = vst.msk [vmem:[#allocation2 + $0x38] sm:$0xff] %vm240_vm0, %v1628_v8 }
 0x16a   : > { %v2176_v30 = vpack.c.bf16 %v1720_v40, %v1720_v40  ;;  %v1721_v18 = vmax.f32 %v1689_v16, 0.0  ;;  %1658 = vst.msk [vmem:[#allocation2 + $0x28] sm:$0xff] %vm240_vm0, %v1626_v22  ;;  %v2396_v38 = vpop.f32.mrb[56].mxu1  ;;  %v2470_v25 = vpop.f32.mrb[56].mxu0  ;;  %v287_v40 = vld [vmem:[#allocation2 + $0x70] sm:$0xff] }
 0x16b   : > { %1883 = vst.msk [vmem:[%s3080_s29 + $0x8] sm:$0xf] %vm1880_vm1, %v2178_v48  ;;  %v2179_v26 = vpack.c.bf16 %v1723_v15, %v1723_v15  ;;  %v1535_v10 = vadd.f32 %v2470_v25, %v3034_v14  ;;  %v2397_v27 = vpop.f32.mrb[57].mxu1  ;;  %v1526_v49 = vpop.f32.mrb[57].mxu0  ;;  %v282_v14 = vld [vmem:[#allocation2 + $0x48] sm:$0xff]  ;;  %v285_v15 = vld [vmem:[#allocation2 + $0x60] sm:$0xff] }
 0x16c   : > { %1881 = vst.msk [vmem:[%s3080_s29] sm:$0xf] %vm1880_vm1, %v2176_v30  ;;  %v2177_v4 = vpack.c.bf16 %v1721_v18, %v1721_v18  ;;  %v2398_v2 = vadd.f32 %v2397_v27, %v2396_v38  ;;  %v1527_v50 = vadd.f32 %v1526_v49, %v3026_v55  ;;  %v2399_v46 = vpop.f32.mrb[58].mxu1  ;;  %v2471_v19 = vpop.f32.mrb[58].mxu0  ;;  %v288_v25 = vld [vmem:[#allocation2 + $0x78] sm:$0xff] }
 0x16d   : > { %1884 = vst.msk [vmem:[%s3080_s29 + $0xc] sm:$0xf] %vm1880_vm1, %v2179_v26  ;;  %v1631_v41 = vadd.f32 %v1535_v10, %v283_v7  ;;  %v1538_v24 = vadd.f32 %v2471_v19, %v3036_v43  ;;  %v2400_v42 = vpop.f32.mrb[59].mxu1  ;;  %v1529_v45 = vpop.f32.mrb[59].mxu0 }
 0x16e   : > { %1882 = vst.msk [vmem:[%s3080_s29 + $0x4] sm:$0xf] %vm1880_vm1, %v2177_v4  ;;  %v1694_v47 = vld [vmem:[#allocation2 + $0x30] sm:$0xff]  ;;  %v1629_v51 = vadd.f32 %v1527_v50, %v281_v28  ;;  %v2401_v54 = vadd.f32 %v2400_v42, %v2399_v46  ;;  %v1530_v52 = vadd.f32 %v1529_v45, %v3028_v31  ;;  %v3101_v55 = vadd.f32 %v2398_v2, %v3038_v12 }
 0x16f   : > { %v1726_v20 = vmax.f32 %v1694_v47, 0.0  ;;  %v1692_v56 = vld [vmem:[#allocation2 + $0x20] sm:$0xff]  ;;  %1663 = vst.msk [vmem:[#allocation2 + $0x50] sm:$0xff] %vm240_vm0, %v1631_v41  ;;  %v1632_v60 = vadd.f32 %v1538_v24, %v284_v37 }
 0x170   : > { %v1724_v43 = vmax.f32 %v1692_v56, 0.0  ;;  %v1695_v61 = vld [vmem:[#allocation2 + $0x38] sm:$0xff]  ;;  %1661 = vst.msk [vmem:[#allocation2 + $0x40] sm:$0xff] %vm240_vm0, %v1629_v51  ;;  %v1630_v62 = vadd.f32 %v1530_v52, %v282_v14  ;;  %v3106_v1 = vadd.f32 %v2401_v54, %v3040_v33  ;;  %v291_v52 = vld [vmem:[#allocation2 + $0x90] sm:$0xff] }
 0x171   : > { %v2182_v39 = vpack.c.bf16 %v1726_v20, %v1726_v20  ;;  %v1727_v31 = vmax.f32 %v1695_v61, 0.0  ;;  %v1693_v0 = vld [vmem:[#allocation2 + $0x28] sm:$0xff]  ;;  %1664 = vst.msk [vmem:[#allocation2 + $0x58] sm:$0xff] %vm240_vm0, %v1632_v60 }
 0x172   : > { %v2180_v12 = vpack.c.bf16 %v1724_v43, %v1724_v43  ;;  %v1725_v21 = vmax.f32 %v1693_v0, 0.0  ;;  %1662 = vst.msk [vmem:[#allocation2 + $0x48] sm:$0xff] %vm240_vm0, %v1630_v62  ;;  %v2402_v8 = vpop.f32.mrb[60].mxu1  ;;  %v2474_v9 = vpop.f32.mrb[60].mxu0  ;;  %v289_v43 = vld [vmem:[#allocation2 + $0x80] sm:$0xff] }
 0x173   : > { %1887 = vst.msk [vmem:[%s3080_s29 + $0x18] sm:$0xf] %vm1880_vm1, %v2182_v39  ;;  %v2183_v22 = vpack.c.bf16 %v1727_v31, %v1727_v31  ;;  %v1551_v33 = vadd.f32 %v2474_v9, %v3050_v36  ;;  %v2403_v48 = vpop.f32.mrb[61].mxu1  ;;  %v1542_v16 = vpop.f32.mrb[61].mxu0  ;;  %v286_v36 = vld [vmem:[#allocation2 + $0x68] sm:$0xff] }
 0x174   : > { %1885 = vst.msk [vmem:[%s3080_s29 + $0x10] sm:$0xf] %vm1880_vm1, %v2180_v12  ;;  %v2181_v30 = vpack.c.bf16 %v1725_v21, %v1725_v21  ;;  %v2404_v18 = vadd.f32 %v2403_v48, %v2402_v8  ;;  %v1543_v38 = vadd.f32 %v1542_v16, %v3042_v34  ;;  %v2405_v7 = vpop.f32.mrb[62].mxu1  ;;  %v2475_v26 = vpop.f32.mrb[62].mxu0  ;;  %v292_v12 = vld [vmem:[#allocation2 + $0x98] sm:$0xff] }
 0x175   : > { %1888 = vst.msk [vmem:[%s3080_s29 + $0x1c] sm:$0xf] %vm1880_vm1, %v2183_v22  ;;  %v1635_v10 = vadd.f32 %v1551_v33, %v287_v40  ;;  %v1554_v27 = vadd.f32 %v2475_v26, %v3052_v13  ;;  %v2406_v28 = vpop.f32.mrb[63].mxu1  ;;  %v1545_v49 = vpop.f32.mrb[63].mxu0 }
 0x176   : > { %1886 = vst.msk [vmem:[%s3080_s29 + $0x14] sm:$0xf] %vm1880_vm1, %v2181_v30  ;;  %v1698_v4 = vld [vmem:[#allocation2 + $0x50] sm:$0xff]  ;;  %v1633_v2 = vadd.f32 %v1543_v38, %v285_v15  ;;  %v2407_v50 = vadd.f32 %v2406_v28, %v2405_v7  ;;  %v1546_v46 = vadd.f32 %v1545_v49, %v3044_v58  ;;  %v3123_v34 = vadd.f32 %v2404_v18, %v3046_v44 }
 0x177   : > { %v1730_v37 = vmax.f32 %v1698_v4, 0.0  ;;  %v1696_v19 = vld [vmem:[#allocation2 + $0x40] sm:$0xff]  ;;  %1667 = vst.msk [vmem:[#allocation2 + $0x70] sm:$0xff] %vm240_vm0, %v1635_v10  ;;  %v1636_v41 = vadd.f32 %v1554_v27, %v288_v25  ;;  %v295_v49 = vld [vmem:[#allocation2 + $0xb0] sm:$0xff] }
 0x178   : > { %v1728_v13 = vmax.f32 %v1696_v19, 0.0  ;;  %v1699_v24 = vld [vmem:[#allocation2 + $0x58] sm:$0xff]  ;;  %1665 = vst.msk [vmem:[#allocation2 + $0x60] sm:$0xff] %vm240_vm0, %v1633_v2  ;;  %v1634_v42 = vadd.f32 %v1546_v46, %v286_v36  ;;  %v3128_v14 = vadd.f32 %v2407_v50, %v3048_v53  ;;  %v293_v46 = vld [vmem:[#allocation2 + $0xa0] sm:$0xff] }
 0x179   : > { %v2186_v45 = vpack.c.bf16 %v1730_v37, %v1730_v37  ;;  %v1731_v58 = vmax.f32 %v1699_v24, 0.0  ;;  %v1697_v47 = vld [vmem:[#allocation2 + $0x48] sm:$0xff]  ;;  %1668 = vst.msk [vmem:[#allocation2 + $0x78] sm:$0xff] %vm240_vm0, %v1636_v41 }
 0x17a   : > { %v2184_v44 = vpack.c.bf16 %v1728_v13, %v1728_v13  ;;  %v1729_v51 = vmax.f32 %v1697_v47, 0.0  ;;  %1666 = vst.msk [vmem:[#allocation2 + $0x68] sm:$0xff] %vm240_vm0, %v1634_v42  ;;  %v2408_v54 = vpop.f32.mrb[64].mxu1  ;;  %v2478_v20 = vpop.f32.mrb[64].mxu0  ;;  %v296_v42 = vld [vmem:[#allocation2 + $0xb8] sm:$0xff] }
 0x17b   : > { %1891 = vst.msk [vmem:[%s3080_s29 + $0x28] sm:$0xf] %vm1880_vm1, %v2186_v45  ;;  %v2187_v56 = vpack.c.bf16 %v1731_v58, %v1731_v58  ;;  %v1567_v53 = vadd.f32 %v2478_v20, %v3074_v6  ;;  %v2409_v60 = vpop.f32.mrb[65].mxu1  ;;  %v1558_v61 = vpop.f32.mrb[65].mxu0  ;;  %v290_v6 = vld [vmem:[#allocation2 + $0x88] sm:$0xff] }
 0x17c   : > { %1889 = vst.msk [vmem:[%s3080_s29 + $0x20] sm:$0xf] %vm1880_vm1, %v2184_v44  ;;  %v2185_v62 = vpack.c.bf16 %v1729_v51, %v1729_v51  ;;  %v2410_v39 = vadd.f32 %v2409_v60, %v2408_v54  ;;  %v1559_v31 = vadd.f32 %v1558_v61, %v3059_v3  ;;  %v2411_v0 = vpop.f32.mrb[66].mxu1  ;;  %v2479_v21 = vpop.f32.mrb[66].mxu0 }
 0x17d   : > { %1892 = vst.msk [vmem:[%s3080_s29 + $0x2c] sm:$0xf] %vm1880_vm1, %v2187_v56  ;;  %v1639_v8 = vadd.f32 %v1567_v53, %v291_v52  ;;  %v1570_v40 = vadd.f32 %v2479_v21, %v3084_v59  ;;  %v2412_v9 = vpop.f32.mrb[67].mxu1  ;;  %v1561_v22 = vpop.f32.mrb[67].mxu0 }
 0x17e   : > { %1890 = vst.msk [vmem:[%s3080_s29 + $0x24] sm:$0xf] %vm1880_vm1, %v2185_v62  ;;  %v1702_v33 = vld [vmem:[#allocation2 + $0x70] sm:$0xff]  ;;  %v1637_v48 = vadd.f32 %v1559_v31, %v289_v43  ;;  %v2413_v15 = vadd.f32 %v2412_v9, %v2411_v0  ;;  %v1562_v16 = vadd.f32 %v1561_v22, %v3064_v32  ;;  %v3145_v3 = vadd.f32 %v2410_v39, %v2990_v57 }
 0x17f   : > { %v1734_v30 = vmax.f32 %v1702_v33, 0.0  ;;  %v1700_v18 = vld [vmem:[#allocation2 + $0x60] sm:$0xff]  ;;  %1671 = vst.msk [vmem:[#allocation2 + $0x90] sm:$0xff] %vm240_vm0, %v1639_v8  ;;  %v1640_v38 = vadd.f32 %v1570_v40, %v292_v12  ;;  %v299_v8 = vld [vmem:[#allocation2 + $0xd0] sm:$0xff] }
 0x180   : > { %v1732_v59 = vmax.f32 %v1700_v18, 0.0  ;;  %v1703_v7 = vld [vmem:[#allocation2 + $0x78] sm:$0xff]  ;;  %1669 = vst.msk [vmem:[#allocation2 + $0x80] sm:$0xff] %vm240_vm0, %v1637_v48  ;;  %v1638_v25 = vadd.f32 %v1562_v16, %v290_v6  ;;  %v3150_v26 = vadd.f32 %v2413_v15, %v2992_v63 }
 0x181   : > { %v2190_v10 = vpack.c.bf16 %v1734_v30, %v1734_v30  ;;  %v1735_v32 = vmax.f32 %v1703_v7, 0.0  ;;  %v1701_v27 = vld [vmem:[#allocation2 + $0x68] sm:$0xff]  ;;  %1672 = vst.msk [vmem:[#allocation2 + $0x98] sm:$0xff] %vm240_vm0, %v1640_v38  ;;  %v300_v18 = vld [vmem:[#allocation2 + $0xd8] sm:$0xff] }
 0x182   : > { %v2188_v57 = vpack.c.bf16 %v1732_v59, %v1732_v59  ;;  %v1733_v28 = vmax.f32 %v1701_v27, 0.0  ;;  %1670 = vst.msk [vmem:[#allocation2 + $0x88] sm:$0xff] %vm240_vm0, %v1638_v25  ;;  %v2414_v36 = vpop.f32.mrb[68].mxu1  ;;  %v2482_v4 = vpop.f32.mrb[68].mxu0 }
 0x183   : > { %1895 = vst.msk [vmem:[%s3080_s29 + $0x38] sm:$0xf] %vm1880_vm1, %v2190_v10  ;;  %v2191_v2 = vpack.c.bf16 %v1735_v32, %v1735_v32  ;;  %v1583_v63 = vadd.f32 %v2482_v4, %v3123_v34  ;;  %v2415_v50 = vpop.f32.mrb[69].mxu1  ;;  %v1574_v37 = vpop.f32.mrb[69].mxu0  ;;  %v294_v34 = vld [vmem:[#allocation2 + $0xa8] sm:$0xff] }
 0x184   : > { %1893 = vst.msk [vmem:[%s3080_s29 + $0x30] sm:$0xf] %vm1880_vm1, %v2188_v57  ;;  %v2189_v19 = vpack.c.bf16 %v1733_v28, %v1733_v28  ;;  %v2416_v41 = vadd.f32 %v2415_v50, %v2414_v36  ;;  %v1575_v13 = vadd.f32 %v1574_v37, %v3101_v55  ;;  %v2417_v24 = vpop.f32.mrb[70].mxu1  ;;  %v2483_v45 = vpop.f32.mrb[70].mxu0  ;;  %v298_v10 = vld [vmem:[#allocation2 + $0xc8] sm:$0xff] }
 0x185   : > { %1896 = vst.msk [vmem:[%s3080_s29 + $0x3c] sm:$0xf] %vm1880_vm1, %v2191_v2  ;;  %v1643_v58 = vadd.f32 %v1583_v63, %v295_v49  ;;  %v1586_v47 = vadd.f32 %v2483_v45, %v3128_v14  ;;  %v2418_v44 = vpop.f32.mrb[71].mxu1  ;;  %v1577_v51 = vpop.f32.mrb[71].mxu0 }
 0x186   : > { %1894 = vst.msk [vmem:[%s3080_s29 + $0x34] sm:$0xf] %vm1880_vm1, %v2189_v19  ;;  %v1706_v54 = vld [vmem:[#allocation2 + $0x90] sm:$0xff]  ;;  %v1641_v52 = vadd.f32 %v1575_v13, %v293_v46  ;;  %v2419_v20 = vadd.f32 %v2418_v44, %v2417_v24  ;;  %v1578_v56 = vadd.f32 %v1577_v51, %v3106_v1  ;;  %v1438_v55 = vadd.f32 %v2416_v41, %v2994_v5 }
 0x187   : > { %v1738_v53 = vmax.f32 %v1706_v54, 0.0  ;;  %v1704_v60 = vld [vmem:[#allocation2 + $0x80] sm:$0xff]  ;;  %1675 = vst.msk [vmem:[#allocation2 + $0xb0] sm:$0xff] %vm240_vm0, %v1643_v58  ;;  %v1644_v43 = vadd.f32 %v1586_v47, %v296_v42 }
 0x188   : > { %v1736_v61 = vmax.f32 %v1704_v60, 0.0  ;;  %v1707_v14 = vld [vmem:[#allocation2 + $0x98] sm:$0xff]  ;;  %1673 = vst.msk [vmem:[#allocation2 + $0xa0] sm:$0xff] %vm240_vm0, %v1641_v52  ;;  %v1642_v62 = vadd.f32 %v1578_v56, %v294_v34  ;;  %v1441_v39 = vadd.f32 %v2419_v20, %v2996_v11  ;;  %v297_v11 = vld [vmem:[#allocation2 + $0xc0] sm:$0xff]  ;;  %v302_v56 = vld [vmem:[#allocation2 + $0xe8] sm:$0xff] }
 0x189   : > { %v2194_v31 = vpack.c.bf16 %v1738_v53, %v1738_v53  ;;  %v1739_v0 = vmax.f32 %v1707_v14, 0.0  ;;  %v1705_v12 = vld [vmem:[#allocation2 + $0x88] sm:$0xff]  ;;  %1676 = vst.msk [vmem:[#allocation2 + $0xb8] sm:$0xff] %vm240_vm0, %v1644_v43  ;;  %v301_v47 = vld [vmem:[#allocation2 + $0xe0] sm:$0xff] }
 0x18a   : > { %v2192_v5 = vpack.c.bf16 %v1736_v61, %v1736_v61  ;;  %v1737_v1 = vmax.f32 %v1705_v12, 0.0  ;;  %1674 = vst.msk [vmem:[#allocation2 + $0xa8] sm:$0xff] %vm240_vm0, %v1642_v62  ;;  %v2420_v21 = vpop.f32.mrb[72].mxu1  ;;  %v2486_v40 = vpop.f32.mrb[72].mxu0 }
 0x18b   : > { %1899 = vst.msk [vmem:[%s3080_s29 + $0x48] sm:$0xf] %vm1880_vm1, %v2194_v31  ;;  %v2195_v9 = vpack.c.bf16 %v1739_v0, %v1739_v0  ;;  %v1599_v6 = vadd.f32 %v2486_v40, %v1438_v55  ;;  %v2421_v22 = vpop.f32.mrb[73].mxu1  ;;  %v1590_v33 = vpop.f32.mrb[73].mxu0  ;;  %v303_v31 = vld [vmem:[#allocation2 + $0xf0] sm:$0xff] }
 0x18c   : > { %1897 = vst.msk [vmem:[%s3080_s29 + $0x40] sm:$0xf] %vm1880_vm1, %v2192_v5  ;;  %v2193_v48 = vpack.c.bf16 %v1737_v1, %v1737_v1  ;;  %v2422_v15 = vadd.f32 %v2421_v22, %v2420_v21  ;;  %v1591_v16 = vadd.f32 %v1590_v33, %v3145_v3  ;;  %v2423_v30 = vpop.f32.mrb[74].mxu1  ;;  %v2487_v38 = vpop.f32.mrb[74].mxu0 }
 0x18d   : > { %1900 = vst.msk [vmem:[%s3080_s29 + $0x4c] sm:$0xf] %vm1880_vm1, %v2195_v9  ;;  %v1647_v59 = vadd.f32 %v1599_v6, %v299_v8  ;;  %v1602_v7 = vadd.f32 %v2487_v38, %v1441_v39  ;;  %v2424_v25 = vpop.f32.mrb[75].mxu1  ;;  %v1593_v32 = vpop.f32.mrb[75].mxu0  ;;  %v304_v9 = vld [vmem:[#allocation2 + $0xf8] sm:$0xff] }
 0x18e   : > { %1898 = vst.msk [vmem:[%s3080_s29 + $0x44] sm:$0xf] %vm1880_vm1, %v2193_v48  ;;  %v1710_v27 = vld [vmem:[#allocation2 + $0xb0] sm:$0xff]  ;;  %v1645_v57 = vadd.f32 %v1591_v16, %v297_v11  ;;  %v2425_v28 = vadd.f32 %v2424_v25, %v2423_v30  ;;  %v1594_v36 = vadd.f32 %v1593_v32, %v3150_v26  ;;  %v1446_v49 = vadd.f32 %v2422_v15, %v2998_v17 }
 0x18f   : > { %v1742_v3 = vmax.f32 %v1710_v27, 0.0  ;;  %v1708_v4 = vld [vmem:[#allocation2 + $0xa0] sm:$0xff]  ;;  %1679 = vst.msk [vmem:[#allocation2 + $0xd0] sm:$0xff] %vm240_vm0, %v1647_v59  ;;  %v1648_v2 = vadd.f32 %v1602_v7, %v300_v18 }
 0x190   : > { %v1740_v63 = vmax.f32 %v1708_v4, 0.0  ;;  %v1711_v50 = vld [vmem:[#allocation2 + $0xb8] sm:$0xff]  ;;  %1677 = vst.msk [vmem:[#allocation2 + $0xc0] sm:$0xff] %vm240_vm0, %v1645_v57  ;;  %v1646_v46 = vadd.f32 %v1594_v36, %v298_v10  ;;  %v1449_v37 = vadd.f32 %v2425_v28, %v3000_v23 }
 0x191   : > { %v2198_v19 = vpack.c.bf16 %v1742_v3, %v1742_v3  ;;  %v1743_v41 = vmax.f32 %v1711_v50, 0.0  ;;  %v1709_v13 = vld [vmem:[#allocation2 + $0xa8] sm:$0xff]  ;;  %1680 = vst.msk [vmem:[#allocation2 + $0xd8] sm:$0xff] %vm240_vm0, %v1648_v2 }
 0x192   : > { %v2196_v17 = vpack.c.bf16 %v1740_v63, %v1740_v63  ;;  %v1741_v26 = vmax.f32 %v1709_v13, 0.0  ;;  %1678 = vst.msk [vmem:[#allocation2 + $0xc8] sm:$0xff] %vm240_vm0, %v1646_v46  ;;  %v2426_v24 = vpop.f32.mrb[76].mxu1  ;;  %v2490_v42 = vpop.f32.mrb[76].mxu0 }
 0x193   : > { %1903 = vst.msk [vmem:[%s3080_s29 + $0x58] sm:$0xf] %vm1880_vm1, %v2198_v19  ;;  %v2199_v45 = vpack.c.bf16 %v1743_v41, %v1743_v41  ;;  %v2427_v58 = vpop.f32.mrb[77].mxu1  ;;  %v1606_v44 = vpop.f32.mrb[77].mxu0 }
 0x194   : > { %1901 = vst.msk [vmem:[%s3080_s29 + $0x50] sm:$0xf] %vm1880_vm1, %v2196_v17  ;;  %v2197_v23 = vpack.c.bf16 %v1741_v26, %v1741_v26  ;;  %v2428_v34 = vadd.f32 %v2427_v58, %v2426_v24  ;;  %v1607_v51 = vadd.f32 %v1606_v44, %v1446_v49  ;;  %v2429_v54 = vpop.f32.mrb[78].mxu1  ;;  %v2491_v52 = vpop.f32.mrb[78].mxu0 }
 0x195   : > { %1904 = vst.msk [vmem:[%s3080_s29 + $0x5c] sm:$0xf] %vm1880_vm1, %v2199_v45  ;;  %v2430_v20 = vpop.f32.mrb[79].mxu1  ;;  %v1609_v55 = vpop.f32.mrb[79].mxu0 }
 0x196   : > { %1902 = vst.msk [vmem:[%s3080_s29 + $0x54] sm:$0xf] %vm1880_vm1, %v2197_v23  ;;  %v1714_v53 = vld [vmem:[#allocation2 + $0xd0] sm:$0xff]  ;;  %v1454_v60 = vadd.f32 %v2428_v34, %v3002_v29  ;;  %v1649_v43 = vadd.f32 %v1607_v51, %v301_v47  ;;  %v2431_v61 = vadd.f32 %v2430_v20, %v2429_v54  ;;  %v1610_v14 = vadd.f32 %v1609_v55, %v1449_v37 }
 0x197   : > { %v1746_v62 = vmax.f32 %v1714_v53, 0.0  ;;  %v1712_v39 = vld [vmem:[#allocation2 + $0xc0] sm:$0xff] }
 0x198   : > { %v1744_v0 = vmax.f32 %v1712_v39, 0.0  ;;  %v1715_v12 = vld [vmem:[#allocation2 + $0xd8] sm:$0xff]  ;;  %v1615_v5 = vadd.f32 %v2490_v42, %v1454_v60  ;;  %1681 = vst.msk [vmem:[#allocation2 + $0xe0] sm:$0xff] %vm240_vm0, %v1649_v43  ;;  %v1457_v1 = vadd.f32 %v2431_v61, %v3004_v35  ;;  %v1650_v21 = vadd.f32 %v1610_v14, %v302_v56 }
 0x199   : > { %v2202_v8 = vpack.c.bf16 %v1746_v62, %v1746_v62  ;;  %v1747_v29 = vmax.f32 %v1715_v12, 0.0  ;;  %v1713_v40 = vld [vmem:[#allocation2 + $0xc8] sm:$0xff] }
 0x19a   : > { %v2200_v6 = vpack.c.bf16 %v1744_v0, %v1744_v0  ;;  %v1745_v22 = vmax.f32 %v1713_v40, 0.0  ;;  %v1651_v11 = vadd.f32 %v1615_v5, %v303_v31  ;;  %v1618_v33 = vadd.f32 %v2491_v52, %v1457_v1  ;;  %1682 = vst.msk [vmem:[#allocation2 + $0xe8] sm:$0xff] %vm240_vm0, %v1650_v21 }
 0x19b   : > { %1907 = vst.msk [vmem:[%s3080_s29 + $0x68] sm:$0xf] %vm1880_vm1, %v2202_v8  ;;  %v2203_v48 = vpack.c.bf16 %v1747_v29, %v1747_v29 }
 0x19c   : > { %1905 = vst.msk [vmem:[%s3080_s29 + $0x60] sm:$0xf] %vm1880_vm1, %v2200_v6  ;;  %v2201_v35 = vpack.c.bf16 %v1745_v22, %v1745_v22  ;;  %v1652_v15 = vadd.f32 %v1618_v33, %v304_v9 }
 0x19d   : > { %1683 = vst.msk [vmem:[#allocation2 + $0xf0] sm:$0xff] %vm240_vm0, %v1651_v11 }
 0x19e   : > { %1908 = vst.msk [vmem:[%s3080_s29 + $0x6c] sm:$0xf] %vm1880_vm1, %v2203_v48  ;;  %1906 = vst.msk [vmem:[%s3080_s29 + $0x64] sm:$0xf] %vm1880_vm1, %v2201_v35 }
 0x19f   : > { %1684 = vst.msk [vmem:[#allocation2 + $0xf8] sm:$0xff] %vm240_vm0, %v1652_v15  ;;  %v1716_v16 = vld [vmem:[#allocation2 + $0xe0] sm:$0xff] }
 0x1a0   : > { %v1748_v30 = vmax.f32 %v1716_v16, 0.0 }
 0x1a1   : > { %v1717_v18 = vld [vmem:[#allocation2 + $0xe8] sm:$0xff] }
 0x1a2   : > { %v2204_v38 = vpack.c.bf16 %v1748_v30, %v1748_v30  ;;  %v1749_v59 = vmax.f32 %v1717_v18, 0.0 }
 0x1a4   : > { %v1718_v7 = vld [vmem:[#allocation2 + $0xf0] sm:$0xff]  ;;  %1909 = vst.msk [vmem:[%s3080_s29 + $0x70] sm:$0xf] %vm1880_vm1, %v2204_v38  ;;  %v2205_v10 = vpack.c.bf16 %v1749_v59, %v1749_v59 }
 0x1a5   : > { %v1750_v25 = vmax.f32 %v1718_v7, 0.0 }
 0x1a6   : > { %v1719_v32 = vld [vmem:[#allocation2 + $0xf8] sm:$0xff]  ;;  %1910 = vst.msk [vmem:[%s3080_s29 + $0x74] sm:$0xf] %vm1880_vm1, %v2205_v10 }
 0x1a7   : > { %v2206_v27 = vpack.c.bf16 %v1750_v25, %v1750_v25  ;;  %v1751_v57 = vmax.f32 %v1719_v32, 0.0 }
 0x1a9   : > { %1911 = vst.msk [vmem:[%s3080_s29 + $0x78] sm:$0xf] %vm1880_vm1, %v2206_v27  ;;  %v2207_v28 = vpack.c.bf16 %v1751_v57, %v1751_v57 }
 0x1ab   : > { %1912 = vst.msk [vmem:[%s3080_s29 + $0x7c] sm:$0xf] %vm1880_vm1, %v2207_v28 }
 0x1ac PF: > { %s13_s14 = sadd.s32 1, %s2703_s14   ;;  %s3231_s12 = smov %s2699_s13 }
 0x1ad   : > { %p10_p5 = scmp.ge.s32.totalorder %s13_s14, 4   ;;  %s3232_s13 = smov %s3234_s15 }
 0x1af   :  { %12 = sbr.rel (!%p10_p5) target bundleno = 2 (0x2), region = 73 }

// kernel: enhanced_cnn_policy_forward.7
= control target key start
LH: loop header
LB: loop body
LE: loop exit
PB: predicated region body
PF: predicated region fallthrough
CT: control target
= control target key end

     0   :  { %12 = vsyncpa [#allocation4], 0  ;;  %s2552_s24 = smov 0   ;;  %s2779_s0 = inlined_call_operand.vmem [shape: bf16[2,16384], index: 0, kind: input, shape index: {}]   ;;  %s2780_s1 = inlined_call_operand.vmem [shape: bf16[16384,32], index: 1, kind: input, shape index: {}]   ;;  %s2781_s2 = inlined_call_operand.vmem [shape: f32[1,32], index: 2, kind: input, shape index: {}]   ;;  %s2782_s3 = inlined_call_operand.vmem [shape: bf16[32,32], index: 3, kind: input, shape index: {}]   ;;  %s2783_s4 = inlined_call_operand.vmem [shape: f32[1,32], index: 4, kind: input, shape index: {}]   ;;  %s2784_s5 = inlined_call_operand.vmem [shape: bf16[32,4], index: 5, kind: input, shape index: {}]   ;;  %s2785_s6 = inlined_call_operand.vmem [shape: f32[1,4], index: 6, kind: input, shape index: {}]   ;;  %s2786_s7 = inlined_call_operand.hbm [shape: f32[2,4], index: 7, kind: output, shape index: {}]  }
   0x1 LB: > { %s2558_s25 = sadd.s32 4294967295, %s2506_s24   ;;  %p1969_p0 = scmp.ge.s32.totalorder %s2506_s24, 1  ;;  %s2506_s24 = sphi %s2552_s24, %s18_s24  }
   0x2   : > { %p244_p1 = scmp.lt.s32.totalorder %s2506_s24, 9 }
   0x4   : > { %p245_p2 = pnand %p1969_p0, %p244_p1 }
   0x5   : > { %s1970_s26 = sshll.u32 (!%p245_p2), %s2558_s25, 4  ;;  %s1971_s27 = sshll.u32 (!%p245_p2), %s2558_s25, 8 }
   0x6   : > { %248 = sbr.rel (%p245_p2) target bundleno = 861 (0x35d), region = 48  ;;  %p276_p3 = scmp.lt.s32.totalorder (!%p245_p2), %s1970_s26, 127 }
   0x7   : > { %p281_p4 = scmp.lt.s32.totalorder (!%p245_p2), %s1971_s27, 2047  ;;  %p1973_p5 = scmp.ne.s32.totalorder (!%p245_p2), %s2558_s25, 0 }
   0xd   : > { %s2788_s26 = smov (!%p276_p3, %s1970_s26), 127  ;;  %s2790_s27 = smov (!%p281_p4, %s1971_s27), 2047 }
   0xe   : > { %s2567_s30 = scalar_lea.vmem %s2779_s0, %s2788_s26  ;;  %s1972_s8 = sshll.u32 %s2790_s27, 2  ;;  %v1974_v0 = vld [vmem:[%s2781_s2] ss:$0 sm:$0xff] (!%p1973_p5)  ;;  %vm299_vm0 = vcmask (!%p1973_p5), 254976  }
   0xf   : > { %s2572_s11 = scalar_lea.vmem %s2780_s1, %s1972_s8  ;;  %290 = sbr.rel (%p1973_p5) target bundleno = 22 (0x16), region = 52  ;;  %300 = vst.msk [vmem:[#allocation2] sm:$0x3] (!%p1973_p5), %vm299_vm0, %v1974_v0 }
  0x16 PF: > { %v2332_v1 = vld [vmem:[%s2572_s11 + $0x40] sm:$0xff]   ;;  %v2336_v5 = vld [vmem:[%s2572_s11 + $0x48] sm:$0xff]   ;;  %v2340_v9 = vld [vmem:[%s2572_s11 + $0x50] sm:$0xff]   ;;  %v566_v29 = vlaneseq  ;;  %v2508_v37 = vmov 1966171168   ;;  %vm1765_vm1 = vcmask 254976  }
  0x17   : > { %v2333_v2 = vld [vmem:[%s2572_s11 + $0xc0] sm:$0xff]   ;;  %2116 = vmatprep.subr.bf16.mxu0 %v2332_v1  ;;  %v2337_v6 = vld [vmem:[%s2572_s11 + $0xc8] sm:$0xff]   ;;  %v2341_v10 = vld [vmem:[%s2572_s11 + $0xd0] sm:$0xff]   ;;  %v564_v38 = vunpack.c.l.s4 %v2508_v37  ;;  %p2103_p6 = scmp.ne.s32.totalorder %s2558_s25, 7 }
  0x18   : > { %v2334_v3 = vld [vmem:[%s2572_s11] sm:$0xff]   ;;  %2138 = vmatprep.subr.bf16.mxu1 %v2333_v2  ;;  %v2338_v7 = vld [vmem:[%s2572_s11 + $0x8] sm:$0xff]   ;;  %v2342_v11 = vld [vmem:[%s2572_s11 + $0x10] sm:$0xff]   ;;  %v567_v34 = vshrl.u32 %v566_v29, 7  ;;  %vm2510_vm2 = vmmov (!%p2103_p6), 0   ;;  %vm1797_vm3 = vcmask (!%p2103_p6), 261120  }
  0x19   : > { %v2335_v4 = vld [vmem:[%s2572_s11 + $0x80] sm:$0xff]   ;;  %2117 = vmatpush3.bf16.msra.mxu0 %v2334_v3  ;;  %v2339_v8 = vld [vmem:[%s2572_s11 + $0x88] sm:$0xff]   ;;  %v2343_v12 = vld [vmem:[%s2572_s11 + $0x90] sm:$0xff]   ;;  %v565_v41 = vunpack.c.0.s8 %v564_v38  ;;  %vm1909_vm4 = vcmask (!%p2103_p6), 25600  }
  0x1a   : > { %2139 = vmatpush3.bf16.msra.mxu1 %v2335_v4  ;;  %2118 = vmatprep.subr.bf16.mxu0 %v2336_v5  ;;  %v2344_v13 = vld [vmem:[%s2572_s11 + $0x58] sm:$0xff]   ;;  %v2348_v17 = vld [vmem:[%s2572_s11 + $0x60] sm:$0xff]   ;;  %v2352_v21 = vld [vmem:[%s2572_s11 + $0x68] sm:$0xff]  }
  0x1b   : > { %2140 = vmatprep.subr.bf16.mxu1 %v2337_v6  ;;  %v2345_v14 = vld [vmem:[%s2572_s11 + $0xd8] sm:$0xff]   ;;  %v2349_v18 = vld [vmem:[%s2572_s11 + $0xe0] sm:$0xff]   ;;  %v2353_v22 = vld [vmem:[%s2572_s11 + $0xe8] sm:$0xff]   ;;  %v2613_v42 = vsub.s32 %v565_v41, %v567_v34 }
  0x1c   : > { %v2346_v15 = vld [vmem:[%s2572_s11 + $0x18] sm:$0xff]   ;;  %v2350_v19 = vld [vmem:[%s2572_s11 + $0x20] sm:$0xff]   ;;  %v2354_v23 = vld [vmem:[%s2572_s11 + $0x28] sm:$0xff]  }
  0x1d   : > { %2119 = vmatpush3.bf16.msra.mxu0 %v2338_v7  ;;  %v2347_v16 = vld [vmem:[%s2572_s11 + $0x98] sm:$0xff]   ;;  %v2351_v20 = vld [vmem:[%s2572_s11 + $0xa0] sm:$0xff]   ;;  %v2355_v24 = vld [vmem:[%s2572_s11 + $0xa8] sm:$0xff]  }
  0x1e   : > { %2141 = vmatpush3.bf16.msra.mxu1 %v2339_v8  ;;  %2120 = vmatprep.subr.bf16.mxu0 %v2340_v9  ;;  %v2356_v25 = vld [vmem:[%s2572_s11 + $0x70] sm:$0xff]   ;;  %v2360_v30 = vld [vmem:[%s2572_s11 + $0x78] sm:$0xff]   ;;  %v302_v35 = vld [vmem:[%s2567_s30] sm:$0xff] }
  0x1f   : > { %2142 = vmatprep.subr.bf16.mxu1 %v2341_v10  ;;  %v2357_v26 = vld [vmem:[%s2572_s11 + $0xf0] sm:$0xff]   ;;  %v2361_v31 = vld [vmem:[%s2572_s11 + $0xf8] sm:$0xff]   ;;  %v2365_v36 = vld [vmem:[%s2572_s11 + $0x140] sm:$0xff]   ;;  %v562_v40 = vcombine.high %v302_v35, %v302_v35  ;;  %v569_v43 = vrot.slane %v302_v35, %v2613_v42 }
  0x20   : > { %v2358_v27 = vld [vmem:[%s2572_s11 + $0x30] sm:$0xff]   ;;  %v2362_v32 = vld [vmem:[%s2572_s11 + $0x38] sm:$0xff]   ;;  %v2366_v39 = vld [vmem:[%s2572_s11 + $0x1c0] sm:$0xff]  }
  0x21   : > { %2121 = vmatpush3.bf16.msra.mxu0 %v2342_v11  ;;  %v2359_v28 = vld [vmem:[%s2572_s11 + $0xb0] sm:$0xff]   ;;  %v2363_v33 = vld [vmem:[%s2572_s11 + $0xb8] sm:$0xff]   ;;  %v2617_v44 = vrot.slane %v562_v40, %v2613_v42  ;;  %v577_v45 = vcombine.high %v569_v43, %v569_v43  ;;  %v585_v46 = vrot.slane %v569_v43, %v2613_v42  ;;  %v2367_v49 = vld [vmem:[%s2572_s11 + $0x100] sm:$0xff]  }
  0x22   : > { %2143 = vmatpush3.bf16.msra.mxu1 %v2343_v12  ;;  %2122 = vmatprep.subr.bf16.mxu0 %v2344_v13  ;;  %v2369_v52 = vld [vmem:[%s2572_s11 + $0x148] sm:$0xff]   ;;  %v2368_v54 = vld [vmem:[%s2572_s11 + $0x180] sm:$0xff]   ;;  %v2373_v58 = vld [vmem:[%s2572_s11 + $0x150] sm:$0xff]  }
  0x23   : > { %2144 = vmatprep.subr.bf16.mxu1 %v2345_v14  ;;  %v578_v47 = vcombine.high %v2617_v44, %v2617_v44  ;;  %v599_v48 = vrot.slane %v577_v45, %v2613_v42  ;;  %v607_v51 = vcombine.high %v585_v46, %v585_v46  ;;  %v2370_v55 = vld [vmem:[%s2572_s11 + $0x1c8] sm:$0xff]   ;;  %v2374_v60 = vld [vmem:[%s2572_s11 + $0x1d0] sm:$0xff]   ;;  %v2377_v62 = vld [vmem:[%s2572_s11 + $0x158] sm:$0xff]  }
  0x24   : > { %v2371_v57 = vld [vmem:[%s2572_s11 + $0x108] sm:$0xff]   ;;  %v2375_v61 = vld [vmem:[%s2572_s11 + $0x110] sm:$0xff]   ;;  %v2378_v0 = vld [vmem:[%s2572_s11 + $0x1d8] sm:$0xff]  }
  0x25   : > { %2123 = vmatpush3.bf16.msra.mxu0 %v2346_v15  ;;  %v606_v50 = vrot.slane %v578_v47, %v2613_v42  ;;  %1476 = vmatprep.mubr.bf16.mxu0 %v599_v48  ;;  %v609_v53 = vcombine.high %v599_v48, %v599_v48  ;;  %v2372_v59 = vld [vmem:[%s2572_s11 + $0x188] sm:$0xff]   ;;  %v2376_v63 = vld [vmem:[%s2572_s11 + $0x190] sm:$0xff]   ;;  %v2379_v1 = vld [vmem:[%s2572_s11 + $0x118] sm:$0xff]  }
  0x26   : > { %2145 = vmatpush3.bf16.msra.mxu1 %v2347_v16  ;;  %2124 = vmatprep.subr.bf16.mxu0 %v2348_v17  ;;  %v2381_v2 = vld [vmem:[%s2572_s11 + $0x160] sm:$0xff]   ;;  %v2380_v3 = vld [vmem:[%s2572_s11 + $0x198] sm:$0xff]   ;;  %v2385_v6 = vld [vmem:[%s2572_s11 + $0x168] sm:$0xff]  }
  0x27   : > { %2146 = vmatprep.subr.bf16.mxu1 %v2349_v18  ;;  %v610_v56 = vcombine.high %v606_v50, %v606_v50  ;;  %1516 = vmatprep.mubr.bf16.mxu1 %v609_v53  ;;  %v2382_v4 = vld [vmem:[%s2572_s11 + $0x1e0] sm:$0xff]   ;;  %v2386_v8 = vld [vmem:[%s2572_s11 + $0x1e8] sm:$0xff]   ;;  %v2389_v10 = vld [vmem:[%s2572_s11 + $0x170] sm:$0xff]   ;;  %v592_v18 = vrot.slane %v2617_v44, %v2613_v42 }
  0x28   : > { %v2383_v5 = vld [vmem:[%s2572_s11 + $0x120] sm:$0xff]   ;;  %v2387_v9 = vld [vmem:[%s2572_s11 + $0x128] sm:$0xff]   ;;  %v2390_v12 = vld [vmem:[%s2572_s11 + $0x1f0] sm:$0xff]  }
  0x29   : > { %2125 = vmatpush3.bf16.msra.mxu0 %v2350_v19  ;;  %v2384_v7 = vld [vmem:[%s2572_s11 + $0x1a0] sm:$0xff]   ;;  %v2388_v11 = vld [vmem:[%s2572_s11 + $0x1a8] sm:$0xff]   ;;  %v2391_v13 = vld [vmem:[%s2572_s11 + $0x130] sm:$0xff]  }
  0x2a   : > { %2147 = vmatpush3.bf16.msra.mxu1 %v2351_v20  ;;  %2126 = vmatprep.subr.bf16.mxu0 %v2352_v21  ;;  %v2393_v14 = vld [vmem:[%s2572_s11 + $0x178] sm:$0xff]   ;;  %v2392_v15 = vld [vmem:[%s2572_s11 + $0x1b0] sm:$0xff]   ;;  %v2397_v19 = vld [vmem:[%s2572_s11 + $0x240] sm:$0xff]  }
  0x2b   : > { %2148 = vmatprep.subr.bf16.mxu1 %v2353_v22  ;;  %v2394_v16 = vld [vmem:[%s2572_s11 + $0x1f8] sm:$0xff]   ;;  %v2398_v21 = vld [vmem:[%s2572_s11 + $0x2c0] sm:$0xff]   ;;  %v2404_v29 = vld [vmem:[%s2572_s11 + $0x288] sm:$0xff]  }
  0x2c   : > { %v2395_v17 = vld [vmem:[%s2572_s11 + $0x138] sm:$0xff]   ;;  %v2399_v22 = vld [vmem:[%s2572_s11 + $0x200] sm:$0xff]   ;;  %v2417_v40 = vld [vmem:[%s2572_s11 + $0x268] sm:$0xff]  }
  0x2d   : > { %2127 = vmatpush3.bf16.msra.mxu0 %v2354_v23  ;;  %v2396_v20 = vld [vmem:[%s2572_s11 + $0x1b8] sm:$0xff]   ;;  %v608_v23 = vcombine.high %v592_v18, %v592_v18  ;;  %v2414_v38 = vld [vmem:[%s2572_s11 + $0x2e0] sm:$0xff]   ;;  %v2418_v43 = vld [vmem:[%s2572_s11 + $0x2e8] sm:$0xff]  }
  0x2e   : > { %2149 = vmatpush3.bf16.msra.mxu1 %v2355_v24  ;;  %2128 = vmatprep.subr.bf16.mxu0 %v2356_v25  ;;  %v2401_v24 = vld [vmem:[%s2572_s11 + $0x248] sm:$0xff]   ;;  %v2400_v25 = vld [vmem:[%s2572_s11 + $0x280] sm:$0xff]   ;;  %v2410_v34 = vld [vmem:[%s2572_s11 + $0x2d8] sm:$0xff]  }
  0x2f   : > { %2150 = vmatprep.subr.bf16.mxu1 %v2357_v26  ;;  %v2402_v26 = vld [vmem:[%s2572_s11 + $0x2c8] sm:$0xff]   ;;  %v2411_v35 = vld [vmem:[%s2572_s11 + $0x218] sm:$0xff]   ;;  %v2416_v41 = vld [vmem:[%s2572_s11 + $0x2a0] sm:$0xff]  }
  0x30   : > { %v2412_v37 = vld [vmem:[%s2572_s11 + $0x298] sm:$0xff]   ;;  %v2419_v44 = vld [vmem:[%s2572_s11 + $0x228] sm:$0xff]   ;;  %v2421_v45 = vld [vmem:[%s2572_s11 + $0x270] sm:$0xff]  }
  0x31   : > { %2129 = vmatpush3.bf16.msra.mxu0 %v2358_v27  ;;  %v2403_v27 = vld [vmem:[%s2572_s11 + $0x208] sm:$0xff]  }
  0x32   : > { %2151 = vmatpush3.bf16.msra.mxu1 %v2359_v28  ;;  %2130 = vmatprep.subr.bf16.mxu0 %v2360_v30  ;;  %v2405_v28 = vld [vmem:[%s2572_s11 + $0x250] sm:$0xff]   ;;  %v2420_v47 = vld [vmem:[%s2572_s11 + $0x2a8] sm:$0xff]  }
  0x33   : > { %2152 = vmatprep.subr.bf16.mxu1 %v2361_v31  ;;  %v2406_v30 = vld [vmem:[%s2572_s11 + $0x2d0] sm:$0xff]  }
  0x34   : > { %v2407_v31 = vld [vmem:[%s2572_s11 + $0x210] sm:$0xff]  }
  0x35   : > { %2131 = vmatpush3.bf16.msra.mxu0 %v2362_v32  ;;  %v2409_v32 = vld [vmem:[%s2572_s11 + $0x258] sm:$0xff]  }
  0x36   : > { %2153 = vmatpush3.bf16.msra.mxu1 %v2363_v33  ;;  %2160 = vmatprep.subr.bf16.mxu0 %v2365_v36  ;;  %v2408_v33 = vld [vmem:[%s2572_s11 + $0x290] sm:$0xff]   ;;  %v2413_v36 = vld [vmem:[%s2572_s11 + $0x260] sm:$0xff]  }
  0x37   : > { %2182 = vmatprep.subr.bf16.mxu1 %v2366_v39  ;;  %v2415_v39 = vld [vmem:[%s2572_s11 + $0x220] sm:$0xff]  }
  0x38   : > { %1477 = vmatmul.mubr.bf16.vlgmr.msra.gmra.mrb[0].mxu0 %v585_v46  ;;  %v303_v46 = vld [vmem:[%s2567_s30 + $0x8] sm:$0xff] }
  0x39   : > { %2161 = vmatpush3.bf16.msra.mxu0 %v2367_v49  ;;  %1517 = vmatmul.mubr.bf16.vlgmr.msra.gmra.mrb[0].mxu1 %v607_v51  ;;  %v618_v48 = vrot.slane %v303_v46, %v2613_v42  ;;  %v611_v49 = vcombine.high %v303_v46, %v303_v46  ;;  %v2423_v51 = vld [vmem:[%s2572_s11 + $0x230] sm:$0xff]  }
  0x3a   : > { %2162 = vmatprep.subr.bf16.mxu0 %v2369_v52  ;;  %2183 = vmatpush3.bf16.msra.mxu1 %v2368_v54  ;;  %v2425_v54 = vld [vmem:[%s2572_s11 + $0x278] sm:$0xff]  }
  0x3b   : > { %1556 = vmatprep.mubr.bf16.mxu0 %v606_v50  ;;  %2184 = vmatprep.subr.bf16.mxu1 %v2370_v55  ;;  %v2422_v50 = vld [vmem:[%s2572_s11 + $0x2f0] sm:$0xff]   ;;  %v626_v52 = vcombine.high %v618_v48, %v618_v48  ;;  %v2686_v53 = vrot.slane %v611_v49, %v2613_v42 }
  0x3c   : > { %1596 = vmatprep.mubr.bf16.mxu1 %v610_v56  ;;  %v2424_v55 = vld [vmem:[%s2572_s11 + $0x2b0] sm:$0xff]  }
  0x3d   : > { %2163 = vmatpush3.bf16.msra.mxu0 %v2371_v57  ;;  %v648_v56 = vrot.slane %v626_v52, %v2613_v42  ;;  %v627_v57 = vcombine.high %v2686_v53, %v2686_v53 }
  0x3e   : > { %2164 = vmatprep.subr.bf16.mxu0 %v2373_v58  ;;  %2185 = vmatpush3.bf16.msra.mxu1 %v2372_v59  ;;  %v2426_v58 = vld [vmem:[%s2572_s11 + $0x2f8] sm:$0xff]  }
  0x3f   : > { %2186 = vmatprep.subr.bf16.mxu1 %v2374_v60  ;;  %v2427_v59 = vld [vmem:[%s2572_s11 + $0x238] sm:$0xff]   ;;  %v658_v60 = vcombine.high %v648_v56, %v648_v56 }
  0x41   : > { %2165 = vmatpush3.bf16.msra.mxu0 %v2375_v61  ;;  %v634_v61 = vrot.slane %v618_v48, %v2613_v42 }
  0x42   : > { %2166 = vmatprep.subr.bf16.mxu0 %v2377_v62  ;;  %2187 = vmatpush3.bf16.msra.mxu1 %v2376_v63  ;;  %v2429_v62 = vld [vmem:[%s2572_s11 + $0x340] sm:$0xff]   ;;  %v2428_v63 = vld [vmem:[%s2572_s11 + $0x2b8] sm:$0xff]  }
  0x43   : > { %2188 = vmatprep.subr.bf16.mxu1 %v2378_v0  ;;  %v655_v0 = vrot.slane %v627_v57, %v2613_v42 }
  0x45   : > { %2167 = vmatpush3.bf16.msra.mxu0 %v2379_v1  ;;  %v2430_v1 = vld [vmem:[%s2572_s11 + $0x3c0] sm:$0xff]  }
  0x46   : > { %2168 = vmatprep.subr.bf16.mxu0 %v2381_v2  ;;  %2189 = vmatpush3.bf16.msra.mxu1 %v2380_v3  ;;  %v2431_v2 = vld [vmem:[%s2572_s11 + $0x300] sm:$0xff]   ;;  %v656_v3 = vcombine.high %v634_v61, %v634_v61 }
  0x47   : > { %2190 = vmatprep.subr.bf16.mxu1 %v2382_v4  ;;  %v2433_v4 = vld [vmem:[%s2572_s11 + $0x348] sm:$0xff]  }
  0x49   : > { %2169 = vmatpush3.bf16.msra.mxu0 %v2383_v5  ;;  %v2432_v5 = vld [vmem:[%s2572_s11 + $0x380] sm:$0xff]  }
  0x4a   : > { %2170 = vmatprep.subr.bf16.mxu0 %v2385_v6  ;;  %2191 = vmatpush3.bf16.msra.mxu1 %v2384_v7  ;;  %v659_v6 = vcombine.high %v655_v0, %v655_v0  ;;  %v2434_v7 = vld [vmem:[%s2572_s11 + $0x3c8] sm:$0xff]  }
  0x4b   : > { %2192 = vmatprep.subr.bf16.mxu1 %v2386_v8  ;;  %v2435_v8 = vld [vmem:[%s2572_s11 + $0x308] sm:$0xff]  }
  0x4d   : > { %2171 = vmatpush3.bf16.msra.mxu0 %v2387_v9  ;;  %v2437_v9 = vld [vmem:[%s2572_s11 + $0x350] sm:$0xff]  }
  0x4e   : > { %2172 = vmatprep.subr.bf16.mxu0 %v2389_v10  ;;  %2193 = vmatpush3.bf16.msra.mxu1 %v2388_v11  ;;  %v2436_v10 = vld [vmem:[%s2572_s11 + $0x388] sm:$0xff]   ;;  %v2438_v11 = vld [vmem:[%s2572_s11 + $0x3d0] sm:$0xff]  }
  0x4f   : > { %2194 = vmatprep.subr.bf16.mxu1 %v2390_v12  ;;  %v2439_v12 = vld [vmem:[%s2572_s11 + $0x310] sm:$0xff]  }
  0x51   : > { %2173 = vmatpush3.bf16.msra.mxu0 %v2391_v13  ;;  %v2441_v13 = vld [vmem:[%s2572_s11 + $0x358] sm:$0xff]  }
  0x52   : > { %2174 = vmatprep.subr.bf16.mxu0 %v2393_v14  ;;  %2195 = vmatpush3.bf16.msra.mxu1 %v2392_v15  ;;  %v2440_v14 = vld [vmem:[%s2572_s11 + $0x390] sm:$0xff]   ;;  %v2442_v15 = vld [vmem:[%s2572_s11 + $0x3d8] sm:$0xff]  }
  0x53   : > { %2196 = vmatprep.subr.bf16.mxu1 %v2394_v16  ;;  %v2443_v16 = vld [vmem:[%s2572_s11 + $0x318] sm:$0xff]  }
  0x55   : > { %2175 = vmatpush3.bf16.msra.mxu0 %v2395_v17  ;;  %v2445_v17 = vld [vmem:[%s2572_s11 + $0x360] sm:$0xff]  }
  0x56   : > { %2204 = vmatprep.subr.bf16.mxu0 %v2397_v19  ;;  %2197 = vmatpush3.bf16.msra.mxu1 %v2396_v20  ;;  %v2446_v19 = vld [vmem:[%s2572_s11 + $0x3e0] sm:$0xff]  }
  0x57   : > { %2226 = vmatprep.subr.bf16.mxu1 %v2398_v21  ;;  %v2447_v20 = vld [vmem:[%s2572_s11 + $0x320] sm:$0xff]   ;;  %v2449_v21 = vld [vmem:[%s2572_s11 + $0x368] sm:$0xff]  }
  0x58   : > { %1557 = vmatmul.mubr.bf16.vlgmr.msra.gmra.mrb[4].mxu0 %v592_v18  ;;  %v2444_v18 = vld [vmem:[%s2572_s11 + $0x398] sm:$0xff]  }
  0x59   : > { %2205 = vmatpush3.bf16.msra.mxu0 %v2399_v22  ;;  %1597 = vmatmul.mubr.bf16.vlgmr.msra.gmra.mrb[4].mxu1 %v608_v23  ;;  %v2448_v22 = vld [vmem:[%s2572_s11 + $0x3a0] sm:$0xff]   ;;  %v2450_v23 = vld [vmem:[%s2572_s11 + $0x3e8] sm:$0xff]  }
  0x5a   : > { %2206 = vmatprep.subr.bf16.mxu0 %v2401_v24  ;;  %2227 = vmatpush3.bf16.msra.mxu1 %v2400_v25  ;;  %v2451_v24 = vld [vmem:[%s2572_s11 + $0x328] sm:$0xff]   ;;  %v2453_v25 = vld [vmem:[%s2572_s11 + $0x370] sm:$0xff]  }
  0x5b   : > { %2228 = vmatprep.subr.bf16.mxu1 %v2402_v26  ;;  %1636 = vmatprep.mubr.bf16.mxu0 %v648_v56  ;;  %v2452_v26 = vld [vmem:[%s2572_s11 + $0x3a8] sm:$0xff]  }
  0x5c   : > { %1676 = vmatprep.mubr.bf16.mxu1 %v658_v60 }
  0x5d   : > { %2207 = vmatpush3.bf16.msra.mxu0 %v2403_v27  ;;  %v2454_v27 = vld [vmem:[%s2572_s11 + $0x3f0] sm:$0xff]  }
  0x5e   : > { %2208 = vmatprep.subr.bf16.mxu0 %v2405_v28  ;;  %2229 = vmatpush3.bf16.msra.mxu1 %v2404_v29  ;;  %v2455_v28 = vld [vmem:[%s2572_s11 + $0x330] sm:$0xff]   ;;  %v2457_v29 = vld [vmem:[%s2572_s11 + $0x378] sm:$0xff]  }
  0x5f   : > { %2230 = vmatprep.subr.bf16.mxu1 %v2406_v30  ;;  %v2456_v30 = vld [vmem:[%s2572_s11 + $0x3b0] sm:$0xff]  }
  0x61   : > { %2209 = vmatpush3.bf16.msra.mxu0 %v2407_v31  ;;  %v2458_v31 = vld [vmem:[%s2572_s11 + $0x3f8] sm:$0xff]  }
  0x62   : > { %2210 = vmatprep.subr.bf16.mxu0 %v2409_v32  ;;  %2231 = vmatpush3.bf16.msra.mxu1 %v2408_v33  ;;  %v2459_v32 = vld [vmem:[%s2572_s11 + $0x338] sm:$0xff]   ;;  %v641_v33 = vrot.slane %v2686_v53, %v2613_v42 }
  0x63   : > { %2232 = vmatprep.subr.bf16.mxu1 %v2410_v34  ;;  %v2460_v34 = vld [vmem:[%s2572_s11 + $0x3b8] sm:$0xff]  }
  0x65   : > { %2211 = vmatpush3.bf16.msra.mxu0 %v2411_v35  ;;  %v657_v35 = vcombine.high %v641_v33, %v641_v33 }
  0x66   : > { %2212 = vmatprep.subr.bf16.mxu0 %v2413_v36  ;;  %2233 = vmatpush3.bf16.msra.mxu1 %v2412_v37 }
  0x67   : > { %2234 = vmatprep.subr.bf16.mxu1 %v2414_v38 }
  0x69   : > { %2213 = vmatpush3.bf16.msra.mxu0 %v2415_v39 }
  0x6a   : > { %2214 = vmatprep.subr.bf16.mxu0 %v2417_v40  ;;  %2235 = vmatpush3.bf16.msra.mxu1 %v2416_v41 }
  0x6b   : > { %2236 = vmatprep.subr.bf16.mxu1 %v2418_v43 }
  0x6d   : > { %2215 = vmatpush3.bf16.msra.mxu0 %v2419_v44 }
  0x6e   : > { %2216 = vmatprep.subr.bf16.mxu0 %v2421_v45  ;;  %2237 = vmatpush3.bf16.msra.mxu1 %v2420_v47 }
  0x6f   : > { %2238 = vmatprep.subr.bf16.mxu1 %v2422_v50 }
  0x71   : > { %2217 = vmatpush3.bf16.msra.mxu0 %v2423_v51 }
  0x72   : > { %2218 = vmatprep.subr.bf16.mxu0 %v2425_v54  ;;  %2239 = vmatpush3.bf16.msra.mxu1 %v2424_v55 }
  0x73   : > { %2240 = vmatprep.subr.bf16.mxu1 %v2426_v58 }
  0x75   : > { %2219 = vmatpush3.bf16.msra.mxu0 %v2427_v59 }
  0x76   : > { %2248 = vmatprep.subr.bf16.mxu0 %v2429_v62  ;;  %2241 = vmatpush3.bf16.msra.mxu1 %v2428_v63 }
  0x77   : > { %2270 = vmatprep.subr.bf16.mxu1 %v2430_v1 }
  0x78   : > { %1637 = vmatmul.mubr.bf16.vlgmr.msra.gmra.mrb[8].mxu0 %v634_v61 }
  0x79   : > { %2249 = vmatpush3.bf16.msra.mxu0 %v2431_v2  ;;  %1716 = vmatprep.mubr.bf16.mxu0 %v655_v0 }
  0x7a   : > { %1677 = vmatmul.mubr.bf16.vlgmr.msra.gmra.mrb[8].mxu1 %v656_v3  ;;  %2250 = vmatprep.subr.bf16.mxu0 %v2433_v4 }
  0x7b   : > { %2271 = vmatpush3.bf16.msra.mxu1 %v2432_v5  ;;  %1756 = vmatprep.mubr.bf16.mxu1 %v659_v6 }
  0x7c   : > { %2272 = vmatprep.subr.bf16.mxu1 %v2434_v7 }
  0x7d   : > { %2251 = vmatpush3.bf16.msra.mxu0 %v2435_v8 }
  0x7e   : > { %2252 = vmatprep.subr.bf16.mxu0 %v2437_v9 }
  0x7f   : > { %2273 = vmatpush3.bf16.msra.mxu1 %v2436_v10 }
  0x80   : > { %2274 = vmatprep.subr.bf16.mxu1 %v2438_v11 }
  0x81   : > { %2253 = vmatpush3.bf16.msra.mxu0 %v2439_v12 }
  0x82   : > { %2254 = vmatprep.subr.bf16.mxu0 %v2441_v13 }
  0x83   : > { %2275 = vmatpush3.bf16.msra.mxu1 %v2440_v14 }
  0x84   : > { %2276 = vmatprep.subr.bf16.mxu1 %v2442_v15 }
  0x85   : > { %2255 = vmatpush3.bf16.msra.mxu0 %v2443_v16 }
  0x86   : > { %2256 = vmatprep.subr.bf16.mxu0 %v2445_v17  ;;  %v301_v17 = vld [vmem:[#allocation2] sm:$0x3] }
  0x87   : > { %2277 = vmatpush3.bf16.msra.mxu1 %v2444_v18 }
  0x88   : > { %2278 = vmatprep.subr.bf16.mxu1 %v2446_v19 }
  0x89   : > { %2257 = vmatpush3.bf16.msra.mxu0 %v2447_v20 }
  0x8a   : > { %2258 = vmatprep.subr.bf16.mxu0 %v2449_v21  ;;  %v2462_v21 = vld [vmem:[%s2782_s3] sm:$0xff] (!%p2103_p6)  }
  0x8b   : > { %2279 = vmatpush3.bf16.msra.mxu1 %v2448_v22  ;;  %v2509_v22 = vmov (!%p2103_p6), 0.0  }
  0x8c   : > { %2280 = vmatprep.subr.bf16.mxu1 %v2450_v23  ;;  %v2463_v23 = vld [vmem:[%s2782_s3 + $0x8] sm:$0xff] (!%p2103_p6)  }
  0x8d   : > { %2259 = vmatpush3.bf16.msra.mxu0 %v2451_v24 }
  0x8e   : > { %2260 = vmatprep.subr.bf16.mxu0 %v2453_v25 }
  0x8f   : > { %2281 = vmatpush3.bf16.msra.mxu1 %v2452_v26 }
  0x90   : > { %2282 = vmatprep.subr.bf16.mxu1 %v2454_v27  ;;  %v2464_v27 = vld [vmem:[%s2784_s5] sm:$0xff] (!%p2103_p6)  }
  0x91   : > { %2261 = vmatpush3.bf16.msra.mxu0 %v2455_v28  ;;  %v2465_v28 = vld [vmem:[%s2784_s5 + $0x8] sm:$0xff] (!%p2103_p6)  }
  0x92   : > { %2262 = vmatprep.subr.bf16.mxu0 %v2457_v29  ;;  %v2104_v29 = vld [vmem:[%s2783_s4] ss:$0 sm:$0xff] (!%p2103_p6) }
  0x93   : > { %2283 = vmatpush3.bf16.msra.mxu1 %v2456_v30 }
  0x94   : > { %2284 = vmatprep.subr.bf16.mxu1 %v2458_v31 }
  0x95   : > { %2263 = vmatpush3.bf16.msra.mxu0 %v2459_v32 }
  0x96   : > { %2298 = vmatprep.subr.bf16.mxu0 (!%p2103_p6), %v2509_v22 }
  0x97   : > { %2285 = vmatpush3.bf16.msra.mxu1 %v2460_v34 }
  0x98   : > { %1717 = vmatmul.mubr.bf16.vlgmr.msra.gmra.mrb[12].mxu0 %v641_v33  ;;  %2306 = vmatprep.subr.bf16.mxu1 (!%p2103_p6), %v2509_v22 }
  0x99   : > { %2299 = vmatpush3.bf16.msra.mxu0 (!%p2103_p6), %v2462_v21  ;;  %2302 = vmatprep.mubr.msk.bf16.mxu0 (!%p2103_p6), %vm2510_vm2, %v2509_v22 }
  0x9a   : > { %1757 = vmatmul.mubr.bf16.vlgmr.msra.gmra.mrb[12].mxu1 %v657_v35  ;;  %2300 = vmatprep.subr.bf16.mxu0 (!%p2103_p6), %v2509_v22 }
  0x9b   : > { %2310 = vmatprep.mubr.msk.bf16.mxu1 (!%p2103_p6), %vm2510_vm2, %v2509_v22  ;;  %2307 = vmatpush3.bf16.msra.mxu1 (!%p2103_p6), %v2464_v27 }
  0x9c   : > { %2308 = vmatprep.subr.bf16.mxu1 (!%p2103_p6), %v2509_v22 }
  0x9d   : > { %2301 = vmatpush3.bf16.msra.mxu0 (!%p2103_p6), %v2463_v23 }
  0x9f   : > { %2309 = vmatpush3.bf16.msra.mxu1 (!%p2103_p6), %v2465_v28 }
 0x10b   : > { %v2132_v36 = vpop.f32.mrb[0].mxu0 }
 0x10c   : > { %v2133_v37 = vpop.f32.mrb[1].mxu0  ;;  %v2154_v38 = vpop.f32.mrb[0].mxu1 }
 0x10d   : > { %v2134_v39 = vadd.f32 %v2133_v37, %v2132_v36  ;;  %v2135_v40 = vpop.f32.mrb[2].mxu0  ;;  %v2155_v41 = vpop.f32.mrb[1].mxu1  ;;  %v2108_v37 = vld [vmem:[%s2785_s6] ss:$0 sm:$0xff] (!%p2103_p6) }
 0x10e   : > { %v2136_v43 = vpop.f32.mrb[3].mxu0  ;;  %v2156_v44 = vadd.f32 %v2155_v41, %v2154_v38  ;;  %v2157_v45 = vpop.f32.mrb[2].mxu1 }
 0x10f   : > { %v2158_v46 = vpop.f32.mrb[3].mxu1 }
 0x110   : > { %v1519_v47 = vadd.f32 %v2156_v44, %v2134_v39 }
 0x12b   : > { %v2176_v42 = vpop.f32.mrb[4].mxu0 }
 0x12c   : > { %v2177_v48 = vpop.f32.mrb[5].mxu0  ;;  %v2198_v49 = vpop.f32.mrb[4].mxu1 }
 0x12d   : > { %v2178_v50 = vadd.f32 %v2177_v48, %v2176_v42  ;;  %v2179_v51 = vpop.f32.mrb[6].mxu0  ;;  %v2199_v52 = vpop.f32.mrb[5].mxu1 }
 0x12e   : > { %v2180_v53 = vpop.f32.mrb[7].mxu0  ;;  %v2200_v55 = vadd.f32 %v2199_v52, %v2198_v49  ;;  %v2201_v56 = vpop.f32.mrb[6].mxu1 }
 0x12f   : > { %v1559_v54 = vadd.f32 %v2178_v50, %v1519_v47  ;;  %v2202_v57 = vpop.f32.mrb[7].mxu1 }
 0x131   : > { %v1599_v58 = vadd.f32 %v2200_v55, %v1559_v54 }
 0x14b   : > { %v2220_v59 = vpop.f32.mrb[8].mxu0 }
 0x14c   : > { %v2221_v60 = vpop.f32.mrb[9].mxu0 }
 0x14d   : > { %v2242_v61 = vpop.f32.mrb[8].mxu1  ;;  %v2222_v62 = vadd.f32 %v2221_v60, %v2220_v59  ;;  %v2223_v63 = vpop.f32.mrb[10].mxu0 }
 0x14e   : > { %v2243_v0 = vpop.f32.mrb[9].mxu1  ;;  %v2224_v1 = vpop.f32.mrb[11].mxu0 }
 0x14f   : > { %v1639_v2 = vadd.f32 %v2222_v62, %v1599_v58  ;;  %v2244_v3 = vadd.f32 %v2243_v0, %v2242_v61  ;;  %v2245_v4 = vpop.f32.mrb[10].mxu1 }
 0x150   : > { %v2246_v5 = vpop.f32.mrb[11].mxu1 }
 0x151   : > { %v1679_v6 = vadd.f32 %v2244_v3, %v1639_v2 }
 0x16b   : > { %v2264_v7 = vpop.f32.mrb[12].mxu0 }
 0x16c   : > { %v2265_v8 = vpop.f32.mrb[13].mxu0 }
 0x16d   : > { %v2286_v9 = vpop.f32.mrb[12].mxu1  ;;  %v2266_v10 = vadd.f32 %v2265_v8, %v2264_v7  ;;  %v2267_v11 = vpop.f32.mrb[14].mxu0 }
 0x16e   : > { %v2287_v12 = vpop.f32.mrb[13].mxu1  ;;  %v2268_v13 = vpop.f32.mrb[15].mxu0 }
 0x16f   : > { %v1719_v14 = vadd.f32 %v2266_v10, %v1679_v6  ;;  %v2288_v15 = vadd.f32 %v2287_v12, %v2286_v9  ;;  %v2289_v16 = vpop.f32.mrb[14].mxu1  ;;  %1770 = sbr.rel (%p2103_p6) target bundleno = 836 (0x344), region = 56 }
 0x170   : > { %v2290_v18 = vpop.f32.mrb[15].mxu1 }
 0x171   : > { %v1759_v19 = vadd.f32 %v2288_v15, %v1719_v14 }
 0x173   : > { %v1764_v20 = vadd.f32 %v1759_v19, %v301_v17 }
 0x175   : > { %1766 = vst.msk [vmem:[#allocation2] sm:$0x3] %vm1765_vm1, %v1764_v20 }
 0x17c   : > { %v1771_v24 = vld [vmem:[#allocation2] sm:$0x3] }
 0x17d   : > { %2466 = vtanh.f32 %v1771_v24 }
 0x187   : > { %v2467_v25 = vpop.eup %2466 }
 0x188   : > { %v1773_v26 = vpack.c.bf16 %v2467_v25, %v2467_v25 }
 0x18a   : > { %2303 = vmatmul.mubr.msk.bf16.vlgmr.msra.gmra.mrb[0].mxu0 %vm1797_vm3, %v1773_v26 }
 0x25d   : > { %v1835_v30 = vpop.f32.mrb[0].mxu0 }
 0x25e   : > { %v1836_v31 = vadd.f32 %v2104_v29, %v1835_v30  ;;  %v2304_v32 = vpop.f32.mrb[1].mxu0 }
 0x25f   : > { %v1838_v33 = vpop.f32.mrb[2].mxu0 }
 0x260   : > { %2468 = vtanh.f32 %v1836_v31  ;;  %v2305_v34 = vpop.f32.mrb[3].mxu0 }
 0x26a   : > { %v2469_v35 = vpop.eup %2468 }
 0x26b   : > { %v1842_v36 = vpack.c.bf16 %v2469_v35, %v2469_v35 }
 0x26d   : > { %2311 = vmatmul.mubr.msk.bf16.vlgmr.msra.gmra.mrb[0].mxu1 %vm1797_vm3, %v1842_v36 }
 0x340   : > { %v1903_v38 = vpop.f32.mrb[0].mxu1 }
 0x341   : > { %v1904_v39 = vadd.f32 %v2108_v37, %v1903_v38  ;;  %v2312_v40 = vpop.f32.mrb[1].mxu1 }
 0x342   : > { %v1906_v41 = vpop.f32.mrb[2].mxu1 }
 0x343   : > { %1910 = vst.msk [vmem:[#allocation3] sm:$0x3] %vm1909_vm4, %v1904_v39  ;;  %v2313_v43 = vpop.f32.mrb[3].mxu1 }
 0x344 PF: > { %p2318_p7 = scmp.eq.s32.totalorder %s2558_s25, 7  ;;  %s2511_s28 = smov [#allocation3]  }
 0x345   : > { %s1918_s29 = sshll.u32 %s2511_s28, 4  ;;  %s1919_s29 = int_to_ptr.vmem [resolvable:$true] %s1918_s29 }
 0x346   : > { %s2470_s30 = scalar_lea.vmem %s1919_s29, 32  ;;  %p2477_p11 = scmp.lt.s32.totalorder %s1919_s29, %s1919_s29 }
 0x347   : > { %p2471_p8 = scmp.ne.s32.totalorder %s1919_s29, %s2470_s30  ;;  %p2478_p12 = scmp.lt.s32.totalorder %s2470_s30, %s2470_s30 }
 0x349   : > { %p2472_p9 = pnand %p2471_p8, %p2318_p7  ;;  %p2479_p13 = por %p2478_p12, %p2477_p11 }
 0x34b   : > { %p2473_p10 = pneg %p2472_p9 }
 0x34d   : > { %p2480_p0 = pnand %p2479_p13, %p2473_p10 }
 0x34f   : > { %2483 = shalt.err (!%p2480_p0)
}
 0x350   : > { %s2484_s10 = scalar_lea.hbm %s2786_s7, 32 }
 0x351   : > { %p2485_p1 = scmp.ne.s32.totalorder %s2786_s7, %s2484_s10  ;;  %p2490_p4 = scmp.lt.u32.totalorder %s2484_s10, %s2786_s7 }
 0x353   : > { %p2486_p2 = pnand %p2485_p1, %p2318_p7 }
 0x355   : > { %p2487_p3 = pneg %p2486_p2 }
 0x357   : > { %p2492_p5 = pnand %p2490_p4, %p2487_p3 }
 0x359   : > { %2495 = shalt.err (!%p2492_p5)
}
 0x35a   : > { %2315 = dma.vmem_to_hbm [thread:$0]  (%p2318_p7), %s1919_s29, 32, %s2786_s7, [#allocation4]  }
 0x35b   : > { %2501 = dma.done.wait (%p2318_p7), [#allocation4], 32  }
 0x35c   : > { %2503 = vsyncadd (%p2318_p7), [#allocation4], 4294967264 }
 0x35d PF: > { %s18_s24 = sadd.s32 1, %s2506_s24  }
 0x35e   : > { %p15_p6 = scmp.ge.s32.totalorder %s18_s24, 10  }
 0x360   :  { %17 = sbr.rel (!%p15_p6) target bundleno = 1 (0x1), region = 86 }
 0x367   :  { %1931 = vsyncpa [#allocation4], 1 }
 0x368   :  { %1933 = vsyncpa [#allocation4 + $0x1], 1 }

</bundles_post_ra>
